<compile_context>
chip_gen: v6e
topology: v6e:2x2x1
jax: 0.10.0
libtpu: 0.0.40
codegen_flags: <defaults>
</compile_context>

<pallas_src>
import functools

import jax
import jax.numpy as jnp
from jax.experimental import pallas as pl
from jax.experimental.pallas import tpu as pltpu


def _fused_encoder_kernel(x_ref, w1_ref, b1_ref, w2_ref, b2_ref, o_ref,
                          xpad_ref, hpad_ref, *, H, W, Cin, Chid, BB):
    """Fused 3x3 conv+ReLU -> 3x3 conv+ReLU for BB batch elements per grid step.

    x_ref:    (BB, H, W*Cin)             f32   row-major inputs, channels minor
    w1_ref:   (3, W*Cin,  W*Chid)        bf16  banded per-kh weights, layer 1
    b1_ref:   (1, W*Chid)                f32   bias tiled across W, layer 1
    w2_ref:   (3, W*Chid, W*Chid)        bf16  banded per-kh weights, layer 2
    b2_ref:   (1, W*Chid)                f32   bias tiled across W, layer 2
    o_ref:    (BB, H, W*Chid)            f32   lane-dense outputs (512 lanes)
    xpad_ref: VMEM (BB*(H+1)+1, W*Cin)   f32   zero-separated layer-1 input slab
    hpad_ref: VMEM (BB*(H+1)+1, W*Chid)  f32   zero-separated layer-1 activation slab

    Slab layout: row k*(H+1) is a zero separator (k = 0..BB); image b occupies rows
    b*(H+1)+1 .. b*(H+1)+H.  GEMM row m = b*(H+1)+i yields conv output (b, i); the
    BB-1 rows that straddle two images are junk and simply never stored.
    """
    P = H + 1                       # row pitch per image inside the slab
    Mtot = BB * P - 1               # GEMM M (valid rows interleaved with junk rows)

    def conv_rows(pad_ref, w_ref, b_ref):
        # out = relu( sum_kh pad[kh:kh+Mtot, :] @ w[kh] + b )
        # Row slabs are pure sublane-offset slices (no lane shifts, no per-tap
        # reshape); kw taps + SAME padding live in the banded weight.
        acc = jnp.dot(pad_ref[0:Mtot, :].astype(jnp.bfloat16), w_ref[0],
                      preferred_element_type=jnp.float32)
        for kh in (1, 2):
            acc = acc + jnp.dot(pad_ref[kh:kh + Mtot, :].astype(jnp.bfloat16),
                                w_ref[kh],
                                preferred_element_type=jnp.float32)
        return jnp.maximum(acc + b_ref[...], 0.0)          # (Mtot, W*Cout) f32

    # ---- layer 1: halo-only zeroing + per-image interior stores ------------
    zrow_x = jnp.zeros((1, W * Cin), jnp.float32)
    for k in range(BB + 1):                                 # BB+1 separator rows
        xpad_ref[k * P:k * P + 1, :] = zrow_x
    for b in range(BB):                                     # interior fully written
        xpad_ref[b * P + 1:b * P + 1 + H, :] = x_ref[b]
    h = conv_rows(xpad_ref, w1_ref, b1_ref)                 # (Mtot, W*Chid) f32

    # ---- layer 2: activation stays in VMEM, never touches HBM --------------
    # Write the whole accumulator (junk rows land exactly on separator rows),
    # THEN re-zero the separators; order matters.
    hpad_ref[1:1 + Mtot, :] = h
    zrow_h = jnp.zeros((1, W * Chid), jnp.float32)
    for k in range(BB + 1):
        hpad_ref[k * P:k * P + 1, :] = zrow_h
    out = conv_rows(hpad_ref, w2_ref, b2_ref)               # (Mtot, W*Chid) f32

    for b in range(BB):                                     # lane-dense stores
        o_ref[b] = out[b * P:b * P + H, :]


def _banded_weights(w_oihw, W, dtype=jnp.bfloat16):
    """(Cout, Cin, 3, 3) -> (3, W*Cin, W*Cout) banded GEMM weights.

    For tap (kh, kw), output column block j draws from input column block
    j + kw - 1; out-of-range source blocks get ZERO weight entries, which
    implements SAME padding along W without any extra zero column blocks
    (K stays exactly W*C, MXU-aligned).
    """
    Cout, Cin = int(w_oihw.shape[0]), int(w_oihw.shape[1])
    w_t = jnp.transpose(w_oihw, (2, 3, 1, 0)).astype(jnp.float32)  # (kh,kw,Cin,Cout)
    cols = jnp.arange(W)
    blocks = jnp.arange(W)
    slabs = []
    for kh in range(3):
        wb = jnp.zeros((W * Cin, W * Cout), jnp.float32)
        for kw in range(3):
            src = cols + (kw - 1)                     # image column feeding output j
            valid = (src >= 0) & (src < W)            # OOB -> zero contribution
            sel = ((src[None, :] == blocks[:, None]) & valid[None, :]
                   ).astype(jnp.float32)              # (src_block, out_block)
            wb = wb + jnp.kron(sel, w_t[kh, kw])      # W*Cin x W*Cout
        slabs.append(wb)
    return jnp.stack(slabs, axis=0).astype(dtype)


def prepare_encoder_params(params, W):
    """Build the banded GEMM weights / tiled biases ONCE (static inference weights)."""
    Chid = int(params["w1"].shape[0])
    return {
        "w1b": _banded_weights(params["w1"], W),                            # (3, W*Cin,  W*Chid)
        "w2b": _banded_weights(params["w2"], W),                            # (3, W*Chid, W*Chid)
        "b1t": jnp.tile(params["b1"].astype(jnp.float32), W).reshape(1, W * Chid),
        "b2t": jnp.tile(params["b2"].astype(jnp.float32), W).reshape(1, W * Chid),
    }


def _pick_batch_block(N, H, target_rows=256):
    """Largest divisor of N such that the GEMM M stays <= target_rows and the grid
    keeps >= 2 steps (so both v7x TensorCores get work) whenever N >= 2."""
    best = 1
    for bb in range(1, N + 1):
        if N % bb:
            continue
        if bb * (H + 1) + 1 > target_rows:
            continue
        if N >= 2 and N // bb < 2:
            continue
        best = bb
    return best


def stgc_autoencoder_forward(x_nchw, prepared):
    """Matches STGCAutoencoder.forward: returns the encoded feature map (NCHW)."""
    N, Cin, H, W = (int(d) for d in x_nchw.shape)
    Chid = int(prepared["b1t"].shape[1]) // W

    BB = _pick_batch_block(N, H)
    G = N // BB
    Mpad = BB * (H + 1) + 1

    # Layout plumbing in plain JAX: NCHW -> (N, H, W*Cin) row-major, channels minor.
    x_rows = jnp.transpose(x_nchw, (0, 2, 3, 1)).reshape(N, H, W * Cin)
    x_rows = x_rows.astype(jnp.float32)

    kernel = functools.partial(_fused_encoder_kernel,
                               H=H, W=W, Cin=Cin, Chid=Chid, BB=BB)

    # Advisory cost for XLA's scheduler (banded-GEMM MAC count, dominant bytes).
    flops = 2 * N * H * (3 * W * Cin + 3 * W * Chid) * (W * Chid)
    bytes_accessed = (N * H * W * Cin * 4 + N * H * W * Chid * 4
                      + 3 * W * Cin * W * Chid * 2 + 3 * W * Chid * W * Chid * 2
                      + 2 * 4 * W * Chid)

    out_rows = pl.pallas_call(
        kernel,
        out_shape=jax.ShapeDtypeStruct((N, H, W * Chid), jnp.float32),
        grid=(G,),
        in_specs=[
            pl.BlockSpec((BB, H, W * Cin), lambda n: (n, 0, 0)),
            pl.BlockSpec((3, W * Cin, W * Chid), lambda n: (0, 0, 0)),
            pl.BlockSpec((1, W * Chid), lambda n: (0, 0)),
            pl.BlockSpec((3, W * Chid, W * Chid), lambda n: (0, 0, 0)),
            pl.BlockSpec((1, W * Chid), lambda n: (0, 0)),
        ],
        out_specs=pl.BlockSpec((BB, H, W * Chid), lambda n: (n, 0, 0)),
        scratch_shapes=[
            pltpu.VMEM((Mpad, W * Cin), jnp.float32),
            pltpu.VMEM((Mpad, W * Chid), jnp.float32),
        ],
        compiler_params=pltpu.CompilerParams(
            # Batch blocks are independent -> shards across v7x's two
            # TensorCores; harmless sequential loop on v5e / v6e.
            dimension_semantics=("parallel",),
        ),
        cost_estimate=pl.CostEstimate(flops=flops, transcendentals=0,
                                      bytes_accessed=bytes_accessed),
    )(x_rows, prepared["w1b"], prepared["b1t"], prepared["w2b"], prepared["b2t"])

    # (N, H, W*Chid) -> (N, H, W, Chid) -> NCHW (free layout plumbing).
    return jnp.transpose(out_rows.reshape(N, H, W, Chid), (0, 3, 1, 2))


def init_params(key, input_dim, hidden_dim):
    """Deterministic synthetic parameters matching the PyTorch __init__ shapes."""
    ks = jax.random.split(key, 8)

    def conv_w(k, cout, cin):
        fan_in = cin * 9
        bound = 1.0 / jnp.sqrt(fan_in)
        return jax.random.uniform(k, (cout, cin, 3, 3), jnp.float32, -bound, bound)

    def conv_b(k, cout, cin):
        fan_in = cin * 9
        bound = 1.0 / jnp.sqrt(fan_in)
        return jax.random.uniform(k, (cout,), jnp.float32, -bound, bound)

    return {
        # encoder (used by forward)
        "w1": conv_w(ks[0], hidden_dim, input_dim),
        "b1": conv_b(ks[1], hidden_dim, input_dim),
        "w2": conv_w(ks[2], hidden_dim, hidden_dim),
        "b2": conv_b(ks[3], hidden_dim, hidden_dim),
        # decoder params exist in the module but are NOT used by forward()
        "dw1": conv_w(ks[4], hidden_dim, hidden_dim),
        "db1": conv_b(ks[5], hidden_dim, hidden_dim),
        "dw2": conv_w(ks[6], input_dim, hidden_dim),
        "db2": conv_b(ks[7], input_dim, hidden_dim),
    }


def _reference_forward(x_nchw, params):
    """lax-conv reference with the same bf16 operand rounding as the kernel."""
    def conv_relu(x, w, b):
        xb = x.astype(jnp.bfloat16).astype(jnp.float32)
        wb = w.astype(jnp.bfloat16).astype(jnp.float32)
        y = jax.lax.conv_general_dilated(
            xb, wb, window_strides=(1, 1), padding="SAME",
            dimension_numbers=("NCHW", "OIHW", "NCHW"),
            precision=jax.lax.Precision.HIGHEST)
        return jnp.maximum(y + b[None, :, None, None], 0.0)

    h = conv_relu(x_nchw, params["w1"], params["b1"])
    return conv_relu(h, params["w2"], params["b2"])


if __name__ == "__main__":
    # batch=4 exercises the batch-blocked path (BB=2 images per grid step, grid=2).
    batch, input_dim, hidden_dim, spatial = 4, 4, 32, 16

    key = jax.random.PRNGKey(0)
    k_x, k_p = jax.random.split(key)
    x = jax.random.normal(k_x, (batch, input_dim, spatial, spatial), jnp.float32)
    params = init_params(k_p, input_dim, hidden_dim)

    # Banded weights / tiled biases built once, outside the per-call jitted forward.
    prepared = prepare_encoder_params(params, spatial)

    fwd = jax.jit(stgc_autoencoder_forward)
    out = jax.block_until_ready(fwd(x, prepared))

    ref = _reference_forward(x, params)
    assert out.shape == (batch, hidden_dim, spatial, spatial), out.shape
    assert jnp.allclose(out, ref, atol=2e-3, rtol=2e-3), float(
        jnp.max(jnp.abs(out - ref)))

    print("KERNEL_OK")
</pallas_src>

<mosaic_0001>
module attributes {stable_mosaic.version = 11 : i64} {
  func.func @_fused_encoder_kernel(%arg0: i32, %arg1: memref<2x16x64xf32, #tpu.memory_space<vmem>>, %arg2: memref<3x64x512xbf16, #tpu.memory_space<vmem>>, %arg3: memref<1x512xf32, #tpu.memory_space<vmem>>, %arg4: memref<3x512x512xbf16, #tpu.memory_space<vmem>>, %arg5: memref<1x512xf32, #tpu.memory_space<vmem>>, %arg6: memref<2x16x512xf32, #tpu.memory_space<vmem>>, %arg7: memref<35x64xf32, #tpu.memory_space<vmem>>, %arg8: memref<35x512xf32, #tpu.memory_space<vmem>>) attributes {dimension_semantics = [#tpu.dimension_semantics<parallel>], iteration_bounds = array<i64: 2>, scalar_prefetch = 0 : i64, scratch_operands = 2 : i64, tpu.core_type = #tpu.core_type<tc>, window_params = [{transform_indices = @transform_0, window_bounds = array<i64: 2, 16, 64>}, {pipeline_mode = #tpu.pipeline_mode<synchronous>, transform_indices = @transform_1, window_bounds = array<i64: 3, 64, 512>}, {pipeline_mode = #tpu.pipeline_mode<synchronous>, transform_indices = @transform_2, window_bounds = array<i64: 1, 512>}, {pipeline_mode = #tpu.pipeline_mode<synchronous>, transform_indices = @transform_3, window_bounds = array<i64: 3, 512, 512>}, {pipeline_mode = #tpu.pipeline_mode<synchronous>, transform_indices = @transform_4, window_bounds = array<i64: 1, 512>}, {transform_indices = @transform_5, window_bounds = array<i64: 2, 16, 512>}]} {
    %cst = arith.constant 0.000000e+00 : f32
    %0 = vector.broadcast %cst : f32 to vector<1x64xf32>
    %c0 = arith.constant 0 : index
    %c0_0 = arith.constant 0 : index
    %1 = vector.load %arg7[%c0, %c0_0] : memref<35x64xf32, #tpu.memory_space<vmem>>, vector<1x64xf32>
    tpu.vector_store %arg7[%c0, %c0_0], %0 {strides = array<i32>} : memref<35x64xf32, #tpu.memory_space<vmem>>, vector<1x64xf32>,
    %c17 = arith.constant 17 : index
    %c0_1 = arith.constant 0 : index
    %2 = vector.load %arg7[%c17, %c0_1] : memref<35x64xf32, #tpu.memory_space<vmem>>, vector<1x64xf32>
    tpu.vector_store %arg7[%c17, %c0_1], %0 {strides = array<i32>} : memref<35x64xf32, #tpu.memory_space<vmem>>, vector<1x64xf32>,
    %c34 = arith.constant 34 : index
    %c0_2 = arith.constant 0 : index
    %3 = vector.load %arg7[%c34, %c0_2] : memref<35x64xf32, #tpu.memory_space<vmem>>, vector<1x64xf32>
    tpu.vector_store %arg7[%c34, %c0_2], %0 {strides = array<i32>} : memref<35x64xf32, #tpu.memory_space<vmem>>, vector<1x64xf32>,
    %c0_3 = arith.constant 0 : index
    %c0_4 = arith.constant 0 : index
    %c0_5 = arith.constant 0 : index
    %4 = vector.load %arg1[%c0_3, %c0_4, %c0_5] : memref<2x16x64xf32, #tpu.memory_space<vmem>>, vector<1x16x64xf32>
    %5 = vector.shape_cast %4 : vector<1x16x64xf32> to vector<16x64xf32>
    %c1 = arith.constant 1 : index
    %c0_6 = arith.constant 0 : index
    %6 = vector.load %arg7[%c1, %c0_6] : memref<35x64xf32, #tpu.memory_space<vmem>>, vector<16x64xf32>
    tpu.vector_store %arg7[%c1, %c0_6], %5 {strides = array<i32>} : memref<35x64xf32, #tpu.memory_space<vmem>>, vector<16x64xf32>,
    %c1_7 = arith.constant 1 : index
    %c0_8 = arith.constant 0 : index
    %c0_9 = arith.constant 0 : index
    %7 = vector.load %arg1[%c1_7, %c0_8, %c0_9] : memref<2x16x64xf32, #tpu.memory_space<vmem>>, vector<1x16x64xf32>
    %8 = vector.shape_cast %7 : vector<1x16x64xf32> to vector<16x64xf32>
    %c18 = arith.constant 18 : index
    %c0_10 = arith.constant 0 : index
    %9 = vector.load %arg7[%c18, %c0_10] : memref<35x64xf32, #tpu.memory_space<vmem>>, vector<16x64xf32>
    tpu.vector_store %arg7[%c18, %c0_10], %8 {strides = array<i32>} : memref<35x64xf32, #tpu.memory_space<vmem>>, vector<16x64xf32>,
    %c0_11 = arith.constant 0 : index
    %c0_12 = arith.constant 0 : index
    %10 = vector.load %arg7[%c0_11, %c0_12] : memref<35x64xf32, #tpu.memory_space<vmem>>, vector<33x64xf32>
    %11 = arith.truncf %10 : vector<33x64xf32> to vector<33x64xbf16>
    %c0_13 = arith.constant 0 : index
    %c0_14 = arith.constant 0 : index
    %c0_15 = arith.constant 0 : index
    %12 = vector.load %arg2[%c0_13, %c0_14, %c0_15] : memref<3x64x512xbf16, #tpu.memory_space<vmem>>, vector<1x64x512xbf16>
    %13 = vector.shape_cast %12 : vector<1x64x512xbf16> to vector<64x512xbf16>
    %cst_16 = arith.constant dense<0.000000e+00> : vector<33x512xf32>
    %14 = tpu.matmul %11, %13, %cst_16 {dimension_numbers = #tpu.dot_dimension_numbers<[1], [0], [0], [1], [0, 0, 1, 1], [], []>} : vector<33x64xbf16>, vector<64x512xbf16>, vector<33x512xf32> -> vector<33x512xf32>
    %c1_17 = arith.constant 1 : index
    %c0_18 = arith.constant 0 : index
    %15 = vector.load %arg7[%c1_17, %c0_18] : memref<35x64xf32, #tpu.memory_space<vmem>>, vector<33x64xf32>
    %16 = arith.truncf %15 : vector<33x64xf32> to vector<33x64xbf16>
    %c1_19 = arith.constant 1 : index
    %c0_20 = arith.constant 0 : index
    %c0_21 = arith.constant 0 : index
    %17 = vector.load %arg2[%c1_19, %c0_20, %c0_21] : memref<3x64x512xbf16, #tpu.memory_space<vmem>>, vector<1x64x512xbf16>
    %18 = vector.shape_cast %17 : vector<1x64x512xbf16> to vector<64x512xbf16>
    %cst_22 = arith.constant dense<0.000000e+00> : vector<33x512xf32>
    %19 = tpu.matmul %16, %18, %cst_22 {dimension_numbers = #tpu.dot_dimension_numbers<[1], [0], [0], [1], [0, 0, 1, 1], [], []>} : vector<33x64xbf16>, vector<64x512xbf16>, vector<33x512xf32> -> vector<33x512xf32>
    %20 = arith.addf %14, %19 : vector<33x512xf32>
    %c2 = arith.constant 2 : index
    %c0_23 = arith.constant 0 : index
    %21 = vector.load %arg7[%c2, %c0_23] : memref<35x64xf32, #tpu.memory_space<vmem>>, vector<33x64xf32>
    %22 = arith.truncf %21 : vector<33x64xf32> to vector<33x64xbf16>
    %c2_24 = arith.constant 2 : index
    %c0_25 = arith.constant 0 : index
    %c0_26 = arith.constant 0 : index
    %23 = vector.load %arg2[%c2_24, %c0_25, %c0_26] : memref<3x64x512xbf16, #tpu.memory_space<vmem>>, vector<1x64x512xbf16>
    %24 = vector.shape_cast %23 : vector<1x64x512xbf16> to vector<64x512xbf16>
    %cst_27 = arith.constant dense<0.000000e+00> : vector<33x512xf32>
    %25 = tpu.matmul %22, %24, %cst_27 {dimension_numbers = #tpu.dot_dimension_numbers<[1], [0], [0], [1], [0, 0, 1, 1], [], []>} : vector<33x64xbf16>, vector<64x512xbf16>, vector<33x512xf32> -> vector<33x512xf32>
    %26 = arith.addf %20, %25 : vector<33x512xf32>
    %c0_28 = arith.constant 0 : index
    %c0_29 = arith.constant 0 : index
    %27 = vector.load %arg3[%c0_28, %c0_29] : memref<1x512xf32, #tpu.memory_space<vmem>>, vector<1x512xf32>
    %28 = vector.broadcast %27 : vector<1x512xf32> to vector<33x512xf32>
    %29 = arith.addf %26, %28 : vector<33x512xf32>
    %cst_30 = arith.constant 0.000000e+00 : f32
    %30 = vector.broadcast %cst_30 : f32 to vector<33x512xf32>
    %31 = arith.maximumf %29, %30 : vector<33x512xf32>
    %c1_31 = arith.constant 1 : index
    %c0_32 = arith.constant 0 : index
    %32 = vector.load %arg8[%c1_31, %c0_32] : memref<35x512xf32, #tpu.memory_space<vmem>>, vector<33x512xf32>
    tpu.vector_store %arg8[%c1_31, %c0_32], %31 {strides = array<i32>} : memref<35x512xf32, #tpu.memory_space<vmem>>, vector<33x512xf32>,
    %cst_33 = arith.constant 0.000000e+00 : f32
    %33 = vector.broadcast %cst_33 : f32 to vector<1x512xf32>
    %c0_34 = arith.constant 0 : index
    %c0_35 = arith.constant 0 : index
    %34 = vector.load %arg8[%c0_34, %c0_35] : memref<35x512xf32, #tpu.memory_space<vmem>>, vector<1x512xf32>
    tpu.vector_store %arg8[%c0_34, %c0_35], %33 {strides = array<i32>} : memref<35x512xf32, #tpu.memory_space<vmem>>, vector<1x512xf32>,
    %c17_36 = arith.constant 17 : index
    %c0_37 = arith.constant 0 : index
    %35 = vector.load %arg8[%c17_36, %c0_37] : memref<35x512xf32, #tpu.memory_space<vmem>>, vector<1x512xf32>
    tpu.vector_store %arg8[%c17_36, %c0_37], %33 {strides = array<i32>} : memref<35x512xf32, #tpu.memory_space<vmem>>, vector<1x512xf32>,
    %c34_38 = arith.constant 34 : index
    %c0_39 = arith.constant 0 : index
    %36 = vector.load %arg8[%c34_38, %c0_39] : memref<35x512xf32, #tpu.memory_space<vmem>>, vector<1x512xf32>
    tpu.vector_store %arg8[%c34_38, %c0_39], %33 {strides = array<i32>} : memref<35x512xf32, #tpu.memory_space<vmem>>, vector<1x512xf32>,
    %c0_40 = arith.constant 0 : index
    %c0_41 = arith.constant 0 : index
    %37 = vector.load %arg8[%c0_40, %c0_41] : memref<35x512xf32, #tpu.memory_space<vmem>>, vector<33x512xf32>
    %38 = arith.truncf %37 : vector<33x512xf32> to vector<33x512xbf16>
    %c0_42 = arith.constant 0 : index
    %c0_43 = arith.constant 0 : index
    %c0_44 = arith.constant 0 : index
    %39 = vector.load %arg4[%c0_42, %c0_43, %c0_44] : memref<3x512x512xbf16, #tpu.memory_space<vmem>>, vector<1x512x512xbf16>
    %40 = vector.shape_cast %39 : vector<1x512x512xbf16> to vector<512x512xbf16>
    %cst_45 = arith.constant dense<0.000000e+00> : vector<33x512xf32>
    %41 = tpu.matmul %38, %40, %cst_45 {dimension_numbers = #tpu.dot_dimension_numbers<[1], [0], [0], [1], [0, 0, 1, 1], [], []>} : vector<33x512xbf16>, vector<512x512xbf16>, vector<33x512xf32> -> vector<33x512xf32>
    %c1_46 = arith.constant 1 : index
    %c0_47 = arith.constant 0 : index
    %42 = vector.load %arg8[%c1_46, %c0_47] : memref<35x512xf32, #tpu.memory_space<vmem>>, vector<33x512xf32>
    %43 = arith.truncf %42 : vector<33x512xf32> to vector<33x512xbf16>
    %c1_48 = arith.constant 1 : index
    %c0_49 = arith.constant 0 : index
    %c0_50 = arith.constant 0 : index
    %44 = vector.load %arg4[%c1_48, %c0_49, %c0_50] : memref<3x512x512xbf16, #tpu.memory_space<vmem>>, vector<1x512x512xbf16>
    %45 = vector.shape_cast %44 : vector<1x512x512xbf16> to vector<512x512xbf16>
    %cst_51 = arith.constant dense<0.000000e+00> : vector<33x512xf32>
    %46 = tpu.matmul %43, %45, %cst_51 {dimension_numbers = #tpu.dot_dimension_numbers<[1], [0], [0], [1], [0, 0, 1, 1], [], []>} : vector<33x512xbf16>, vector<512x512xbf16>, vector<33x512xf32> -> vector<33x512xf32>
    %47 = arith.addf %41, %46 : vector<33x512xf32>
    %c2_52 = arith.constant 2 : index
    %c0_53 = arith.constant 0 : index
    %48 = vector.load %arg8[%c2_52, %c0_53] : memref<35x512xf32, #tpu.memory_space<vmem>>, vector<33x512xf32>
    %49 = arith.truncf %48 : vector<33x512xf32> to vector<33x512xbf16>
    %c2_54 = arith.constant 2 : index
    %c0_55 = arith.constant 0 : index
    %c0_56 = arith.constant 0 : index
    %50 = vector.load %arg4[%c2_54, %c0_55, %c0_56] : memref<3x512x512xbf16, #tpu.memory_space<vmem>>, vector<1x512x512xbf16>
    %51 = vector.shape_cast %50 : vector<1x512x512xbf16> to vector<512x512xbf16>
    %cst_57 = arith.constant dense<0.000000e+00> : vector<33x512xf32>
    %52 = tpu.matmul %49, %51, %cst_57 {dimension_numbers = #tpu.dot_dimension_numbers<[1], [0], [0], [1], [0, 0, 1, 1], [], []>} : vector<33x512xbf16>, vector<512x512xbf16>, vector<33x512xf32> -> vector<33x512xf32>
    %53 = arith.addf %47, %52 : vector<33x512xf32>
    %c0_58 = arith.constant 0 : index
    %c0_59 = arith.constant 0 : index
    %54 = vector.load %arg5[%c0_58, %c0_59] : memref<1x512xf32, #tpu.memory_space<vmem>>, vector<1x512xf32>
    %55 = vector.broadcast %54 : vector<1x512xf32> to vector<33x512xf32>
    %56 = arith.addf %53, %55 : vector<33x512xf32>
    %cst_60 = arith.constant 0.000000e+00 : f32
    %57 = vector.broadcast %cst_60 : f32 to vector<33x512xf32>
    %58 = arith.maximumf %56, %57 : vector<33x512xf32>
    %59 = vector.extract_strided_slice %58 {offsets = [0, 0], sizes = [16, 512], strides = [1, 1]} : vector<33x512xf32> to vector<16x512xf32>
    %c0_61 = arith.constant 0 : index
    %c0_62 = arith.constant 0 : index
    %c0_63 = arith.constant 0 : index
    %60 = vector.load %arg6[%c0_61, %c0_62, %c0_63] : memref<2x16x512xf32, #tpu.memory_space<vmem>>, vector<1x16x512xf32>
    %61 = vector.shape_cast %60 : vector<1x16x512xf32> to vector<16x512xf32>
    %62 = vector.shape_cast %59 : vector<16x512xf32> to vector<1x16x512xf32>
    tpu.vector_store %arg6[%c0_61, %c0_62, %c0_63], %62 {strides = array<i32>} : memref<2x16x512xf32, #tpu.memory_space<vmem>>, vector<1x16x512xf32>,
    %63 = vector.extract_strided_slice %58 {offsets = [17, 0], sizes = [16, 512], strides = [1, 1]} : vector<33x512xf32> to vector<16x512xf32>
    %c1_64 = arith.constant 1 : index
    %c0_65 = arith.constant 0 : index
    %c0_66 = arith.constant 0 : index
    %64 = vector.load %arg6[%c1_64, %c0_65, %c0_66] : memref<2x16x512xf32, #tpu.memory_space<vmem>>, vector<1x16x512xf32>
    %65 = vector.shape_cast %64 : vector<1x16x512xf32> to vector<16x512xf32>
    %66 = vector.shape_cast %63 : vector<16x512xf32> to vector<1x16x512xf32>
    tpu.vector_store %arg6[%c1_64, %c0_65, %c0_66], %66 {strides = array<i32>} : memref<2x16x512xf32, #tpu.memory_space<vmem>>, vector<1x16x512xf32>,
    return
  }
  func.func @transform_0(%arg0: i32) -> (i32, i32, i32) {
    %c0_i32 = arith.constant 0 : i32
    %c0_i32_0 = arith.constant 0 : i32
    %c0_i32_1 = arith.constant 0 : i32
    return %arg0, %c0_i32, %c0_i32_0 : i32, i32, i32
  }
  func.func @transform_1(%arg0: i32) -> (i32, i32, i32) {
    %c0_i32 = arith.constant 0 : i32
    %c0_i32_0 = arith.constant 0 : i32
    %c0_i32_1 = arith.constant 0 : i32
    %c0_i32_2 = arith.constant 0 : i32
    return %c0_i32, %c0_i32_0, %c0_i32_1 : i32, i32, i32
  }
  func.func @transform_2(%arg0: i32) -> (i32, i32) {
    %c0_i32 = arith.constant 0 : i32
    %c0_i32_0 = arith.constant 0 : i32
    %c0_i32_1 = arith.constant 0 : i32
    return %c0_i32, %c0_i32_0 : i32, i32
  }
  func.func @transform_3(%arg0: i32) -> (i32, i32, i32) {
    %c0_i32 = arith.constant 0 : i32
    %c0_i32_0 = arith.constant 0 : i32
    %c0_i32_1 = arith.constant 0 : i32
    %c0_i32_2 = arith.constant 0 : i32
    return %c0_i32, %c0_i32_0, %c0_i32_1 : i32, i32, i32
  }
  func.func @transform_4(%arg0: i32) -> (i32, i32) {
    %c0_i32 = arith.constant 0 : i32
    %c0_i32_0 = arith.constant 0 : i32
    %c0_i32_1 = arith.constant 0 : i32
    return %c0_i32, %c0_i32_0 : i32, i32
  }
  func.func @transform_5(%arg0: i32) -> (i32, i32, i32) {
    %c0_i32 = arith.constant 0 : i32
    %c0_i32_0 = arith.constant 0 : i32
    %c0_i32_1 = arith.constant 0 : i32
    return %arg0, %c0_i32, %c0_i32_0 : i32, i32, i32
  }
}

</mosaic_0001>

<bundles_post_ra>
// kernel: stgc_autoencoder_forward.1
= control target key start
LH: loop header
LB: loop body
LE: loop exit
PB: predicated region body
PF: predicated region fallthrough
CT: control target
= control target key end

     0   :  { %10 = vsyncpa [#allocation5], 0  ;;  %s6710_s0 = inlined_call_operand.vmem [shape: f32[4,16,64], index: 0, kind: input, shape index: {}]   ;;  %s6711_s1 = inlined_call_operand.hbm [shape: bf16[3,64,512], index: 1, kind: input, shape index: {}]   ;;  %s6712_s2 = inlined_call_operand.hbm [shape: f32[1,512], index: 2, kind: input, shape index: {}]   ;;  %s6713_s3 = inlined_call_operand.hbm [shape: bf16[3,512,512], index: 3, kind: input, shape index: {}]   ;;  %s6714_s4 = inlined_call_operand.hbm [shape: f32[1,512], index: 4, kind: input, shape index: {}]   ;;  %s6715_s5 = inlined_call_operand.vmem [shape: f32[4,16,512], index: 5, kind: output, shape index: {}]  }
   0x1   :  { %11 = vsyncpa [#allocation7], 0 }
   0x2   :  { %12 = vsyncpa [#allocation10], 0  ;;  %s6038_s18 = smov 0  }
   0x3 LB: > { %s6000_s19 = smov [#allocation6]   ;;  %s4688_s21 = sadd.s32 4294967295, %s5998_s18   ;;  %s5998_s18 = sphi %s6038_s18, %s18_s18  }
   0x4   : > { %s185_s20 = sshll.u32 %s6000_s19, 4  ;;  %p4690_p0 = scmp.ge.s32.totalorder %s5998_s18, 1  ;;  %s186_s20 = int_to_ptr.vmem [resolvable:$true] %s185_s20 }
   0x5   : > { %p159_p1 = scmp.lt.s32.totalorder %s5998_s18, 3  ;;  %p6048_p2 = scmp.eq.s32.totalorder %s4688_s21, 0 }
   0x6   : > { %s6001_s24 = smov [#allocation4]   ;;  %s6002_s27 = smov [#allocation8]  }
   0x7   : > { %p6052_p3 = pnand %p4690_p0, %p159_p1  ;;  %s171_s25 = sshll.u32 %s6001_s24, 4  ;;  %s6058_s25 = int_to_ptr.vmem [resolvable:$true] %s171_s25 }
   0x8   : > { %s195_s28 = sshll.u32 %s6002_s27, 4  ;;  %s6003_s29 = smov [#allocation9]   ;;  %s6066_s28 = int_to_ptr.vmem [resolvable:$true] %s195_s28 }
   0x9   : > { %p5187_p4 = pneg %p6052_p3  ;;  %s6068_s30 = sshll.u32 %s6003_s29, 4  ;;  %s210_s30 = int_to_ptr.vmem [resolvable:$true] %s6068_s30 }
   0xa   : > { %s5887_s6 = scalar_lea.vmem %s186_s20, 64  ;;  %p5895_p10 = scmp.lt.s32.totalorder %s186_s20, %s186_s20 }
   0xb   : > { %p6062_p5 = pnand %p6048_p2, %p5187_p4  ;;  %p5888_p7 = scmp.ne.s32.totalorder %s186_s20, %s5887_s6 }
   0xc   : > { %p5896_p11 = scmp.lt.s32.totalorder %s5887_s6, %s5887_s6 }
   0xd   : > { %p5878_p6 = pneg %p6062_p5 }
   0xe   : > { %p5897_p12 = por %p5896_p11, %p5895_p10 }
   0xf   : > { %p5890_p8 = pnand %p5888_p7, %p5878_p6 }
  0x11   : > { %p5891_p9 = pneg %p5890_p8 }
  0x13   : > { %p5898_p13 = pnand %p5897_p12, %p5891_p9 }
  0x15   : > { %5901 = shalt.err (!%p5898_p13)
}
  0x16   : > { %5193 = dma.hbm_to_vmem [thread:$0]  (!%p6062_p5), %s6712_s2, 64, %s186_s20, [#allocation7]  }
  0x17   : > { %s5913_s9 = scalar_lea.vmem %s6058_s25, 6144  ;;  %p5921_p7 = scmp.lt.s32.totalorder %s6058_s25, %s6058_s25 }
  0x18   : > { %p5914_p0 = scmp.ne.s32.totalorder %s6058_s25, %s5913_s9  ;;  %p5922_p8 = scmp.lt.s32.totalorder %s5913_s9, %s5913_s9 }
  0x1a   : > { %p5916_p1 = pnand %p5914_p0, %p5878_p6  ;;  %p5923_p9 = por %p5922_p8, %p5921_p7 }
  0x1c   : > { %p5917_p4 = pneg %p5916_p1 }
  0x1e   : > { %p5924_p10 = pnand %p5923_p9, %p5917_p4 }
  0x20   : > { %5927 = shalt.err (!%p5924_p10)
}
  0x21   : > { %s6004_s10 = smov 256   ;;  %s6005_s11 = smov 16  }
  0x22   : > { %5190 = dma.hbm_to_vmem [thread:$0]  (!%p6062_p5), %s6711_s1, 6144, %s6058_s25, [#allocation5], %s6004_s10, %s6004_s10, %s6005_s11  }
  0x23   : > { %s5939_s14 = scalar_lea.vmem %s6066_s28, 49152  ;;  %p5947_p0 = scmp.lt.s32.totalorder %s6066_s28, %s6066_s28 }
  0x24   : > { %p5940_p11 = scmp.ne.s32.totalorder %s6066_s28, %s5939_s14  ;;  %p5948_p1 = scmp.lt.s32.totalorder %s5939_s14, %s5939_s14 }
  0x26   : > { %p5942_p12 = pnand %p5940_p11, %p5878_p6  ;;  %p5949_p4 = por %p5948_p1, %p5947_p0 }
  0x28   : > { %p5943_p13 = pneg %p5942_p12 }
  0x2a   : > { %p5950_p7 = pnand %p5949_p4, %p5943_p13 }
  0x2c   : > { %5953 = shalt.err (!%p5950_p7)
}
  0x2d   : > { %5196 = dma.hbm_to_vmem [thread:$0]  (!%p6062_p5), %s6713_s3, 49152, %s6066_s28, [#allocation7], %s6004_s10, %s6004_s10, %s6005_s11  }
  0x2e   : > { %s5965_s17 = scalar_lea.vmem %s210_s30, 64  ;;  %p5973_p11 = scmp.lt.s32.totalorder %s210_s30, %s210_s30 }
  0x2f   : > { %p5966_p8 = scmp.ne.s32.totalorder %s210_s30, %s5965_s17  ;;  %p5974_p12 = scmp.lt.s32.totalorder %s5965_s17, %s5965_s17 }
  0x31   : > { %p5968_p9 = pnand %p5966_p8, %p5878_p6  ;;  %p5975_p13 = por %p5974_p12, %p5973_p11 }
  0x33   : > { %p5969_p10 = pneg %p5968_p9 }
  0x35   : > { %p5976_p0 = pnand %p5975_p13, %p5969_p10 }
  0x37   : > { %5979 = shalt.err (!%p5976_p0)
}
  0x38   : > { %5199 = dma.hbm_to_vmem [thread:$0]  (!%p6062_p5), %s6714_s4, 64, %s210_s30, [#allocation10]  }
  0x39   : > { %232 = sbr.rel (%p6052_p3) target bundleno = 911 (0x38f), region = 40 }
  0x3e   : > { %5985 = dma.done.wait (%p6048_p2), [#allocation5], 6144  }
  0x3f   : > { %5987 = vsyncadd (%p6048_p2), [#allocation5], 4294961152 }
  0x40   : > { %5989 = dma.done.wait (%p6048_p2), [#allocation7], 49216  }
  0x41   : > { %5991 = vsyncadd (%p6048_p2), [#allocation7], 4294918080 }
  0x42   : > { %5993 = dma.done.wait (%p6048_p2), [#allocation10], 64  }
  0x43   : > { %5995 = vsyncadd (%p6048_p2), [#allocation10], 4294967232  ;;  %s4701_s23 = sshll.u32 %s4688_s21, 1  ;;  %vm289_vm0 = vcmask 516096   ;;  %v6006_v0 = vmov 0   ;;  %v6719_v1 = vmov 0.0  }
  0x44   : > { %473 = vmatprep.mubr.bf16.mxu0 %v6006_v0  ;;  %534 = vmatprep.mubr.bf16.mxu1 %v6006_v0  ;;  %290 = vst.msk [vmem:[#allocation2] sm:$0x1] %vm289_vm0, %v6719_v1  ;;  %291 = vst.msk [vmem:[#allocation2 + $0x11] sm:$0x1] %vm289_vm0, %v6719_v1  ;;  %p275_p3 = scmp.lt.s32.totalorder %s4701_s23, 3  ;;  %vm295_vm1 = vcmask 523264  }
  0x45   : > { %292 = vst.msk [vmem:[#allocation2 + $0x22] sm:$0x1] %vm289_vm0, %v6719_v1  ;;  %v5224_v2 = vld [vmem:[#allocation4 + $0xe4] ss:$16 sps:$4 sm:$0xff]   ;;  %v5226_v3 = vld [vmem:[#allocation4 + $0xec] ss:$16 sps:$4 sm:$0xff]  }
  0x46   : > { %s6733_s23 = smov (!%p275_p3, %s4701_s23), 3  ;;  %449 = vmatprep.subr.bf16.mxu0 %v5224_v2  ;;  %v5228_v4 = vld [vmem:[#allocation4 + $0xe0] ss:$16 sps:$4 sm:$0xff]   ;;  %v5229_v5 = vld [vmem:[#allocation4 + $0xe8] ss:$16 sps:$4 sm:$0xff]   ;;  %510 = vmatprep.subr.bf16.mxu1 %v5226_v3  ;;  %vm1112_vm3 = vcmask 1040384  }
  0x47   : > { %v5230_v6 = vld [vmem:[#allocation4 + $0xc4] ss:$16 sps:$4 sm:$0xff]   ;;  %450 = vmatpush1.bf16.msra.mxu0 %v5228_v4  ;;  %511 = vmatpush1.bf16.msra.mxu1 %v5229_v5  ;;  %v5232_v7 = vld [vmem:[#allocation4 + $0xcc] ss:$16 sps:$4 sm:$0xff]   ;;  %v5234_v8 = vld [vmem:[#allocation4 + $0xc0] ss:$16 sps:$4 sm:$0xff]  }
  0x48   : > { %s5169_s21 = sshll.u32 %s6733_s23, 4  ;;  %451 = vmatprep.subr.bf16.mxu0 %v5230_v6  ;;  %v5235_v9 = vld [vmem:[#allocation4 + $0xc8] ss:$16 sps:$4 sm:$0xff]   ;;  %512 = vmatprep.subr.bf16.mxu1 %v5232_v7  ;;  %v5236_v10 = vld [vmem:[#allocation4 + $0xa4] ss:$16 sps:$4 sm:$0xff]   ;;  %vm3532_vm5 = vcmask 1046528  }
  0x49   : > { %v5238_v11 = vld [vmem:[#allocation4 + $0xac] ss:$16 sps:$4 sm:$0xff]   ;;  %v5240_v12 = vld [vmem:[#allocation4 + $0xa0] ss:$16 sps:$4 sm:$0xff]   ;;  %v5241_v13 = vld [vmem:[#allocation4 + $0xa8] ss:$16 sps:$4 sm:$0xff]   ;;  %s279_s25 = scalar_lea.vmem %s6710_s0, %s5169_s21 }
  0x4a   : > { %v5242_v14 = vld [vmem:[#allocation4 + $0x84] ss:$16 sps:$4 sm:$0xff]   ;;  %v5244_v15 = vld [vmem:[#allocation4 + $0x8c] ss:$16 sps:$4 sm:$0xff]   ;;  %v5246_v18 = vld [vmem:[#allocation4 + $0x80] ss:$16 sps:$4 sm:$0xff]  }
  0x4b   : > { %452 = vmatpush1.bf16.msra.mxu0 %v5234_v8  ;;  %513 = vmatpush1.bf16.msra.mxu1 %v5235_v9  ;;  %v293_v16 = vld [vmem:[%s279_s25] sm:$0xff]  ;;  %v294_v17 = vld [vmem:[%s279_s25 + $0x8] sm:$0xff]  ;;  %v4707_v22 = vld [vmem:[%s279_s25 + $0x10] sm:$0xff]  ;;  %vm1506_vm4 = vsmask.f32 7424  ;;  %s5170_s26 = sshll.u32 %s6733_s23, 6 }
  0x4c   : > { %453 = vmatprep.subr.bf16.mxu0 %v5236_v10  ;;  %514 = vmatprep.subr.bf16.mxu1 %v5238_v11  ;;  %296 = vst.msk [vmem:[#allocation2 + $0x1] sm:$0xff] %vm295_vm1, %v293_v16  ;;  %v5247_v19 = vld [vmem:[#allocation4 + $0x88] ss:$16 sps:$4 sm:$0xff]   ;;  %297 = vst.msk [vmem:[#allocation2 + $0x9] sm:$0xff] %vm295_vm1, %v294_v17  ;;  %v5250_v20 = vld [vmem:[#allocation4 + $0x64] ss:$16 sps:$4 sm:$0xff]   ;;  %s6634_s29 = scalar_lea.vmem %s6715_s5, %s5170_s26 }
  0x4d   : > { %v5253_v21 = vld [vmem:[#allocation4 + $0x6c] ss:$16 sps:$4 sm:$0xff]   ;;  %v4708_v23 = vld [vmem:[%s279_s25 + $0x18] sm:$0xff]  ;;  %301 = vst.msk [vmem:[#allocation2 + $0x12] sm:$0xff] %vm295_vm1, %v4707_v22  ;;  %v5251_v26 = vld [vmem:[#allocation4 + $0x68] ss:$16 sps:$4 sm:$0xff]  }
  0x4e   : > { %v5248_v25 = vld [vmem:[#allocation4 + $0x60] ss:$16 sps:$4 sm:$0xff]   ;;  %302 = vst.msk [vmem:[#allocation2 + $0x1a] sm:$0xff] %vm295_vm1, %v4708_v23  ;;  %v5256_v29 = vld [vmem:[#allocation4 + $0x44] ss:$16 sps:$4 sm:$0xff]  }
  0x4f   : > { %454 = vmatpush1.bf16.msra.mxu0 %v5240_v12  ;;  %515 = vmatpush1.bf16.msra.mxu1 %v5241_v13  ;;  %v5259_v30 = vld [vmem:[#allocation4 + $0x4c] ss:$16 sps:$4 sm:$0xff]   ;;  %v5254_v31 = vld [vmem:[#allocation4 + $0x40] ss:$16 sps:$4 sm:$0xff]   ;;  %v5257_v32 = vld [vmem:[#allocation4 + $0x48] ss:$16 sps:$4 sm:$0xff]  }
  0x50   : > { %455 = vmatprep.subr.bf16.mxu0 %v5242_v14  ;;  %516 = vmatprep.subr.bf16.mxu1 %v5244_v15  ;;  %v5262_v33 = vld [vmem:[#allocation4 + $0x24] ss:$16 sps:$4 sm:$0xff]   ;;  %v5265_v34 = vld [vmem:[#allocation4 + $0x2c] ss:$16 sps:$4 sm:$0xff]   ;;  %v5260_v38 = vld [vmem:[#allocation4 + $0x20] ss:$16 sps:$4 sm:$0xff]  }
  0x51   : > { %v5263_v39 = vld [vmem:[#allocation4 + $0x28] ss:$16 sps:$4 sm:$0xff]   ;;  %v5268_v40 = vld [vmem:[#allocation4 + $0x4] ss:$16 sps:$4 sm:$0xff]   ;;  %v5271_v41 = vld [vmem:[#allocation4 + $0xc] ss:$16 sps:$4 sm:$0xff]  }
  0x52   : > { %v5266_v43 = vld [vmem:[#allocation4] ss:$16 sps:$4 sm:$0xff]   ;;  %v5269_v44 = vld [vmem:[#allocation4 + $0x8] ss:$16 sps:$4 sm:$0xff]   ;;  %v5274_v45 = vld [vmem:[#allocation4 + $0x164] ss:$16 sps:$4 sm:$0xff]  }
  0x53   : > { %456 = vmatpush1.bf16.msra.mxu0 %v5246_v18  ;;  %517 = vmatpush1.bf16.msra.mxu1 %v5247_v19  ;;  %v327_v24 = vld [vmem:[#allocation2 + $0x1] sm:$0xff]  ;;  %v328_v27 = vld [vmem:[#allocation2 + $0x9] sm:$0xff] }
  0x54   : > { %660 = vmatprep.subr.bf16.mxu0 %v5250_v20  ;;  %721 = vmatprep.subr.bf16.mxu1 %v5253_v21  ;;  %v332_v28 = vpack.c.bf16 %v328_v27, %v327_v24  ;;  %v329_v35 = vld [vmem:[#allocation2 + $0x11] sm:$0xff]  ;;  %v303_v48 = vld [vmem:[#allocation2] sm:$0xff]  ;;  %v304_v49 = vld [vmem:[#allocation2 + $0x8] sm:$0xff] }
  0x55   : > { %v330_v36 = vld [vmem:[#allocation2 + $0x19] sm:$0xff]  ;;  %v331_v42 = vld [vmem:[#allocation2 + $0x21] sm:$0x1]  ;;  %v5277_v46 = vld [vmem:[#allocation4 + $0x16c] ss:$16 sps:$4 sm:$0xff]   ;;  %v308_v52 = vpack.c.bf16 %v304_v49, %v303_v48 }
  0x56   : > { %4725 = vmatmul.mubr.msk.bf16.vlgmr.msra.gmra.mxu0 %vm295_vm1, %v332_v28  ;;  %4728 = vmatmul.mubr.msk.bf16.vlgmr.msra.gmra.mxu1 %vm295_vm1, %v332_v28  ;;  %v333_v37 = vpack.c.bf16 %v330_v36, %v329_v35  ;;  %v334_v47 = vpack.c.bf16 %v331_v42, %v331_v42  ;;  %v5272_v50 = vld [vmem:[#allocation4 + $0x160] ss:$16 sps:$4 sm:$0xff]   ;;  %v5275_v51 = vld [vmem:[#allocation4 + $0x168] ss:$16 sps:$4 sm:$0xff]   ;;  %v5280_v53 = vld [vmem:[#allocation4 + $0x144] ss:$16 sps:$4 sm:$0xff]  }
  0x57   : > { %661 = vmatpush1.bf16.msra.mxu0 %v5248_v25  ;;  %722 = vmatpush1.bf16.msra.mxu1 %v5251_v26  ;;  %v5283_v54 = vld [vmem:[#allocation4 + $0x14c] ss:$16 sps:$4 sm:$0xff]   ;;  %v5278_v55 = vld [vmem:[#allocation4 + $0x140] ss:$16 sps:$4 sm:$0xff]   ;;  %v5281_v56 = vld [vmem:[#allocation4 + $0x148] ss:$16 sps:$4 sm:$0xff]  }
  0x58   : > { %662 = vmatprep.subr.bf16.mxu0 %v5256_v29  ;;  %723 = vmatprep.subr.bf16.mxu1 %v5259_v30  ;;  %v305_v57 = vld [vmem:[#allocation2 + $0x10] sm:$0xff]  ;;  %v306_v58 = vld [vmem:[#allocation2 + $0x18] sm:$0xff]  ;;  %v307_v4 = vld [vmem:[#allocation2 + $0x20] sm:$0x1] }
  0x59   : > { %483 = vmatprep.mubr.bf16.mxu0 %v6006_v0  ;;  %544 = vmatprep.mubr.bf16.mxu1 %v6006_v0  ;;  %v5286_v59 = vld [vmem:[#allocation4 + $0x124] ss:$16 sps:$4 sm:$0xff]   ;;  %v5289_v60 = vld [vmem:[#allocation4 + $0x12c] ss:$16 sps:$4 sm:$0xff]   ;;  %v5284_v61 = vld [vmem:[#allocation4 + $0x120] ss:$16 sps:$4 sm:$0xff]   ;;  %v309_v63 = vpack.c.bf16 %v306_v58, %v305_v57  ;;  %v310_v7 = vpack.c.bf16 %v307_v4, %v307_v4 }
  0x5a   : > { %v5287_v62 = vld [vmem:[#allocation4 + $0x128] ss:$16 sps:$4 sm:$0xff]   ;;  %v5292_v2 = vld [vmem:[#allocation4 + $0x104] ss:$16 sps:$4 sm:$0xff]   ;;  %v5295_v3 = vld [vmem:[#allocation4 + $0x10c] ss:$16 sps:$4 sm:$0xff]  }
  0x5b   : > { %663 = vmatpush1.bf16.msra.mxu0 %v5254_v31  ;;  %724 = vmatpush1.bf16.msra.mxu1 %v5257_v32  ;;  %v5290_v5 = vld [vmem:[#allocation4 + $0x100] ss:$16 sps:$4 sm:$0xff]   ;;  %v5293_v6 = vld [vmem:[#allocation4 + $0x108] ss:$16 sps:$4 sm:$0xff]   ;;  %v5296_v18 = vld [vmem:[#allocation8 + $0x4e0] ss:$16 sps:$4 sm:$0xff]  }
  0x5c   : > { %664 = vmatprep.subr.bf16.mxu0 %v5262_v33  ;;  %725 = vmatprep.subr.bf16.mxu1 %v5265_v34  ;;  %v774_v8 = vld [vmem:[#allocation2 + $0x2] sm:$0xff]  ;;  %v775_v9 = vld [vmem:[#allocation2 + $0xa] sm:$0xff]  ;;  %v776_v11 = vld [vmem:[#allocation2 + $0x12] sm:$0xff] }
  0x5d   : > { %v779_v10 = vpack.c.bf16 %v775_v9, %v774_v8  ;;  %v777_v12 = vld [vmem:[#allocation2 + $0x1a] sm:$0xff]  ;;  %v778_v14 = vld [vmem:[#allocation2 + $0x22] sm:$0x1] }
  0x5e   : > { %4726 = vmatmul.mubr.msk.bf16.gmra.mxu0 %vm295_vm1, %v333_v37  ;;  %4729 = vmatmul.mubr.msk.bf16.gmra.mxu1 %vm295_vm1, %v333_v37  ;;  %v780_v13 = vpack.c.bf16 %v777_v12, %v776_v11  ;;  %v781_v15 = vpack.c.bf16 %v778_v14, %v778_v14  ;;  %v5298_v16 = vld [vmem:[#allocation8 + $0x4e4] ss:$16 sps:$4 sm:$0xff]   ;;  %v5299_v19 = vld [vmem:[#allocation8 + $0x6e0] ss:$16 sps:$4 sm:$0xff]  }
  0x5f   : > { %665 = vmatpush1.bf16.msra.mxu0 %v5260_v38  ;;  %726 = vmatpush1.bf16.msra.mxu1 %v5263_v39  ;;  %v5301_v17 = vld [vmem:[#allocation8 + $0x6e4] ss:$16 sps:$4 sm:$0xff]   ;;  %v5302_v22 = vld [vmem:[#allocation8 + $0x4c0] ss:$16 sps:$4 sm:$0xff]  }
  0x60   : > { %493 = vmatprep.mubr.bf16.mxu0 %v6006_v0  ;;  %554 = vmatprep.mubr.bf16.mxu1 %v6006_v0  ;;  %v5304_v20 = vld [vmem:[#allocation8 + $0x4c4] ss:$16 sps:$4 sm:$0xff]   ;;  %v5305_v23 = vld [vmem:[#allocation8 + $0x6c0] ss:$16 sps:$4 sm:$0xff]  }
  0x61   : > { %666 = vmatprep.subr.bf16.mxu0 %v5268_v40  ;;  %727 = vmatprep.subr.bf16.mxu1 %v5271_v41  ;;  %v5307_v21 = vld [vmem:[#allocation8 + $0x6c4] ss:$16 sps:$4 sm:$0xff]   ;;  %v5308_v25 = vld [vmem:[#allocation8 + $0x4a0] ss:$16 sps:$4 sm:$0xff]  }
  0x62   : > { %v5313_v24 = vld [vmem:[#allocation8 + $0x6a4] ss:$16 sps:$4 sm:$0xff]   ;;  %v5311_v26 = vld [vmem:[#allocation8 + $0x6a0] ss:$16 sps:$4 sm:$0xff]  }
  0x63   : > { %667 = vmatpush1.bf16.msra.mxu0 %v5266_v43  ;;  %728 = vmatpush1.bf16.msra.mxu1 %v5269_v44  ;;  %v5316_v27 = vld [vmem:[#allocation8 + $0x484] ss:$16 sps:$4 sm:$0xff]   ;;  %v5314_v29 = vld [vmem:[#allocation8 + $0x480] ss:$16 sps:$4 sm:$0xff]  }
  0x64   : > { %896 = vmatprep.subr.bf16.mxu0 %v5274_v45  ;;  %957 = vmatprep.subr.bf16.mxu1 %v5277_v46  ;;  %v5319_v28 = vld [vmem:[#allocation8 + $0x684] ss:$16 sps:$4 sm:$0xff]   ;;  %v5317_v30 = vld [vmem:[#allocation8 + $0x680] ss:$16 sps:$4 sm:$0xff]  }
  0x65   : > { %v5322_v31 = vld [vmem:[#allocation8 + $0x464] ss:$16 sps:$4 sm:$0xff]   ;;  %v5320_v33 = vld [vmem:[#allocation8 + $0x460] ss:$16 sps:$4 sm:$0xff]  }
  0x66   : > { %4727 = vmatmul.mubr.msk.bf16.gmra.mxu0 %vm295_vm1, %v334_v47  ;;  %4730 = vmatmul.mubr.msk.bf16.gmra.mxu1 %vm295_vm1, %v334_v47  ;;  %v5325_v32 = vld [vmem:[#allocation8 + $0x664] ss:$16 sps:$4 sm:$0xff]   ;;  %v5323_v34 = vld [vmem:[#allocation8 + $0x660] ss:$16 sps:$4 sm:$0xff]  }
  0x67   : > { %684 = vmatprep.mubr.bf16.mxu0 %v6006_v0  ;;  %745 = vmatprep.mubr.bf16.mxu1 %v6006_v0  ;;  %v5328_v35 = vld [vmem:[#allocation8 + $0x444] ss:$16 sps:$4 sm:$0xff]   ;;  %v5326_v37 = vld [vmem:[#allocation8 + $0x440] ss:$16 sps:$4 sm:$0xff]  }
  0x68   : > { %v5331_v36 = vld [vmem:[#allocation8 + $0x644] ss:$16 sps:$4 sm:$0xff]   ;;  %v5329_v38 = vld [vmem:[#allocation8 + $0x640] ss:$16 sps:$4 sm:$0xff]  }
  0x69   : > { %v5334_v39 = vld [vmem:[#allocation8 + $0x424] ss:$16 sps:$4 sm:$0xff]   ;;  %v5332_v41 = vld [vmem:[#allocation8 + $0x420] ss:$16 sps:$4 sm:$0xff]  }
  0x6a   : > { %v5337_v40 = vld [vmem:[#allocation8 + $0x624] ss:$16 sps:$4 sm:$0xff]   ;;  %v5335_v42 = vld [vmem:[#allocation8 + $0x620] ss:$16 sps:$4 sm:$0xff]  }
  0x6b   : > { %v5340_v43 = vld [vmem:[#allocation8 + $0x404] ss:$16 sps:$4 sm:$0xff]   ;;  %v5338_v45 = vld [vmem:[#allocation8 + $0x400] ss:$16 sps:$4 sm:$0xff]  }
  0x6c   : > { %v5343_v44 = vld [vmem:[#allocation8 + $0x604] ss:$16 sps:$4 sm:$0xff]   ;;  %v5341_v46 = vld [vmem:[#allocation8 + $0x600] ss:$16 sps:$4 sm:$0xff]  }
  0x6d   : > { %v5346_v47 = vld [vmem:[#allocation8 + $0x5e4] ss:$16 sps:$4 sm:$0xff]   ;;  %v5344_v49 = vld [vmem:[#allocation8 + $0x5e0] ss:$16 sps:$4 sm:$0xff]  }
  0x6e   : > { %4747 = vmatmul.mubr.msk.bf16.vlgmr.msra.gmra.mxu0 %vm295_vm1, %v308_v52  ;;  %4750 = vmatmul.mubr.msk.bf16.vlgmr.msra.gmra.mxu1 %vm295_vm1, %v308_v52  ;;  %v5349_v48 = vld [vmem:[#allocation8 + $0x7e4] ss:$16 sps:$4 sm:$0xff]   ;;  %v5374_v9 = vld [vmem:[#allocation8 + $0x540] ss:$16 sps:$4 sm:$0xff]  }
  0x6f   : > { %897 = vmatpush1.bf16.msra.mxu0 %v5272_v50  ;;  %958 = vmatpush1.bf16.msra.mxu1 %v5275_v51  ;;  %v5347_v50 = vld [vmem:[#allocation8 + $0x7e0] ss:$16 sps:$4 sm:$0xff]   ;;  %v1032_v51 = vlaneseq  ;;  %v5352_v52 = vld [vmem:[#allocation8 + $0x5c4] ss:$16 sps:$4 sm:$0xff]  }
  0x70   : > { %898 = vmatprep.subr.bf16.mxu0 %v5280_v53  ;;  %959 = vmatprep.subr.bf16.mxu1 %v5283_v54  ;;  %v5355_v53 = vld [vmem:[#allocation8 + $0x7c4] ss:$16 sps:$4 sm:$0xff]   ;;  %v6724_v54 = vmov 0  ;;  %v5383_v14 = vld [vmem:[#allocation8 + $0x720] ss:$16 sps:$4 sm:$0xff]  }
  0x71   : > { %694 = vmatprep.mubr.bf16.mxu0 %v6006_v0  ;;  %755 = vmatprep.mubr.bf16.mxu1 %v6006_v0  ;;  %vm6181_vm2 = vcmp.lt.s32.totalorder %v1032_v51, 512  ;;  %v5358_v57 = vld [vmem:[#allocation8 + $0x5a4] ss:$16 sps:$4 sm:$0xff]  }
  0x72   : > { %v6725_v54 = vsel %vm6181_vm2, 4294967295, %v6724_v54  ;;  %1193 = vst.msk [vmem:[#allocation3] ss:$8 sm:$0xf] %vm6181_vm2, %v6719_v1  ;;  %v5361_v58 = vld [vmem:[#allocation8 + $0x7a4] ss:$16 sps:$4 sm:$0xff]  }
  0x73   : > { %899 = vmatpush1.bf16.msra.mxu0 %v5278_v55  ;;  %960 = vmatpush1.bf16.msra.mxu1 %v5281_v56  ;;  %6726 = vst [vmem:[#allocation14_spill] sm:$0xff] %v6725_v54  ;;  %v5350_v55 = vld [vmem:[#allocation8 + $0x5c0] ss:$16 sps:$4 sm:$0xff]   ;;  %1199 = vst.msk [vmem:[#allocation3 + $0x82] ss:$8 sm:$0xf] %vm6181_vm2, %v6719_v1 }
  0x74   : > { %900 = vmatprep.subr.bf16.mxu0 %v5286_v59  ;;  %961 = vmatprep.subr.bf16.mxu1 %v5289_v60  ;;  %v5353_v56 = vld [vmem:[#allocation8 + $0x7c0] ss:$16 sps:$4 sm:$0xff]   ;;  %v5373_v4 = vld [vmem:[#allocation8 + $0x764] ss:$16 sps:$4 sm:$0xff]  }
  0x75   : > { %v5356_v59 = vld [vmem:[#allocation8 + $0x5a0] ss:$16 sps:$4 sm:$0xff]   ;;  %v5379_v8 = vld [vmem:[#allocation8 + $0x744] ss:$16 sps:$4 sm:$0xff]  }
  0x76   : > { %4748 = vmatmul.mubr.msk.bf16.gmra.mxu0 %vm295_vm1, %v309_v63  ;;  %4751 = vmatmul.mubr.msk.bf16.gmra.mxu1 %vm295_vm1, %v309_v63  ;;  %v5359_v60 = vld [vmem:[#allocation8 + $0x7a0] ss:$16 sps:$4 sm:$0xff]   ;;  %v5382_v11 = vld [vmem:[#allocation8 + $0x524] ss:$16 sps:$4 sm:$0xff]  }
  0x77   : > { %901 = vmatpush1.bf16.msra.mxu0 %v5284_v61  ;;  %962 = vmatpush1.bf16.msra.mxu1 %v5287_v62  ;;  %v5364_v61 = vld [vmem:[#allocation8 + $0x584] ss:$16 sps:$4 sm:$0xff]   ;;  %v5362_v63 = vld [vmem:[#allocation8 + $0x580] ss:$16 sps:$4 sm:$0xff]  }
  0x78   : > { %704 = vmatprep.mubr.bf16.mxu0 %v6006_v0  ;;  %765 = vmatprep.mubr.bf16.mxu1 %v6006_v0  ;;  %v5367_v62 = vld [vmem:[#allocation8 + $0x784] ss:$16 sps:$4 sm:$0xff]  }
  0x79   : > { %902 = vmatprep.subr.bf16.mxu0 %v5292_v2  ;;  %963 = vmatprep.subr.bf16.mxu1 %v5295_v3  ;;  %v5365_v2 = vld [vmem:[#allocation8 + $0x780] ss:$16 sps:$4 sm:$0xff]   ;;  %v5370_v3 = vld [vmem:[#allocation8 + $0x564] ss:$16 sps:$4 sm:$0xff]  }
  0x7a   : > { %v5385_v12 = vld [vmem:[#allocation8 + $0x724] ss:$16 sps:$4 sm:$0xff]  }
  0x7b   : > { %903 = vmatpush1.bf16.msra.mxu0 %v5290_v5  ;;  %964 = vmatpush1.bf16.msra.mxu1 %v5293_v6  ;;  %v5368_v5 = vld [vmem:[#allocation8 + $0x560] ss:$16 sps:$4 sm:$0xff]  }
  0x7c   : > { %2247 = vmatprep.subr.bf16.mxu0 %v5298_v16  ;;  %2308 = vmatprep.subr.bf16.mxu1 %v5301_v17  ;;  %v5371_v6 = vld [vmem:[#allocation8 + $0x760] ss:$16 sps:$4 sm:$0xff]   ;;  %v5388_v16 = vld [vmem:[#allocation8 + $0x504] ss:$16 sps:$4 sm:$0xff]  }
  0x7d   : > { %v5389_v17 = vld [vmem:[#allocation8 + $0x700] ss:$16 sps:$4 sm:$0xff]  }
  0x7e   : > { %4749 = vmatmul.mubr.msk.bf16.gmra.mxu0 %vm295_vm1, %v310_v7  ;;  %4752 = vmatmul.mubr.msk.bf16.gmra.mxu1 %vm295_vm1, %v310_v7  ;;  %v5376_v7 = vld [vmem:[#allocation8 + $0x544] ss:$16 sps:$4 sm:$0xff]  }
  0x7f   : > { %920 = vmatprep.mubr.bf16.mxu0 %v6006_v0  ;;  %981 = vmatprep.mubr.bf16.mxu1 %v6006_v0 }
  0x86   : > { %4769 = vmatmul.mubr.msk.bf16.vlgmr.msra.gmra.mxu0 %vm295_vm1, %v779_v10  ;;  %4772 = vmatmul.mubr.msk.bf16.vlgmr.msra.gmra.mxu1 %vm295_vm1, %v779_v10  ;;  %v5377_v10 = vld [vmem:[#allocation8 + $0x740] ss:$16 sps:$4 sm:$0xff]  }
  0x87   : > { %930 = vmatprep.mubr.bf16.mxu0 %v6006_v0  ;;  %991 = vmatprep.mubr.bf16.mxu1 %v6006_v0 }
  0x88   : > { %2248 = vmatpush1.bf16.msra.mxu0 %v5296_v18  ;;  %2309 = vmatpush1.bf16.msra.mxu1 %v5299_v19  ;;  %v5391_v18 = vld [vmem:[#allocation8 + $0x704] ss:$16 sps:$4 sm:$0xff]   ;;  %v5394_v19 = vld [vmem:[#allocation8 + $0x4ec] ss:$16 sps:$4 sm:$0xff]  }
  0x89   : > { %2249 = vmatprep.subr.bf16.mxu0 %v5304_v20  ;;  %2310 = vmatprep.subr.bf16.mxu1 %v5307_v21  ;;  %v5397_v20 = vld [vmem:[#allocation8 + $0x6ec] ss:$16 sps:$4 sm:$0xff]  }
  0x8c   : > { %2250 = vmatpush1.bf16.msra.mxu0 %v5302_v22  ;;  %2311 = vmatpush1.bf16.msra.mxu1 %v5305_v23 }
  0x8d   : > { %2312 = vmatprep.subr.bf16.mxu1 %v5313_v24 }
  0x8e   : > { %4770 = vmatmul.mubr.msk.bf16.gmra.mxu0 %vm295_vm1, %v780_v13  ;;  %4773 = vmatmul.mubr.msk.bf16.gmra.mxu1 %vm295_vm1, %v780_v13  ;;  %v5380_v13 = vld [vmem:[#allocation8 + $0x520] ss:$16 sps:$4 sm:$0xff]  }
  0x8f   : > { %940 = vmatprep.mubr.bf16.mxu0 %v6006_v0  ;;  %1001 = vmatprep.mubr.bf16.mxu1 %v6006_v0  ;;  %v5310_v0 = vld [vmem:[#allocation8 + $0x4a4] ss:$16 sps:$4 sm:$0xff]  }
  0x90   : > { %2251 = vmatprep.subr.bf16.mxu0 %v5310_v0  ;;  %2313 = vmatpush1.bf16.msra.mxu1 %v5311_v26 }
  0x91   : > { %2252 = vmatpush1.bf16.msra.mxu0 %v5308_v25  ;;  %2314 = vmatprep.subr.bf16.mxu1 %v5319_v28 }
  0x92   : > { %2253 = vmatprep.subr.bf16.mxu0 %v5316_v27 }
  0x94   : > { %2315 = vmatpush1.bf16.msra.mxu1 %v5317_v30 }
  0x95   : > { %2254 = vmatpush1.bf16.msra.mxu0 %v5314_v29  ;;  %2316 = vmatprep.subr.bf16.mxu1 %v5325_v32 }
  0x96   : > { %4771 = vmatmul.mubr.msk.bf16.gmra.mxu0 %vm295_vm1, %v781_v15  ;;  %4774 = vmatmul.mubr.msk.bf16.gmra.mxu1 %vm295_vm1, %v781_v15  ;;  %v5386_v15 = vld [vmem:[#allocation8 + $0x500] ss:$16 sps:$4 sm:$0xff]  }
  0x97   : > { %2255 = vmatprep.subr.bf16.mxu0 %v5322_v31 }
  0x98   : > { %2317 = vmatpush1.bf16.msra.mxu1 %v5323_v34 }
  0x99   : > { %2256 = vmatpush1.bf16.msra.mxu0 %v5320_v33  ;;  %2318 = vmatprep.subr.bf16.mxu1 %v5331_v36 }
  0x9a   : > { %2257 = vmatprep.subr.bf16.mxu0 %v5328_v35 }
  0x9c   : > { %2319 = vmatpush1.bf16.msra.mxu1 %v5329_v38 }
  0x9d   : > { %2258 = vmatpush1.bf16.msra.mxu0 %v5326_v37  ;;  %2320 = vmatprep.subr.bf16.mxu1 %v5337_v40 }
  0x9e   : > { %2259 = vmatprep.subr.bf16.mxu0 %v5334_v39 }
  0xa0   : > { %2321 = vmatpush1.bf16.msra.mxu1 %v5335_v42 }
  0xa1   : > { %2260 = vmatpush1.bf16.msra.mxu0 %v5332_v41  ;;  %2322 = vmatprep.subr.bf16.mxu1 %v5343_v44 }
  0xa2   : > { %2261 = vmatprep.subr.bf16.mxu0 %v5340_v43 }
  0xa4   : > { %2323 = vmatpush1.bf16.msra.mxu1 %v5341_v46 }
  0xa5   : > { %2262 = vmatpush1.bf16.msra.mxu0 %v5338_v45  ;;  %2324 = vmatprep.subr.bf16.mxu1 %v5349_v48 }
  0xa6   : > { %2263 = vmatprep.subr.bf16.mxu0 %v5346_v47 }
  0xa8   : > { %2325 = vmatpush2.bf16.msra.mxu1 %v5347_v50 }
  0xa9   : > { %2264 = vmatpush2.bf16.msra.mxu0 %v5344_v49  ;;  %2326 = vmatprep.subr.bf16.mxu1 %v5355_v53 }
  0xaa   : > { %2265 = vmatprep.subr.bf16.mxu0 %v5352_v52 }
  0xac   : > { %2327 = vmatpush2.bf16.msra.mxu1 %v5353_v56 }
  0xad   : > { %2266 = vmatpush2.bf16.msra.mxu0 %v5350_v55  ;;  %2328 = vmatprep.subr.bf16.mxu1 %v5361_v58 }
  0xae   : > { %2267 = vmatprep.subr.bf16.mxu0 %v5358_v57 }
  0xb0   : > { %2329 = vmatpush2.bf16.msra.mxu1 %v5359_v60 }
  0xb1   : > { %2268 = vmatpush2.bf16.msra.mxu0 %v5356_v59  ;;  %2330 = vmatprep.subr.bf16.mxu1 %v5367_v62  ;;  %v6204_v62 = vshrl.u32 %v1032_v51, 7 }
  0xb2   : > { %2269 = vmatprep.subr.bf16.mxu0 %v5364_v61 }
  0xb4   : > { %2331 = vmatpush2.bf16.msra.mxu1 %v5365_v2 }
  0xb5   : > { %2270 = vmatpush2.bf16.msra.mxu0 %v5362_v63  ;;  %2332 = vmatprep.subr.bf16.mxu1 %v5373_v4 }
  0xb6   : > { %2271 = vmatprep.subr.bf16.mxu0 %v5370_v3 }
  0xb8   : > { %2333 = vmatpush2.bf16.msra.mxu1 %v5371_v6  ;;  %v6716_v6 = vsub.s32 2, %v6204_v62 }
  0xb9   : > { %2272 = vmatpush2.bf16.msra.mxu0 %v5368_v5  ;;  %2334 = vmatprep.subr.bf16.mxu1 %v5379_v8  ;;  %v6717_v5 = vsub.s32 0, %v6204_v62  ;;  %v1046_v8 = vsub.s32 3, %v6204_v62 }
  0xba   : > { %2273 = vmatprep.subr.bf16.mxu0 %v5376_v7  ;;  %v6718_v7 = vsub.s32 1, %v6204_v62 }
  0xbc   : > { %2335 = vmatpush2.bf16.msra.mxu1 %v5377_v10 }
  0xbd   : > { %2274 = vmatpush2.bf16.msra.mxu0 %v5374_v9  ;;  %2336 = vmatprep.subr.bf16.mxu1 %v5385_v12  ;;  %v1030_v9 = vld [vmem:[#allocation6] sm:$0xf] }
  0xbe   : > { %2275 = vmatprep.subr.bf16.mxu0 %v5382_v11  ;;  %v6212_v51 = vrot.slane %v1030_v9, %v6717_v5 }
  0xc0   : > { %2337 = vmatpush2.bf16.msra.mxu1 %v5383_v14  ;;  %v6216_v14 = vrot.slane %v1030_v9, %v6716_v6 }
  0xc1   : > { %2276 = vmatpush2.bf16.msra.mxu0 %v5380_v13  ;;  %2338 = vmatprep.subr.bf16.mxu1 %v5391_v18 }
  0xc2   : > { %2277 = vmatprep.subr.bf16.mxu0 %v5388_v16  ;;  %v6224_v16 = vrot.slane %v1030_v9, %v1046_v8 }
  0xc4   : > { %2339 = vmatpush2.bf16.msra.mxu1 %v5389_v17 }
  0xc5   : > { %2278 = vmatpush2.bf16.msra.mxu0 %v5386_v15  ;;  %2430 = vmatprep.subr.bf16.mxu1 %v5397_v20  ;;  %v6220_v15 = vrot.slane %v1030_v9, %v6718_v7 }
  0xc6   : > { %2369 = vmatprep.subr.bf16.mxu0 %v5394_v19 }
 0x116   : > { %v475_v21 = vpop.f32.mrf.mxu0  ;;  %v536_v22 = vpop.f32.mrf.mxu1 }
 0x118   : > { %v477_v23 = vpop.f32.mrf.mxu0  ;;  %v538_v0 = vpop.f32.mrf.mxu1 }
 0x11a   : > { %v479_v24 = vpop.f32.mrf.mxu0  ;;  %v540_v25 = vpop.f32.mrf.mxu1 }
 0x11c   : > { %v481_v26 = vpop.f32.mrf.mxu0  ;;  %v542_v27 = vpop.f32.mrf.mxu1 }
 0x11e   : > { %v485_v28 = vpop.f32.mrf.mxu0  ;;  %v546_v29 = vpop.f32.mrf.mxu1 }
 0x120   : > { %v487_v30 = vpop.f32.mrf.mxu0  ;;  %v548_v31 = vpop.f32.mrf.mxu1 }
 0x122   : > { %v489_v32 = vpop.f32.mrf.mxu0  ;;  %v550_v33 = vpop.f32.mrf.mxu1 }
 0x124   : > { %v6191_v34 = vpop.f32.mrf.mxu0  ;;  %v6193_v35 = vpop.f32.mrf.mxu1 }
 0x126   : > { %v6195_v36 = vpop.f32.mrf.mxu0  ;;  %v6197_v37 = vpop.f32.mrf.mxu1 }
 0x128   : > { %v6199_v38 = vpop.f32.mrf.mxu0  ;;  %v6201_v39 = vpop.f32.mrf.mxu1 }
 0x12a   : > { %v499_v40 = vpop.f32.mrf.mxu0  ;;  %v560_v41 = vpop.f32.mrf.mxu1 }
 0x12c   : > { %v500_v42 = vpop.f32.mrf.mxu0  ;;  %v561_v43 = vpop.f32.mrf.mxu1 }
 0x12e   : > { %v686_v44 = vpop.f32.mrf.mxu0  ;;  %v747_v45 = vpop.f32.mrf.mxu1 }
 0x12f   : > { %v687_v17 = vadd.f32 %v686_v44, %v475_v21  ;;  %v748_v18 = vadd.f32 %v747_v45, %v536_v22 }
 0x130   : > { %v688_v46 = vpop.f32.mrf.mxu0  ;;  %v749_v47 = vpop.f32.mrf.mxu1 }
 0x131   : > { %v689_v19 = vadd.f32 %v688_v46, %v477_v23  ;;  %v750_v20 = vadd.f32 %v749_v47, %v538_v0 }
 0x132   : > { %v690_v48 = vpop.f32.mrf.mxu0  ;;  %v751_v49 = vpop.f32.mrf.mxu1 }
 0x133   : > { %v691_v40 = vadd.f32 %v690_v48, %v479_v24  ;;  %v752_v41 = vadd.f32 %v751_v49, %v540_v25 }
 0x134   : > { %v692_v50 = vpop.f32.mrf.mxu0  ;;  %v753_v52 = vpop.f32.mrf.mxu1 }
 0x135   : > { %v693_v42 = vadd.f32 %v692_v50, %v481_v26  ;;  %v754_v43 = vadd.f32 %v753_v52, %v542_v27 }
 0x136   : > { %v696_v53 = vpop.f32.mrf.mxu0  ;;  %v757_v55 = vpop.f32.mrf.mxu1 }
 0x138   : > { %v698_v56 = vpop.f32.mrf.mxu0  ;;  %v759_v57 = vpop.f32.mrf.mxu1 }
 0x139   : > { %v699_v7 = vadd.f32 %v698_v56, %v487_v30  ;;  %v760_v1 = vadd.f32 %v759_v57, %v548_v31 }
 0x13a   : > { %v700_v58 = vpop.f32.mrf.mxu0  ;;  %v761_v59 = vpop.f32.mrf.mxu1 }
 0x13b   : > { %v6226_v54 = vadd.f32 %v700_v58, %v489_v32  ;;  %v6228_v9 = vadd.f32 %v761_v59, %v550_v33 }
 0x13c   : > { %v702_v60 = vpop.f32.mrf.mxu0  ;;  %v763_v61 = vpop.f32.mrf.mxu1 }
 0x13d   : > { %v6233_v26 = vadd.f32 %v702_v60, %v6191_v34  ;;  %v6236_v27 = vadd.f32 %v763_v61, %v6193_v35 }
 0x13e   : > { %v706_v63 = vpop.f32.mrf.mxu0  ;;  %v767_v2 = vpop.f32.mrf.mxu1 }
 0x140   : > { %v708_v3 = vpop.f32.mrf.mxu0  ;;  %v769_v4 = vpop.f32.mrf.mxu1 }
 0x141   : > { %v6247_v34 = vadd.f32 %v708_v3, %v6199_v38  ;;  %v6250_v35 = vadd.f32 %v769_v4, %v6201_v39 }
 0x142   : > { %v710_v10 = vpop.f32.mrf.mxu0  ;;  %v771_v11 = vpop.f32.mrf.mxu1 }
 0x144   : > { %v711_v12 = vpop.f32.mrf.mxu0  ;;  %v772_v13 = vpop.f32.mrf.mxu1 }
 0x145   : > { %v697_v12 = vadd.f32 %v696_v53, %v485_v28  ;;  %v758_v13 = vadd.f32 %v757_v55, %v546_v29  ;;  %v6239_v28 = vadd.f32 %v706_v63, %v6195_v36  ;;  %v6242_v29 = vadd.f32 %v767_v2, %v6197_v37 }
 0x146   : > { %v922_v10 = vpop.f32.mrf.mxu0  ;;  %v983_v11 = vpop.f32.mrf.mxu1 }
 0x147   : > { %v1010_v6 = vadd.f32 %v922_v10, %v687_v17  ;;  %v1012_v5 = vadd.f32 %v983_v11, %v748_v18 }
 0x148   : > { %v924_v21 = vpop.f32.mrf.mxu0  ;;  %v985_v22 = vpop.f32.mrf.mxu1 }
 0x149   : > { %v1052_v23 = vadd.f32 %v6212_v51, %v1010_v6  ;;  %v1054_v0 = vadd.f32 %v6216_v14, %v1012_v5  ;;  %v1011_v24 = vadd.f32 %v924_v21, %v689_v19  ;;  %v1013_v25 = vadd.f32 %v985_v22, %v750_v20 }
 0x14a   : > { %v926_v30 = vpop.f32.mrf.mxu0  ;;  %v987_v31 = vpop.f32.mrf.mxu1 }
 0x14b   : > { %v1072_v32 = vmax.f32 %v1052_v23, 0.0  ;;  %v1074_v33 = vmax.f32 %v1054_v0, 0.0  ;;  %v1053_v44 = vadd.f32 %v6220_v15, %v1011_v24  ;;  %v1055_v45 = vadd.f32 %v6224_v16, %v1013_v25 }
 0x14c   : > { %v1014_v46 = vadd.f32 %v926_v30, %v691_v40  ;;  %v1016_v36 = vadd.f32 %v987_v31, %v752_v41  ;;  %v928_v47 = vpop.f32.mrf.mxu0  ;;  %v989_v48 = vpop.f32.mrf.mxu1 }
 0x14d   : > { %v1113_v37 = vrot.slane %v1072_v32, 7  ;;  %v1115_v49 = vrot.slane %v1074_v33, 7  ;;  %v1073_v50 = vmax.f32 %v1053_v44, 0.0  ;;  %v1075_v52 = vmax.f32 %v1055_v45, 0.0 }
 0x14e   : > { %v1056_v53 = vadd.f32 %v6212_v51, %v1014_v46  ;;  %v1058_v55 = vadd.f32 %v6216_v14, %v1016_v36  ;;  %v1015_v56 = vadd.f32 %v928_v47, %v693_v42  ;;  %v1017_v57 = vadd.f32 %v989_v48, %v754_v43  ;;  %v932_v58 = vpop.f32.mrf.mxu0  ;;  %v993_v38 = vpop.f32.mrf.mxu1 }
 0x14f   : > { %1169 = vst [vmem:[#allocation3] sm:$0xfe] %v1113_v37  ;;  %1171 = vst [vmem:[#allocation3 + $0x10] sm:$0xfe] %v1115_v49  ;;  %v1114_v39 = vrot.slane %v1073_v50, 7  ;;  %v1116_v59 = vrot.slane %v1075_v52, 7  ;;  %v1018_v60 = vadd.f32 %v932_v58, %v697_v12  ;;  %v1020_v61 = vadd.f32 %v993_v38, %v758_v13 }
 0x150   : > { %v1076_v63 = vmax.f32 %v1056_v53, 0.0  ;;  %v1078_v2 = vmax.f32 %v1058_v55, 0.0  ;;  %v1057_v3 = vadd.f32 %v6220_v15, %v1015_v56  ;;  %v1059_v4 = vadd.f32 %v6224_v16, %v1017_v57  ;;  %v934_v5 = vpop.f32.mrf.mxu0  ;;  %v995_v6 = vpop.f32.mrf.mxu1 }
 0x151   : > { %1170 = vst [vmem:[#allocation3 + $0x8] sm:$0xfe] %v1114_v39  ;;  %1172 = vst [vmem:[#allocation3 + $0x18] sm:$0xfe] %v1116_v59  ;;  %v1060_v17 = vadd.f32 %v6212_v51, %v1018_v60  ;;  %v1062_v18 = vadd.f32 %v6216_v14, %v1020_v61  ;;  %v1019_v19 = vadd.f32 %v934_v5, %v699_v7 }
 0x152   : > { %v1021_v20 = vadd.f32 %v995_v6, %v760_v1  ;;  %v1117_v40 = vrot.slane %v1076_v63, 7  ;;  %v1121_v41 = vrot.slane %v1078_v2, 7  ;;  %v1077_v42 = vmax.f32 %v1057_v3, 0.0  ;;  %v936_v10 = vpop.f32.mrf.mxu0  ;;  %v997_v11 = vpop.f32.mrf.mxu1 }
 0x153   : > { %v1079_v43 = vmax.f32 %v1059_v4, 0.0  ;;  %v1080_v12 = vmax.f32 %v1060_v17, 0.0  ;;  %v1082_v13 = vmax.f32 %v1062_v18, 0.0  ;;  %v1061_v21 = vadd.f32 %v6220_v15, %v1019_v19 }
 0x154   : > { %v1063_v22 = vadd.f32 %v6224_v16, %v1021_v20  ;;  %v6261_v23 = vsel %vm1112_vm3, %v1113_v37, %v1117_v40  ;;  %v6264_v0 = vsel %vm1112_vm3, %v1115_v49, %v1121_v41  ;;  %v1119_v7 = vrot.slane %v1077_v42, 7  ;;  %v938_v24 = vpop.f32.mrf.mxu0  ;;  %v999_v25 = vpop.f32.mrf.mxu1 }
 0x155   : > { %v1123_v1 = vrot.slane %v1079_v43, 7  ;;  %1173 = vst [vmem:[#allocation3 + $0x20] sm:$0xff] %v6261_v23  ;;  %1175 = vst [vmem:[#allocation3 + $0x30] sm:$0xff] %v6264_v0  ;;  %v1125_v30 = vrot.slane %v1080_v12, 7  ;;  %v1129_v31 = vrot.slane %v1082_v13, 7  ;;  %v1081_v32 = vmax.f32 %v1061_v21, 0.0 }
 0x156   : > { %v1083_v33 = vmax.f32 %v1063_v22, 0.0  ;;  %v6269_v44 = vsel %vm1112_vm3, %v1114_v39, %v1119_v7  ;;  %v1022_v46 = vadd.f32 %v936_v10, %v6226_v54  ;;  %v1024_v36 = vadd.f32 %v997_v11, %v6228_v9  ;;  %v942_v47 = vpop.f32.mrf.mxu0  ;;  %v1003_v48 = vpop.f32.mrf.mxu1 }
 0x157   : > { %v6272_v45 = vsel %vm1112_vm3, %v1116_v59, %v1123_v1  ;;  %1174 = vst [vmem:[#allocation3 + $0x28] sm:$0xff] %v6269_v44  ;;  %v1126_v37 = vsel %vm1112_vm3, %v1117_v40, %v1125_v30  ;;  %v1130_v49 = vsel %vm1112_vm3, %v1121_v41, %v1129_v31  ;;  %v1127_v50 = vrot.slane %v1081_v32, 7 }
 0x158   : > { %1176 = vst [vmem:[#allocation3 + $0x38] sm:$0xff] %v6272_v45  ;;  %v1131_v52 = vrot.slane %v1083_v33, 7  ;;  %1177 = vst [vmem:[#allocation3 + $0x40] sm:$0xff] %v1126_v37  ;;  %v1064_v53 = vadd.f32 %v6212_v51, %v1022_v46  ;;  %v1066_v54 = vadd.f32 %v6216_v14, %v1024_v36  ;;  %v1023_v9 = vadd.f32 %v938_v24, %v6233_v26  ;;  %v944_v56 = vpop.f32.mrf.mxu0  ;;  %v1005_v57 = vpop.f32.mrf.mxu1  ;;  %v1362_v12 = vld [vmem:[#allocation3 + $0x8] sm:$0xfe] }
 0x159   : > { %1179 = vst [vmem:[#allocation3 + $0x50] sm:$0xff] %v1130_v49  ;;  %v1025_v55 = vadd.f32 %v999_v25, %v6236_v27  ;;  %v1128_v58 = vsel %vm1112_vm3, %v1119_v7, %v1127_v50  ;;  %v1026_v39 = vadd.f32 %v942_v47, %v6239_v28  ;;  %v1028_v59 = vadd.f32 %v1003_v48, %v6242_v29  ;;  %v1361_v46 = vld [vmem:[#allocation3] sm:$0xfe]  ;;  %v1363_v36 = vld [vmem:[#allocation3 + $0x10] sm:$0xfe] }
 0x15a   : > { %v1132_v38 = vsel %vm1112_vm3, %v1123_v1, %v1131_v52  ;;  %1178 = vst [vmem:[#allocation3 + $0x48] sm:$0xff] %v1128_v58  ;;  %v1084_v60 = vmax.f32 %v1064_v53, 0.0  ;;  %v1086_v61 = vmax.f32 %v1066_v54, 0.0  ;;  %v1065_v63 = vadd.f32 %v6220_v15, %v1023_v9  ;;  %v946_v2 = vpop.f32.mrf.mxu0  ;;  %v1007_v27 = vpop.f32.mrf.mxu1 }
 0x15b   : > { %1180 = vst [vmem:[#allocation3 + $0x58] sm:$0xff] %v1132_v38  ;;  %v1067_v26 = vadd.f32 %v6224_v16, %v1025_v55  ;;  %v6727_v3 = vmov 0.0   ;;  %v1068_v5 = vadd.f32 %v6212_v51, %v1026_v39  ;;  %v1070_v28 = vadd.f32 %v6216_v14, %v1028_v59  ;;  %v1364_v51 = vld [vmem:[#allocation3 + $0x18] sm:$0xfe] }
 0x15c   : > { %1196 = vst.msk [vmem:[#allocation3 + $0x41] ss:$8 sm:$0xf] %vm6181_vm2, %v6727_v3  ;;  %v1027_v29 = vadd.f32 %v944_v56, %v6247_v34  ;;  %v1029_v6 = vadd.f32 %v1005_v57, %v6250_v35  ;;  %v1133_v17 = vrot.slane %v1084_v60, 7  ;;  %v1137_v18 = vrot.slane %v1086_v61, 7  ;;  %v947_v40 = vpop.f32.mrf.mxu0  ;;  %v1008_v41 = vpop.f32.mrf.mxu1 }
 0x15d   : > { %v1085_v19 = vmax.f32 %v1065_v63, 0.0  ;;  %v1087_v20 = vmax.f32 %v1067_v26, 0.0  ;;  %v1088_v42 = vmax.f32 %v1068_v5, 0.0  ;;  %v1090_v43 = vmax.f32 %v1070_v28, 0.0 }
 0x15e   : > { %v1069_v10 = vadd.f32 %v6220_v15, %v1027_v29  ;;  %v1071_v11 = vadd.f32 %v6224_v16, %v1029_v6  ;;  %v1134_v14 = vsel %vm1112_vm3, %v1125_v30, %v1133_v17  ;;  %v1138_v34 = vsel %vm1112_vm3, %v1129_v31, %v1137_v18 }
 0x15f   : > { %v1135_v13 = vrot.slane %v1085_v19, 7  ;;  %v1139_v35 = vrot.slane %v1087_v20, 7  ;;  %v1141_v21 = vrot.slane %v1088_v42, 7  ;;  %v1145_v22 = vrot.slane %v1090_v43, 7  ;;  %v5392_v43 = vld [vmem:[#allocation8 + $0x4e8] ss:$16 sps:$4 sm:$0xff]  }
 0x160   : > { %v1089_v7 = vmax.f32 %v1069_v10, 0.0  ;;  %v1091_v1 = vmax.f32 %v1071_v11, 0.0  ;;  %v1370_v15 = vpack.c.bf16 %v6269_v44, %v1362_v12  ;;  %v1372_v16 = vpack.c.bf16 %v6272_v45, %v1364_v51 }
 0x161   : > { %v1136_v24 = vsel %vm1112_vm3, %v1127_v50, %v1135_v13  ;;  %v1140_v25 = vsel %vm1112_vm3, %v1131_v52, %v1139_v35  ;;  %v1142_v32 = vsel %vm1112_vm3, %v1133_v17, %v1141_v21  ;;  %v1146_v30 = vsel %vm1112_vm3, %v1137_v18, %v1145_v22  ;;  %v5395_v22 = vld [vmem:[#allocation8 + $0x6e8] ss:$16 sps:$4 sm:$0xff]  }
 0x162   : > { %v1143_v33 = vrot.slane %v1089_v7, 7  ;;  %v1147_v31 = vrot.slane %v1091_v1, 7  ;;  %1185 = vst [vmem:[#allocation3 + $0x80] sm:$0x3] %v1142_v32  ;;  %1187 = vst [vmem:[#allocation3 + $0x90] sm:$0x3] %v1146_v30  ;;  %v1369_v59 = vpack.c.bf16 %v6261_v23, %v1361_v46  ;;  %v1371_v26 = vpack.c.bf16 %v6264_v0, %v1363_v36 }
 0x163   : > { %v1210_v47 = vld [vmem:[#allocation3 + $0x48] sm:$0xff]  ;;  %v1520_v48 = vshrl.u32 %v1370_v15, 16  ;;  %v1522_v37 = vshll.u32 %v1370_v15, 16  ;;  %v1212_v49 = vld [vmem:[#allocation3 + $0x58] sm:$0xff]  ;;  %v1544_v50 = vshrl.u32 %v1372_v16, 16  ;;  %v1546_v52 = vshll.u32 %v1372_v16, 16 }
 0x164   : > { %v1144_v53 = vsel %vm1112_vm3, %v1135_v13, %v1143_v33  ;;  %v1148_v54 = vsel %vm1112_vm3, %v1139_v35, %v1147_v31  ;;  %v6309_v9 = vpack.c.bf16 %v1136_v24, %v1210_v47  ;;  %v6311_v55 = vpack.c.bf16 %v1140_v25, %v1212_v49  ;;  %v1209_v56 = vld [vmem:[#allocation3 + $0x40] sm:$0xff]  ;;  %v1211_v57 = vld [vmem:[#allocation3 + $0x50] sm:$0xff]  ;;  %v5398_v36 = vld [vmem:[#allocation8 + $0x4c8] ss:$16 sps:$4 sm:$0xff]  }
 0x165   : > { %1186 = vst [vmem:[#allocation3 + $0x88] sm:$0x3] %v1144_v53  ;;  %1188 = vst [vmem:[#allocation3 + $0x98] sm:$0x3] %v1148_v54  ;;  %v1524_v58 = vrot.slane %v1522_v37, 1  ;;  %v1548_v38 = vrot.slane %v1546_v52, 1  ;;  %v6313_v39 = vpack.c.bf16 %v1134_v14, %v1209_v56  ;;  %v6318_v63 = vpack.c.bf16 %v1138_v34, %v1211_v57 }
 0x166   : > { %v1527_v60 = vshll.u32 %v6309_v9, 16  ;;  %v1551_v61 = vshll.u32 %v6311_v55, 16  ;;  %v1510_v27 = vshll.u32 %v1369_v59, 16  ;;  %v1508_v29 = vshrl.u32 %v1369_v59, 16  ;;  %v5400_v13 = vld [vmem:[#allocation8 + $0x4cc] ss:$16 sps:$4 sm:$0xff]  }
 0x167   : > { %v1525_v2 = vor.u32 %v1524_v58, %v1520_v48  ;;  %v1549_v4 = vor.u32 %v1548_v38, %v1544_v50  ;;  %v1515_v28 = vshll.u32 %v6313_v39, 16  ;;  %v1534_v17 = vshll.u32 %v1371_v26, 16  ;;  %v5403_v32 = vld [vmem:[#allocation8 + $0x6cc] ss:$16 sps:$4 sm:$0xff]   ;;  %v5401_v37 = vld [vmem:[#allocation8 + $0x6c8] ss:$16 sps:$4 sm:$0xff]  }
 0x168   : > { %v1529_v3 = vrot.slane %v1527_v60, 1  ;;  %v1553_v5 = vrot.slane %v1551_v61, 1  ;;  %v1512_v6 = vrot.slane %v1510_v27, 1  ;;  %v1539_v18 = vshll.u32 %v6318_v63, 16  ;;  %v5406_v54 = vld [vmem:[#allocation8 + $0x4ac] ss:$16 sps:$4 sm:$0xff]  }
 0x169   : > { %v1517_v40 = vrot.slane %v1515_v28, 1  ;;  %v1365_v41 = vld [vmem:[#allocation3 + $0x80] sm:$0x3]  ;;  %v1367_v42 = vld [vmem:[#allocation3 + $0x90] sm:$0x3]  ;;  %v1532_v11 = vshrl.u32 %v1371_v26, 16 }
 0x16a   : > { %v6324_v19 = vsel %vm1506_vm4, %v1525_v2, %v1529_v3  ;;  %v6327_v20 = vsel %vm1506_vm4, %v1549_v4, %v1553_v5  ;;  %v1513_v10 = vor.u32 %v1512_v6, %v1508_v29  ;;  %v1536_v12 = vrot.slane %v1534_v17, 1  ;;  %v5409_v57 = vld [vmem:[#allocation8 + $0x6ac] ss:$16 sps:$4 sm:$0xff]   ;;  %v5404_v60 = vld [vmem:[#allocation8 + $0x4a8] ss:$16 sps:$4 sm:$0xff]  }
 0x16b   : > { %2279 = vmatprep.mubr.bf16.mxu0 %v6324_v19  ;;  %2340 = vmatprep.mubr.bf16.mxu1 %v6327_v20  ;;  %v1541_v51 = vrot.slane %v1539_v18, 1  ;;  %v6331_v35 = vpack.c.bf16 %v1365_v41, %v1365_v41  ;;  %v6333_v21 = vpack.c.bf16 %v1367_v42, %v1367_v42  ;;  %v1563_v15 = vshrl.u32 %v6309_v9, 16  ;;  %v5412_v2 = vld [vmem:[#allocation8 + $0x48c] ss:$16 sps:$4 sm:$0xff]   ;;  %v5407_v27 = vld [vmem:[#allocation8 + $0x6a8] ss:$16 sps:$4 sm:$0xff]  }
 0x16c   : > { %v1366_v14 = vld [vmem:[#allocation3 + $0x88] sm:$0x3]  ;;  %v1368_v34 = vld [vmem:[#allocation3 + $0x98] sm:$0x3]  ;;  %v6336_v7 = vsel %vm1506_vm4, %v1513_v10, %v1517_v40  ;;  %v1537_v1 = vor.u32 %v1536_v12, %v1532_v11  ;;  %v1579_v16 = vshrl.u32 %v6311_v55, 16  ;;  %v1555_v49 = vshrl.u32 %v6313_v39, 16 }
 0x16d   : > { %v6338_v24 = vpack.c.bf16 %v1366_v14, %v1366_v14  ;;  %v6340_v25 = vpack.c.bf16 %v1368_v34, %v1368_v34  ;;  %2280 = vmatmul.mubr.bf16.vlgmr.msra.gmra.mxu0 %v6336_v7  ;;  %v1559_v30 = vshll.u32 %v6331_v35, 16  ;;  %v1575_v47 = vshll.u32 %v6333_v21, 16  ;;  %v5415_v28 = vld [vmem:[#allocation8 + $0x68c] ss:$16 sps:$4 sm:$0xff]   ;;  %v5410_v17 = vld [vmem:[#allocation8 + $0x488] ss:$16 sps:$4 sm:$0xff]  }
 0x16e   : > { %v6347_v33 = vsel %vm1506_vm4, %v1537_v1, %v1541_v51  ;;  %2370 = vmatpush1.bf16.msra.mxu0 %v5392_v43  ;;  %v1565_v48 = vor.u32 %v1563_v15, %v1529_v3  ;;  %v1581_v52 = vor.u32 %v1579_v16, %v1553_v5  ;;  %v1557_v58 = vor.u32 %v1555_v49, %v1517_v40  ;;  %v5418_v18 = vld [vmem:[#allocation8 + $0x46c] ss:$16 sps:$4 sm:$0xff]   ;;  %v5413_v40 = vld [vmem:[#allocation8 + $0x688] ss:$16 sps:$4 sm:$0xff]  }
 0x16f   : > { %v1567_v31 = vshll.u32 %v6338_v24, 16  ;;  %v1583_v46 = vshll.u32 %v6340_v25, 16  ;;  %2341 = vmatmul.mubr.bf16.vlgmr.msra.gmra.mxu1 %v6347_v33  ;;  %2371 = vmatprep.subr.bf16.mxu0 %v5400_v13  ;;  %v1561_v56 = vrot.slane %v1559_v30, 1  ;;  %v1571_v61 = vshrl.u32 %v6318_v63, 16  ;;  %v5421_v41 = vld [vmem:[#allocation8 + $0x66c] ss:$16 sps:$4 sm:$0xff]  }
 0x170   : > { %2431 = vmatpush1.bf16.msra.mxu1 %v5395_v22  ;;  %v1577_v26 = vrot.slane %v1575_v47, 1  ;;  %v1589_v5 = vshrl.u32 %v6338_v24, 16  ;;  %v1593_v6 = vshrl.u32 %v6340_v25, 16  ;;  %v5416_v42 = vld [vmem:[#allocation8 + $0x468] ss:$16 sps:$4 sm:$0xff]   ;;  %v1587_v43 = vshrl.u32 %v6331_v35, 16 }
 0x171   : > { %v1569_v50 = vrot.slane %v1567_v31, 1  ;;  %v1585_v53 = vrot.slane %v1583_v46, 1  ;;  %2432 = vmatprep.subr.bf16.mxu1 %v5403_v32  ;;  %v6364_v3 = vsel %vm1506_vm4, %v1557_v58, %v1561_v56  ;;  %v1573_v4 = vor.u32 %v1571_v61, %v1541_v51  ;;  %v5424_v10 = vld [vmem:[#allocation8 + $0x44c] ss:$16 sps:$4 sm:$0xff]   ;;  %v5419_v11 = vld [vmem:[#allocation8 + $0x668] ss:$16 sps:$4 sm:$0xff]  }
 0x172   : > { %2372 = vmatpush1.bf16.msra.mxu0 %v5398_v36  ;;  %v1591_v12 = vshrl.u32 %v6333_v21, 16  ;;  %v5427_v51 = vld [vmem:[#allocation8 + $0x64c] ss:$16 sps:$4 sm:$0xff]   ;;  %v5422_v14 = vld [vmem:[#allocation8 + $0x448] ss:$16 sps:$4 sm:$0xff]  }
 0x173   : > { %v6355_v38 = vsel %vm1506_vm4, %v1565_v48, %v1569_v50  ;;  %v6358_v59 = vsel %vm1506_vm4, %v1581_v52, %v1585_v53  ;;  %2373 = vmatprep.subr.bf16.mxu0 %v5406_v54  ;;  %v6369_v29 = vsel %vm1506_vm4, %v1573_v4, %v1577_v26  ;;  %v5430_v34 = vld [vmem:[#allocation8 + $0x42c] ss:$16 sps:$4 sm:$0xff]   ;;  %v5425_v13 = vld [vmem:[#allocation8 + $0x648] ss:$16 sps:$4 sm:$0xff]   ;;  %v5520_v24 = vld [vmem:[#allocation8 + $0x44] ss:$16 sps:$4 sm:$0xff]  }
 0x174   : > { %2289 = vmatprep.mubr.bf16.mxu0 %v6355_v38  ;;  %2350 = vmatprep.mubr.bf16.mxu1 %v6358_v59  ;;  %v5433_v22 = vld [vmem:[#allocation8 + $0x62c] ss:$16 sps:$4 sm:$0xff]   ;;  %v5428_v1 = vld [vmem:[#allocation8 + $0x428] ss:$16 sps:$4 sm:$0xff]   ;;  %v5523_v25 = vld [vmem:[#allocation8 + $0x244] ss:$16 sps:$4 sm:$0xff]  }
 0x175   : > { %2433 = vmatpush1.bf16.msra.mxu1 %v5401_v37  ;;  %2290 = vmatmul.mubr.bf16.gmra.mxu0 %v6364_v3  ;;  %v5436_v15 = vld [vmem:[#allocation8 + $0x40c] ss:$16 sps:$4 sm:$0xff]   ;;  %v5431_v16 = vld [vmem:[#allocation8 + $0x628] ss:$16 sps:$4 sm:$0xff]   ;;  %v5529_v35 = vld [vmem:[#allocation8 + $0x224] ss:$16 sps:$4 sm:$0xff]  }
 0x176   : > { %2434 = vmatprep.subr.bf16.mxu1 %v5409_v57  ;;  %2374 = vmatpush1.bf16.msra.mxu0 %v5404_v60  ;;  %v5434_v32 = vld [vmem:[#allocation8 + $0x408] ss:$16 sps:$4 sm:$0xff]   ;;  %v5442_v30 = vld [vmem:[#allocation8 + $0x5ec] ss:$16 sps:$4 sm:$0xff]   ;;  %v5538_v21 = vld [vmem:[#allocation8 + $0x1e4] ss:$16 sps:$4 sm:$0xff]  }
 0x177   : > { %2299 = vmatprep.mubr.bf16.mxu0 %v1589_v5  ;;  %2351 = vmatmul.mubr.bf16.gmra.mxu1 %v6369_v29  ;;  %v5437_v31 = vld [vmem:[#allocation8 + $0x608] ss:$16 sps:$4 sm:$0xff]   ;;  %v5445_v46 = vld [vmem:[#allocation8 + $0x7ec] ss:$16 sps:$4 sm:$0xff]  }
 0x178   : > { %2375 = vmatprep.subr.bf16.mxu0 %v5412_v2  ;;  %2360 = vmatprep.mubr.bf16.mxu1 %v1593_v6  ;;  %v5448_v36 = vld [vmem:[#allocation8 + $0x5cc] ss:$16 sps:$4 sm:$0xff]   ;;  %v5443_v47 = vld [vmem:[#allocation8 + $0x7e8] ss:$16 sps:$4 sm:$0xff]  }
 0x179   : > { %2435 = vmatpush1.bf16.msra.mxu1 %v5407_v27  ;;  %v5451_v48 = vld [vmem:[#allocation8 + $0x7cc] ss:$16 sps:$4 sm:$0xff]   ;;  %v5446_v37 = vld [vmem:[#allocation8 + $0x5c8] ss:$16 sps:$4 sm:$0xff]  }
 0x17a   : > { %2436 = vmatprep.subr.bf16.mxu1 %v5415_v28  ;;  %2376 = vmatpush1.bf16.msra.mxu0 %v5410_v17  ;;  %v5454_v49 = vld [vmem:[#allocation8 + $0x5ac] ss:$16 sps:$4 sm:$0xff]   ;;  %v5449_v50 = vld [vmem:[#allocation8 + $0x7c8] ss:$16 sps:$4 sm:$0xff]  }
 0x17b   : > { %2377 = vmatprep.subr.bf16.mxu0 %v5418_v18  ;;  %v5457_v52 = vld [vmem:[#allocation8 + $0x7ac] ss:$16 sps:$4 sm:$0xff]   ;;  %v5452_v53 = vld [vmem:[#allocation8 + $0x5a8] ss:$16 sps:$4 sm:$0xff]  }
 0x17c   : > { %v5460_v54 = vld [vmem:[#allocation8 + $0x58c] ss:$16 sps:$4 sm:$0xff]   ;;  %v5455_v56 = vld [vmem:[#allocation8 + $0x7a8] ss:$16 sps:$4 sm:$0xff]  }
 0x17d   : > { %2437 = vmatpush1.bf16.msra.mxu1 %v5413_v40  ;;  %2300 = vmatmul.mubr.bf16.gmra.mxu0 %v1587_v43  ;;  %v5463_v57 = vld [vmem:[#allocation8 + $0x78c] ss:$16 sps:$4 sm:$0xff]   ;;  %v5458_v58 = vld [vmem:[#allocation8 + $0x588] ss:$16 sps:$4 sm:$0xff]  }
 0x17e   : > { %2438 = vmatprep.subr.bf16.mxu1 %v5421_v41  ;;  %2378 = vmatpush1.bf16.msra.mxu0 %v5416_v42  ;;  %v5466_v60 = vld [vmem:[#allocation8 + $0x56c] ss:$16 sps:$4 sm:$0xff]   ;;  %v5461_v61 = vld [vmem:[#allocation8 + $0x788] ss:$16 sps:$4 sm:$0xff]  }
 0x17f   : > { %2401 = vmatprep.mubr.bf16.mxu0 %v6324_v19  ;;  %2361 = vmatmul.mubr.bf16.gmra.mxu1 %v1591_v12  ;;  %v5439_v19 = vld [vmem:[#allocation8 + $0x60c] ss:$16 sps:$4 sm:$0xff]   ;;  %v5464_v2 = vld [vmem:[#allocation8 + $0x568] ss:$16 sps:$4 sm:$0xff]  }
 0x180   : > { %2379 = vmatprep.subr.bf16.mxu0 %v5424_v10  ;;  %2462 = vmatprep.mubr.bf16.mxu1 %v6327_v20  ;;  %v5440_v20 = vld [vmem:[#allocation8 + $0x5e8] ss:$16 sps:$4 sm:$0xff]   ;;  %v5469_v26 = vld [vmem:[#allocation8 + $0x76c] ss:$16 sps:$4 sm:$0xff]  }
 0x181   : > { %2439 = vmatpush1.bf16.msra.mxu1 %v5419_v11  ;;  %v5472_v27 = vld [vmem:[#allocation8 + $0x54c] ss:$16 sps:$4 sm:$0xff]   ;;  %v5467_v4 = vld [vmem:[#allocation8 + $0x768] ss:$16 sps:$4 sm:$0xff]  }
 0x182   : > { %2440 = vmatprep.subr.bf16.mxu1 %v5427_v51  ;;  %2380 = vmatpush1.bf16.msra.mxu0 %v5422_v14  ;;  %v5475_v28 = vld [vmem:[#allocation8 + $0x74c] ss:$16 sps:$4 sm:$0xff]   ;;  %v5470_v17 = vld [vmem:[#allocation8 + $0x548] ss:$16 sps:$4 sm:$0xff]  }
 0x183   : > { %2381 = vmatprep.subr.bf16.mxu0 %v5430_v34  ;;  %v5478_v18 = vld [vmem:[#allocation8 + $0x52c] ss:$16 sps:$4 sm:$0xff]   ;;  %v5473_v40 = vld [vmem:[#allocation8 + $0x748] ss:$16 sps:$4 sm:$0xff]   ;;  %v5490_v34 = vld [vmem:[#allocation8 + $0xe4] ss:$16 sps:$4 sm:$0xff]  }
 0x184   : > { %v5481_v41 = vld [vmem:[#allocation8 + $0x72c] ss:$16 sps:$4 sm:$0xff]   ;;  %v5476_v42 = vld [vmem:[#allocation8 + $0x528] ss:$16 sps:$4 sm:$0xff]  }
 0x185   : > { %2441 = vmatpush1.bf16.msra.mxu1 %v5425_v13  ;;  %v5484_v10 = vld [vmem:[#allocation8 + $0x50c] ss:$16 sps:$4 sm:$0xff]   ;;  %v5479_v11 = vld [vmem:[#allocation8 + $0x728] ss:$16 sps:$4 sm:$0xff]  }
 0x186   : > { %2442 = vmatprep.subr.bf16.mxu1 %v5433_v22  ;;  %2382 = vmatpush1.bf16.msra.mxu0 %v5428_v1  ;;  %v5487_v51 = vld [vmem:[#allocation8 + $0x70c] ss:$16 sps:$4 sm:$0xff]   ;;  %v5482_v14 = vld [vmem:[#allocation8 + $0x508] ss:$16 sps:$4 sm:$0xff]   ;;  %v5493_v22 = vld [vmem:[#allocation8 + $0x2e4] ss:$16 sps:$4 sm:$0xff]  }
 0x187   : > { %2383 = vmatprep.subr.bf16.mxu0 %v5436_v15  ;;  %v5485_v13 = vld [vmem:[#allocation8 + $0x708] ss:$16 sps:$4 sm:$0xff]   ;;  %v5488_v1 = vld [vmem:[#allocation8 + $0xe0] ss:$16 sps:$4 sm:$0xff]   ;;  %v5496_v15 = vld [vmem:[#allocation8 + $0xc4] ss:$16 sps:$4 sm:$0xff]  }
 0x189   : > { %2443 = vmatpush1.bf16.msra.mxu1 %v5431_v16  ;;  %v5491_v16 = vld [vmem:[#allocation8 + $0x2e0] ss:$16 sps:$4 sm:$0xff]  }
 0x18a   : > { %2444 = vmatprep.subr.bf16.mxu1 %v5439_v19  ;;  %2384 = vmatpush1.bf16.msra.mxu0 %v5434_v32  ;;  %v5499_v19 = vld [vmem:[#allocation8 + $0x2c4] ss:$16 sps:$4 sm:$0xff]   ;;  %v5494_v32 = vld [vmem:[#allocation8 + $0xc0] ss:$16 sps:$4 sm:$0xff]  }
 0x18b   : > { %2385 = vmatprep.subr.bf16.mxu0 %v5442_v30  ;;  %v5502_v30 = vld [vmem:[#allocation8 + $0xa4] ss:$16 sps:$4 sm:$0xff]  }
 0x18d   : > { %2445 = vmatpush1.bf16.msra.mxu1 %v5437_v31  ;;  %v5497_v31 = vld [vmem:[#allocation8 + $0x2c0] ss:$16 sps:$4 sm:$0xff]  }
 0x18e   : > { %2446 = vmatprep.subr.bf16.mxu1 %v5445_v46  ;;  %2386 = vmatpush2.bf16.msra.mxu0 %v5440_v20  ;;  %v5505_v46 = vld [vmem:[#allocation8 + $0x2a4] ss:$16 sps:$4 sm:$0xff]   ;;  %v5500_v20 = vld [vmem:[#allocation8 + $0xa0] ss:$16 sps:$4 sm:$0xff]  }
 0x18f   : > { %2387 = vmatprep.subr.bf16.mxu0 %v5448_v36  ;;  %v5503_v36 = vld [vmem:[#allocation8 + $0x2a0] ss:$16 sps:$4 sm:$0xff]  }
 0x191   : > { %2447 = vmatpush2.bf16.msra.mxu1 %v5443_v47  ;;  %v5509_v47 = vld [vmem:[#allocation8 + $0x280] ss:$16 sps:$4 sm:$0xff]  }
 0x192   : > { %2448 = vmatprep.subr.bf16.mxu1 %v5451_v48  ;;  %2388 = vmatpush2.bf16.msra.mxu0 %v5446_v37  ;;  %v5517_v48 = vld [vmem:[#allocation8 + $0x264] ss:$16 sps:$4 sm:$0xff]  }
 0x193   : > { %2389 = vmatprep.subr.bf16.mxu0 %v5454_v49  ;;  %v1202_v37 = vld [vmem:[#allocation3 + $0x8] sm:$0xff]  ;;  %v1204_v49 = vld [vmem:[#allocation3 + $0x18] sm:$0xff] }
 0x195   : > { %2449 = vmatpush2.bf16.msra.mxu1 %v5449_v50  ;;  %v6396_v50 = vpack.c.bf16 %v6269_v44, %v1202_v37  ;;  %v5521_v44 = vld [vmem:[#allocation8 + $0x240] ss:$16 sps:$4 sm:$0xff]   ;;  %v5592_v37 = vld [vmem:[#allocation8 + $0xcc] ss:$16 sps:$4 sm:$0xff]  }
 0x196   : > { %2450 = vmatprep.subr.bf16.mxu1 %v5457_v52  ;;  %2390 = vmatpush2.bf16.msra.mxu0 %v5452_v53  ;;  %v5526_v52 = vld [vmem:[#allocation8 + $0x24] ss:$16 sps:$4 sm:$0xff]  }
 0x197   : > { %2391 = vmatprep.subr.bf16.mxu0 %v5460_v54  ;;  %v5532_v53 = vld [vmem:[#allocation8 + $0x4] ss:$16 sps:$4 sm:$0xff]   ;;  %v5527_v54 = vld [vmem:[#allocation8 + $0x220] ss:$16 sps:$4 sm:$0xff]  }
 0x199   : > { %2451 = vmatpush2.bf16.msra.mxu1 %v5455_v56  ;;  %v5530_v56 = vld [vmem:[#allocation8] ss:$16 sps:$4 sm:$0xff]  }
 0x19a   : > { %2452 = vmatprep.subr.bf16.mxu1 %v5463_v57  ;;  %2392 = vmatpush2.bf16.msra.mxu0 %v5458_v58  ;;  %v5541_v57 = vld [vmem:[#allocation8 + $0x3e4] ss:$16 sps:$4 sm:$0xff]   ;;  %v5536_v58 = vld [vmem:[#allocation8 + $0x1e0] ss:$16 sps:$4 sm:$0xff]  }
 0x19b   : > { %2393 = vmatprep.subr.bf16.mxu0 %v5466_v60  ;;  %v5544_v60 = vld [vmem:[#allocation8 + $0x1c4] ss:$16 sps:$4 sm:$0xff]  }
 0x19d   : > { %2453 = vmatpush2.bf16.msra.mxu1 %v5461_v61  ;;  %v5539_v61 = vld [vmem:[#allocation8 + $0x3e0] ss:$16 sps:$4 sm:$0xff]  }
 0x19e   : > { %2454 = vmatprep.subr.bf16.mxu1 %v5469_v26  ;;  %2394 = vmatpush2.bf16.msra.mxu0 %v5464_v2  ;;  %v5547_v26 = vld [vmem:[#allocation8 + $0x3c4] ss:$16 sps:$4 sm:$0xff]   ;;  %v5542_v2 = vld [vmem:[#allocation8 + $0x1c0] ss:$16 sps:$4 sm:$0xff]  }
 0x19f   : > { %2395 = vmatprep.subr.bf16.mxu0 %v5472_v27  ;;  %v5550_v27 = vld [vmem:[#allocation8 + $0x1a4] ss:$16 sps:$4 sm:$0xff]  }
 0x1a1   : > { %2455 = vmatpush2.bf16.msra.mxu1 %v5467_v4  ;;  %v5545_v4 = vld [vmem:[#allocation8 + $0x3c0] ss:$16 sps:$4 sm:$0xff]  }
 0x1a2   : > { %2456 = vmatprep.subr.bf16.mxu1 %v5475_v28  ;;  %2396 = vmatpush2.bf16.msra.mxu0 %v5470_v17  ;;  %v5553_v28 = vld [vmem:[#allocation8 + $0x3a4] ss:$16 sps:$4 sm:$0xff]   ;;  %v5548_v17 = vld [vmem:[#allocation8 + $0x1a0] ss:$16 sps:$4 sm:$0xff]  }
 0x1a3   : > { %2397 = vmatprep.subr.bf16.mxu0 %v5478_v18  ;;  %v5556_v18 = vld [vmem:[#allocation8 + $0x184] ss:$16 sps:$4 sm:$0xff]  }
 0x1a5   : > { %2457 = vmatpush2.bf16.msra.mxu1 %v5473_v40  ;;  %v5551_v40 = vld [vmem:[#allocation8 + $0x3a0] ss:$16 sps:$4 sm:$0xff]  }
 0x1a6   : > { %2458 = vmatprep.subr.bf16.mxu1 %v5481_v41  ;;  %2398 = vmatpush2.bf16.msra.mxu0 %v5476_v42  ;;  %v5559_v41 = vld [vmem:[#allocation8 + $0x384] ss:$16 sps:$4 sm:$0xff]   ;;  %v5554_v42 = vld [vmem:[#allocation8 + $0x180] ss:$16 sps:$4 sm:$0xff]  }
 0x1a7   : > { %2399 = vmatprep.subr.bf16.mxu0 %v5484_v10  ;;  %v5562_v10 = vld [vmem:[#allocation8 + $0x164] ss:$16 sps:$4 sm:$0xff]  }
 0x1a9   : > { %2459 = vmatpush2.bf16.msra.mxu1 %v5479_v11  ;;  %v5557_v11 = vld [vmem:[#allocation8 + $0x380] ss:$16 sps:$4 sm:$0xff]  }
 0x1aa   : > { %2460 = vmatprep.subr.bf16.mxu1 %v5487_v51  ;;  %2400 = vmatpush2.bf16.msra.mxu0 %v5482_v14  ;;  %v5565_v51 = vld [vmem:[#allocation8 + $0x364] ss:$16 sps:$4 sm:$0xff]   ;;  %v5560_v14 = vld [vmem:[#allocation8 + $0x160] ss:$16 sps:$4 sm:$0xff]  }
 0x1ab   : > { %3131 = vmatprep.subr.bf16.mxu0 %v5490_v34  ;;  %v5568_v34 = vld [vmem:[#allocation8 + $0x144] ss:$16 sps:$4 sm:$0xff]  }
 0x1ad   : > { %2461 = vmatpush2.bf16.msra.mxu1 %v5485_v13  ;;  %2402 = vmatmul.mubr.bf16.vlgmr.msra.gmra.mxu0 %v6336_v7  ;;  %v5508_v7 = vld [vmem:[#allocation8 + $0x84] ss:$16 sps:$4 sm:$0xff]   ;;  %v5563_v13 = vld [vmem:[#allocation8 + $0x360] ss:$16 sps:$4 sm:$0xff]  }
 0x1ae   : > { %3192 = vmatprep.subr.bf16.mxu1 %v5493_v22  ;;  %2411 = vmatprep.mubr.bf16.mxu0 %v6355_v38  ;;  %v5511_v38 = vld [vmem:[#allocation8 + $0x284] ss:$16 sps:$4 sm:$0xff]  }
 0x1af   : > { %3132 = vmatpush1.bf16.msra.mxu0 %v5488_v1  ;;  %v5571_v22 = vld [vmem:[#allocation8 + $0x344] ss:$16 sps:$4 sm:$0xff]   ;;  %v5566_v1 = vld [vmem:[#allocation8 + $0x140] ss:$16 sps:$4 sm:$0xff]  }
 0x1b0   : > { %2463 = vmatmul.mubr.bf16.vlgmr.msra.gmra.mxu1 %v6347_v33  ;;  %3133 = vmatprep.subr.bf16.mxu0 %v5496_v15  ;;  %v5506_v33 = vld [vmem:[#allocation8 + $0x80] ss:$16 sps:$4 sm:$0xff]   ;;  %v5574_v15 = vld [vmem:[#allocation8 + $0x124] ss:$16 sps:$4 sm:$0xff]  }
 0x1b1   : > { %2472 = vmatprep.mubr.bf16.mxu1 %v6358_v59  ;;  %3193 = vmatpush1.bf16.msra.mxu1 %v5491_v16  ;;  %v5514_v59 = vld [vmem:[#allocation8 + $0x64] ss:$16 sps:$4 sm:$0xff]   ;;  %v5569_v16 = vld [vmem:[#allocation8 + $0x340] ss:$16 sps:$4 sm:$0xff]  }
 0x1b2   : > { %3194 = vmatprep.subr.bf16.mxu1 %v5499_v19  ;;  %v5577_v19 = vld [vmem:[#allocation8 + $0x324] ss:$16 sps:$4 sm:$0xff]  }
 0x1b3   : > { %3134 = vmatpush1.bf16.msra.mxu0 %v5494_v32  ;;  %v5572_v32 = vld [vmem:[#allocation8 + $0x120] ss:$16 sps:$4 sm:$0xff]  }
 0x1b4   : > { %3135 = vmatprep.subr.bf16.mxu0 %v5502_v30  ;;  %v5580_v30 = vld [vmem:[#allocation8 + $0x104] ss:$16 sps:$4 sm:$0xff]  }
 0x1b5   : > { %3195 = vmatpush1.bf16.msra.mxu1 %v5497_v31  ;;  %2412 = vmatmul.mubr.bf16.gmra.mxu0 %v6364_v3  ;;  %v5512_v3 = vld [vmem:[#allocation8 + $0x60] ss:$16 sps:$4 sm:$0xff]  }
 0x1b6   : > { %3196 = vmatprep.subr.bf16.mxu1 %v5505_v46  ;;  %2421 = vmatprep.mubr.bf16.mxu0 %v1589_v5  ;;  %v5515_v5 = vld [vmem:[#allocation8 + $0x260] ss:$16 sps:$4 sm:$0xff]   ;;  %v5583_v46 = vld [vmem:[#allocation8 + $0x304] ss:$16 sps:$4 sm:$0xff]  }
 0x1b7   : > { %3136 = vmatpush1.bf16.msra.mxu0 %v5500_v20  ;;  %v5575_v31 = vld [vmem:[#allocation8 + $0x320] ss:$16 sps:$4 sm:$0xff]  }
 0x1b8   : > { %2473 = vmatmul.mubr.bf16.gmra.mxu1 %v6369_v29  ;;  %3137 = vmatprep.subr.bf16.mxu0 %v5508_v7  ;;  %v6402_v29 = vpack.c.bf16 %v6272_v45, %v1204_v49  ;;  %v5535_v45 = vld [vmem:[#allocation8 + $0x204] ss:$16 sps:$4 sm:$0xff]   ;;  %v5578_v20 = vld [vmem:[#allocation8 + $0x100] ss:$16 sps:$4 sm:$0xff]   ;;  %v5586_v7 = vld [vmem:[#allocation8 + $0xec] ss:$16 sps:$4 sm:$0xff]  }
 0x1b9   : > { %2482 = vmatprep.mubr.bf16.mxu1 %v1593_v6  ;;  %3197 = vmatpush1.bf16.msra.mxu1 %v5503_v36  ;;  %v5518_v6 = vld [vmem:[#allocation8 + $0x40] ss:$16 sps:$4 sm:$0xff]  }
 0x1ba   : > { %3198 = vmatprep.subr.bf16.mxu1 %v5511_v38  ;;  %v5581_v36 = vld [vmem:[#allocation8 + $0x300] ss:$16 sps:$4 sm:$0xff]  }
 0x1bb   : > { %3138 = vmatpush1.bf16.msra.mxu0 %v5506_v33  ;;  %v1201_v38 = vld [vmem:[#allocation3] sm:$0xff] }
 0x1bc   : > { %3139 = vmatprep.subr.bf16.mxu0 %v5514_v59  ;;  %v5589_v33 = vld [vmem:[#allocation8 + $0x2ec] ss:$16 sps:$4 sm:$0xff]  }
 0x1bd   : > { %3199 = vmatpush1.bf16.msra.mxu1 %v5509_v47  ;;  %2422 = vmatmul.mubr.bf16.gmra.mxu0 %v1587_v43  ;;  %v5524_v43 = vld [vmem:[#allocation8 + $0x20] ss:$16 sps:$4 sm:$0xff]   ;;  %v5584_v47 = vld [vmem:[#allocation8 + $0xe8] ss:$16 sps:$4 sm:$0xff]  }
 0x1be   : > { %3200 = vmatprep.subr.bf16.mxu1 %v5517_v48  ;;  %3163 = vmatprep.mubr.bf16.mxu0 %v6396_v50  ;;  %v1203_v59 = vld [vmem:[#allocation3 + $0x10] sm:$0xff]  ;;  %v6408_v48 = vpack.c.bf16 %v6261_v23, %v1201_v38 }
 0x1bf   : > { %3140 = vmatpush1.bf16.msra.mxu0 %v5512_v3  ;;  %v5587_v3 = vld [vmem:[#allocation8 + $0x2e8] ss:$16 sps:$4 sm:$0xff]   ;;  %v6412_v49 = vpack.c.bf16 %v6264_v0, %v1203_v59  ;;  %v5598_v23 = vld [vmem:[#allocation8 + $0xac] ss:$16 sps:$4 sm:$0xff]  }
 0x1c0   : > { %2483 = vmatmul.mubr.bf16.gmra.mxu1 %v1591_v12  ;;  %3141 = vmatprep.subr.bf16.mxu0 %v5520_v24  ;;  %v5533_v12 = vld [vmem:[#allocation8 + $0x200] ss:$16 sps:$4 sm:$0xff]   ;;  %v5595_v24 = vld [vmem:[#allocation8 + $0x2cc] ss:$16 sps:$4 sm:$0xff]   ;;  %v5596_v0 = vld [vmem:[#allocation8 + $0xa8] ss:$16 sps:$4 sm:$0xff]  }
 0x1c1   : > { %3201 = vmatpush1.bf16.msra.mxu1 %v5515_v5  ;;  %3224 = vmatprep.mubr.bf16.mxu1 %v6402_v29  ;;  %v5590_v5 = vld [vmem:[#allocation8 + $0xc8] ss:$16 sps:$4 sm:$0xff]   ;;  %v5658_v38 = vld [vmem:[#allocation8 + $0x16c] ss:$16 sps:$4 sm:$0xff]  }
 0x1c2   : > { %3202 = vmatprep.subr.bf16.mxu1 %v5523_v25  ;;  %v5593_v25 = vld [vmem:[#allocation8 + $0x2c8] ss:$16 sps:$4 sm:$0xff]   ;;  %v5661_v59 = vld [vmem:[#allocation8 + $0x36c] ss:$16 sps:$4 sm:$0xff]  }
 0x1c3   : > { %3142 = vmatpush1.bf16.msra.mxu0 %v5518_v6  ;;  %v5601_v6 = vld [vmem:[#allocation8 + $0x2ac] ss:$16 sps:$4 sm:$0xff]  }
 0x1c4   : > { %3143 = vmatprep.subr.bf16.mxu0 %v5526_v52  ;;  %v1218_v52 = vld [vmem:[#allocation3 + $0x88] sm:$0x1] }
 0x1c5   : > { %3203 = vmatpush1.bf16.msra.mxu1 %v5521_v44  ;;  %v1220_v44 = vld [vmem:[#allocation3 + $0x98] sm:$0x1] }
 0x1c6   : > { %3204 = vmatprep.subr.bf16.mxu1 %v5529_v35  ;;  %v5604_v35 = vld [vmem:[#allocation8 + $0x8c] ss:$16 sps:$4 sm:$0xff]  }
 0x1c7   : > { %3144 = vmatpush1.bf16.msra.mxu0 %v5524_v43  ;;  %v5599_v43 = vld [vmem:[#allocation8 + $0x2a8] ss:$16 sps:$4 sm:$0xff]  }
 0x1c8   : > { %3145 = vmatprep.subr.bf16.mxu0 %v5532_v53  ;;  %v6417_v53 = vpack.c.bf16 %v1218_v52, %v1218_v52  ;;  %v5668_v52 = vld [vmem:[#allocation8 + $0x128] ss:$16 sps:$4 sm:$0xff]  }
 0x1c9   : > { %3205 = vmatpush1.bf16.msra.mxu1 %v5527_v54  ;;  %v5607_v54 = vld [vmem:[#allocation8 + $0x28c] ss:$16 sps:$4 sm:$0xff]  }
 0x1ca   : > { %3206 = vmatprep.subr.bf16.mxu1 %v5535_v45  ;;  %v6421_v45 = vpack.c.bf16 %v1220_v44, %v1220_v44  ;;  %v5671_v44 = vld [vmem:[#allocation8 + $0x328] ss:$16 sps:$4 sm:$0xff]  }
 0x1cb   : > { %3146 = vmatpush1.bf16.msra.mxu0 %v5530_v56  ;;  %v5602_v56 = vld [vmem:[#allocation8 + $0x88] ss:$16 sps:$4 sm:$0xff]  }
 0x1cc   : > { %3147 = vmatprep.subr.bf16.mxu0 %v5538_v21  ;;  %v5610_v21 = vld [vmem:[#allocation8 + $0x6c] ss:$16 sps:$4 sm:$0xff]  }
 0x1cd   : > { %3207 = vmatpush1.bf16.msra.mxu1 %v5533_v12  ;;  %v5605_v12 = vld [vmem:[#allocation8 + $0x288] ss:$16 sps:$4 sm:$0xff]  }
 0x1ce   : > { %3208 = vmatprep.subr.bf16.mxu1 %v5541_v57  ;;  %v1217_v57 = vld [vmem:[#allocation3 + $0x80] sm:$0x1] }
 0x1cf   : > { %3148 = vmatpush2.bf16.msra.mxu0 %v5536_v58  ;;  %v5613_v58 = vld [vmem:[#allocation8 + $0x26c] ss:$16 sps:$4 sm:$0xff]  }
 0x1d0   : > { %3149 = vmatprep.subr.bf16.mxu0 %v5544_v60  ;;  %v1219_v60 = vld [vmem:[#allocation3 + $0x90] sm:$0x1] }
 0x1d1   : > { %3209 = vmatpush2.bf16.msra.mxu1 %v5539_v61  ;;  %v5608_v61 = vld [vmem:[#allocation8 + $0x68] ss:$16 sps:$4 sm:$0xff]  }
 0x1d2   : > { %3210 = vmatprep.subr.bf16.mxu1 %v5547_v26  ;;  %v6425_v26 = vpack.c.bf16 %v1217_v57, %v1217_v57  ;;  %v5688_v57 = vld [vmem:[#allocation8 + $0x8c4] ss:$16 sps:$4 sm:$0xff]  }
 0x1d3   : > { %3150 = vmatpush2.bf16.msra.mxu0 %v5542_v2  ;;  %v5616_v2 = vld [vmem:[#allocation8 + $0x4c] ss:$16 sps:$4 sm:$0xff]  }
 0x1d4   : > { %3151 = vmatprep.subr.bf16.mxu0 %v5550_v27  ;;  %v5611_v27 = vld [vmem:[#allocation8 + $0x268] ss:$16 sps:$4 sm:$0xff]  }
 0x1d5   : > { %3211 = vmatpush2.bf16.msra.mxu1 %v5545_v4  ;;  %v6428_v4 = vpack.c.bf16 %v1219_v60, %v1219_v60 }
 0x1d6   : > { %3212 = vmatprep.subr.bf16.mxu1 %v5553_v28  ;;  %v5619_v28 = vld [vmem:[#allocation8 + $0x24c] ss:$16 sps:$4 sm:$0xff]  }
 0x1d7   : > { %3152 = vmatpush2.bf16.msra.mxu0 %v5548_v17  ;;  %v5614_v17 = vld [vmem:[#allocation8 + $0x48] ss:$16 sps:$4 sm:$0xff]  }
 0x1d8   : > { %3153 = vmatprep.subr.bf16.mxu0 %v5556_v18  ;;  %v5622_v18 = vld [vmem:[#allocation8 + $0x2c] ss:$16 sps:$4 sm:$0xff]  }
 0x1d9   : > { %3213 = vmatpush2.bf16.msra.mxu1 %v5551_v40  ;;  %v5617_v40 = vld [vmem:[#allocation8 + $0x248] ss:$16 sps:$4 sm:$0xff]  }
 0x1da   : > { %3214 = vmatprep.subr.bf16.mxu1 %v5559_v41  ;;  %v5625_v41 = vld [vmem:[#allocation8 + $0x22c] ss:$16 sps:$4 sm:$0xff]  }
 0x1db   : > { %3154 = vmatpush2.bf16.msra.mxu0 %v5554_v42  ;;  %v5620_v42 = vld [vmem:[#allocation8 + $0x28] ss:$16 sps:$4 sm:$0xff]  }
 0x1dc   : > { %3155 = vmatprep.subr.bf16.mxu0 %v5562_v10  ;;  %v5628_v10 = vld [vmem:[#allocation8 + $0xc] ss:$16 sps:$4 sm:$0xff]  }
 0x1dd   : > { %3215 = vmatpush2.bf16.msra.mxu1 %v5557_v11  ;;  %v5623_v11 = vld [vmem:[#allocation8 + $0x228] ss:$16 sps:$4 sm:$0xff]  }
 0x1de   : > { %3216 = vmatprep.subr.bf16.mxu1 %v5565_v51  ;;  %v5631_v51 = vld [vmem:[#allocation8 + $0x20c] ss:$16 sps:$4 sm:$0xff]  }
 0x1df   : > { %3156 = vmatpush2.bf16.msra.mxu0 %v5560_v14  ;;  %v5634_v14 = vld [vmem:[#allocation8 + $0x1ec] ss:$16 sps:$4 sm:$0xff]  }
 0x1e0   : > { %3157 = vmatprep.subr.bf16.mxu0 %v5568_v34  ;;  %v5629_v34 = vld [vmem:[#allocation8 + $0x208] ss:$16 sps:$4 sm:$0xff]  }
 0x1e1   : > { %3217 = vmatpush2.bf16.msra.mxu1 %v5563_v13  ;;  %v5637_v13 = vld [vmem:[#allocation8 + $0x3ec] ss:$16 sps:$4 sm:$0xff]  }
 0x1e2   : > { %3218 = vmatprep.subr.bf16.mxu1 %v5571_v22  ;;  %v5640_v22 = vld [vmem:[#allocation8 + $0x1cc] ss:$16 sps:$4 sm:$0xff]  }
 0x1e3   : > { %3158 = vmatpush2.bf16.msra.mxu0 %v5566_v1  ;;  %v5635_v1 = vld [vmem:[#allocation8 + $0x3e8] ss:$16 sps:$4 sm:$0xff]  }
 0x1e4   : > { %3159 = vmatprep.subr.bf16.mxu0 %v5574_v15  ;;  %v5643_v15 = vld [vmem:[#allocation8 + $0x3cc] ss:$16 sps:$4 sm:$0xff]  }
 0x1e5   : > { %3219 = vmatpush2.bf16.msra.mxu1 %v5569_v16  ;;  %v5638_v16 = vld [vmem:[#allocation8 + $0x1c8] ss:$16 sps:$4 sm:$0xff]  }
 0x1e6   : > { %3220 = vmatprep.subr.bf16.mxu1 %v5577_v19  ;;  %v5646_v19 = vld [vmem:[#allocation8 + $0x1ac] ss:$16 sps:$4 sm:$0xff]  }
 0x1e7   : > { %3160 = vmatpush2.bf16.msra.mxu0 %v5572_v32  ;;  %v5641_v32 = vld [vmem:[#allocation8 + $0x3c8] ss:$16 sps:$4 sm:$0xff]  }
 0x1e8   : > { %3161 = vmatprep.subr.bf16.mxu0 %v5580_v30  ;;  %v5649_v30 = vld [vmem:[#allocation8 + $0x3ac] ss:$16 sps:$4 sm:$0xff]  }
 0x1e9   : > { %3221 = vmatpush2.bf16.msra.mxu1 %v5575_v31  ;;  %v5644_v31 = vld [vmem:[#allocation8 + $0x1a8] ss:$16 sps:$4 sm:$0xff]  }
 0x1ea   : > { %3222 = vmatprep.subr.bf16.mxu1 %v5583_v46  ;;  %v5652_v46 = vld [vmem:[#allocation8 + $0x18c] ss:$16 sps:$4 sm:$0xff]  }
 0x1eb   : > { %3162 = vmatpush2.bf16.msra.mxu0 %v5578_v20  ;;  %v5647_v20 = vld [vmem:[#allocation8 + $0x3a8] ss:$16 sps:$4 sm:$0xff]  }
 0x1ec   : > { %3253 = vmatprep.subr.bf16.mxu0 %v5586_v7  ;;  %v5655_v7 = vld [vmem:[#allocation8 + $0x38c] ss:$16 sps:$4 sm:$0xff]  }
 0x1ed   : > { %3223 = vmatpush2.bf16.msra.mxu1 %v5581_v36  ;;  %v5650_v36 = vld [vmem:[#allocation8 + $0x188] ss:$16 sps:$4 sm:$0xff]  }
 0x1ee   : > { %3164 = vmatmul.mubr.bf16.vlgmr.msra.gmra.mxu0 %v6408_v48  ;;  %3314 = vmatprep.subr.bf16.mxu1 %v5589_v33  ;;  %v5653_v33 = vld [vmem:[#allocation8 + $0x388] ss:$16 sps:$4 sm:$0xff]  }
 0x1ef   : > { %3173 = vmatprep.mubr.bf16.mxu0 %v6309_v9  ;;  %3254 = vmatpush1.bf16.msra.mxu0 %v5584_v47  ;;  %v5656_v47 = vld [vmem:[#allocation8 + $0x168] ss:$16 sps:$4 sm:$0xff]  }
 0x1f0   : > { %3225 = vmatmul.mubr.bf16.vlgmr.msra.gmra.mxu1 %v6412_v49  ;;  %3255 = vmatprep.subr.bf16.mxu0 %v5592_v37  ;;  %v5664_v37 = vld [vmem:[#allocation8 + $0x14c] ss:$16 sps:$4 sm:$0xff]  }
 0x1f1   : > { %3234 = vmatprep.mubr.bf16.mxu1 %v6311_v55  ;;  %3315 = vmatpush1.bf16.msra.mxu1 %v5587_v3  ;;  %v5659_v3 = vld [vmem:[#allocation8 + $0x368] ss:$16 sps:$4 sm:$0xff]  }
 0x1f2   : > { %3316 = vmatprep.subr.bf16.mxu1 %v5595_v24  ;;  %v5667_v24 = vld [vmem:[#allocation8 + $0x34c] ss:$16 sps:$4 sm:$0xff]  }
 0x1f3   : > { %3256 = vmatpush1.bf16.msra.mxu0 %v5590_v5  ;;  %v5662_v5 = vld [vmem:[#allocation8 + $0x148] ss:$16 sps:$4 sm:$0xff]  }
 0x1f4   : > { %3257 = vmatprep.subr.bf16.mxu0 %v5598_v23  ;;  %v5670_v23 = vld [vmem:[#allocation8 + $0x12c] ss:$16 sps:$4 sm:$0xff]  }
 0x1f5   : > { %3317 = vmatpush1.bf16.msra.mxu1 %v5593_v25  ;;  %v5665_v25 = vld [vmem:[#allocation8 + $0x348] ss:$16 sps:$4 sm:$0xff]  }
 0x1f6   : > { %3174 = vmatmul.mubr.bf16.gmra.mxu0 %v6313_v39  ;;  %3318 = vmatprep.subr.bf16.mxu1 %v5601_v6  ;;  %v5673_v6 = vld [vmem:[#allocation8 + $0x32c] ss:$16 sps:$4 sm:$0xff]  }
 0x1f7   : > { %3183 = vmatprep.mubr.bf16.mxu0 %v6417_v53  ;;  %3258 = vmatpush1.bf16.msra.mxu0 %v5596_v0  ;;  %v5676_v0 = vld [vmem:[#allocation8 + $0x10c] ss:$16 sps:$4 sm:$0xff]  }
 0x1f8   : > { %3235 = vmatmul.mubr.bf16.gmra.mxu1 %v6318_v63  ;;  %3259 = vmatprep.subr.bf16.mxu0 %v5604_v35  ;;  %v5679_v35 = vld [vmem:[#allocation8 + $0x30c] ss:$16 sps:$4 sm:$0xff]  }
 0x1f9   : > { %3244 = vmatprep.mubr.bf16.mxu1 %v6421_v45  ;;  %3319 = vmatpush1.bf16.msra.mxu1 %v5599_v43  ;;  %v5674_v43 = vld [vmem:[#allocation8 + $0x108] ss:$16 sps:$4 sm:$0xff]  }
 0x1fa   : > { %3320 = vmatprep.subr.bf16.mxu1 %v5607_v54  ;;  %v5682_v54 = vld [vmem:[#allocation8 + $0x8e4] ss:$16 sps:$4 sm:$0xff]  }
 0x1fb   : > { %3260 = vmatpush1.bf16.msra.mxu0 %v5602_v56  ;;  %v5677_v56 = vld [vmem:[#allocation8 + $0x308] ss:$16 sps:$4 sm:$0xff]  }
 0x1fc   : > { %3261 = vmatprep.subr.bf16.mxu0 %v5610_v21  ;;  %v5685_v21 = vld [vmem:[#allocation8 + $0xae4] ss:$16 sps:$4 sm:$0xff]  }
 0x1fd   : > { %3321 = vmatpush1.bf16.msra.mxu1 %v5605_v12  ;;  %v5680_v12 = vld [vmem:[#allocation8 + $0x8e0] ss:$16 sps:$4 sm:$0xff]  }
 0x1fe   : > { %3184 = vmatmul.mubr.bf16.gmra.mxu0 %v6425_v26  ;;  %3322 = vmatprep.subr.bf16.mxu1 %v5613_v58  ;;  %v5683_v58 = vld [vmem:[#allocation8 + $0xae0] ss:$16 sps:$4 sm:$0xff]  }
 0x1ff   : > { %3262 = vmatpush1.bf16.msra.mxu0 %v5608_v61  ;;  %3285 = vmatprep.mubr.bf16.mxu0 %v6396_v50  ;;  %v5626_v50 = vld [vmem:[#allocation8 + $0x8] ss:$16 sps:$4 sm:$0xff]   ;;  %v5691_v61 = vld [vmem:[#allocation8 + $0xac4] ss:$16 sps:$4 sm:$0xff]  }
 0x200   : > { %3245 = vmatmul.mubr.bf16.gmra.mxu1 %v6428_v4  ;;  %3263 = vmatprep.subr.bf16.mxu0 %v5616_v2  ;;  %v5686_v2 = vld [vmem:[#allocation8 + $0x8c0] ss:$16 sps:$4 sm:$0xff]  }
 0x201   : > { %3323 = vmatpush1.bf16.msra.mxu1 %v5611_v27  ;;  %3346 = vmatprep.mubr.bf16.mxu1 %v6402_v29  ;;  %v5632_v29 = vld [vmem:[#allocation8 + $0x1e8] ss:$16 sps:$4 sm:$0xff]  }
 0x202   : > { %3324 = vmatprep.subr.bf16.mxu1 %v5619_v28 }
 0x203   : > { %3264 = vmatpush1.bf16.msra.mxu0 %v5614_v17  ;;  %v5694_v17 = vld [vmem:[#allocation8 + $0x8a4] ss:$16 sps:$4 sm:$0xff]  }
 0x204   : > { %3265 = vmatprep.subr.bf16.mxu0 %v5622_v18 }
 0x205   : > { %3325 = vmatpush1.bf16.msra.mxu1 %v5617_v40  ;;  %v5689_v40 = vld [vmem:[#allocation8 + $0xac0] ss:$16 sps:$4 sm:$0xff]  }
 0x206   : > { %3326 = vmatprep.subr.bf16.mxu1 %v5625_v41 }
 0x207   : > { %3266 = vmatpush1.bf16.msra.mxu0 %v5620_v42  ;;  %v5697_v42 = vld [vmem:[#allocation8 + $0xaa4] ss:$16 sps:$4 sm:$0xff]  }
 0x208   : > { %3267 = vmatprep.subr.bf16.mxu0 %v5628_v10 }
 0x209   : > { %3327 = vmatpush1.bf16.msra.mxu1 %v5623_v11  ;;  %v5692_v11 = vld [vmem:[#allocation8 + $0x8a0] ss:$16 sps:$4 sm:$0xff]  }
 0x20a   : > { %3328 = vmatprep.subr.bf16.mxu1 %v5631_v51 }
 0x20b   : > { %3268 = vmatpush1.bf16.msra.mxu0 %v5626_v50  ;;  %v5700_v50 = vld [vmem:[#allocation8 + $0x884] ss:$16 sps:$4 sm:$0xff]  }
 0x20c   : > { %3269 = vmatprep.subr.bf16.mxu0 %v5634_v14 }
 0x20d   : > { %3329 = vmatpush1.bf16.msra.mxu1 %v5629_v34  ;;  %v5695_v34 = vld [vmem:[#allocation8 + $0xaa0] ss:$16 sps:$4 sm:$0xff]  }
 0x20e   : > { %3330 = vmatprep.subr.bf16.mxu1 %v5637_v13  ;;  %v3376_v13 = vld [vmem:[#allocation3 + $0x8] sm:$0xfc] }
 0x20f   : > { %3270 = vmatpush2.bf16.msra.mxu0 %v5632_v29 }
 0x210   : > { %3271 = vmatprep.subr.bf16.mxu0 %v5640_v22 }
 0x211   : > { %3331 = vmatpush2.bf16.msra.mxu1 %v5635_v1  ;;  %v5703_v1 = vld [vmem:[#allocation8 + $0xa84] ss:$16 sps:$4 sm:$0xff]  }
 0x212   : > { %3332 = vmatprep.subr.bf16.mxu1 %v5643_v15 }
 0x213   : > { %3272 = vmatpush2.bf16.msra.mxu0 %v5638_v16  ;;  %v5698_v16 = vld [vmem:[#allocation8 + $0x880] ss:$16 sps:$4 sm:$0xff]  }
 0x214   : > { %3273 = vmatprep.subr.bf16.mxu0 %v5646_v19  ;;  %v3378_v19 = vld [vmem:[#allocation3 + $0x18] sm:$0xfc] }
 0x215   : > { %3333 = vmatpush2.bf16.msra.mxu1 %v5641_v32 }
 0x216   : > { %3334 = vmatprep.subr.bf16.mxu1 %v5649_v30 }
 0x217   : > { %3274 = vmatpush2.bf16.msra.mxu0 %v5644_v31  ;;  %v5706_v31 = vld [vmem:[#allocation8 + $0x864] ss:$16 sps:$4 sm:$0xff]  }
 0x218   : > { %3275 = vmatprep.subr.bf16.mxu0 %v5652_v46  ;;  %v5872_v46 = vld [vmem:[#allocation3 + $0x28] sm:$0xff] }
 0x219   : > { %3335 = vmatpush2.bf16.msra.mxu1 %v5647_v20  ;;  %v3384_v20 = vpack.c.bf16 %v5872_v46, %v3376_v13  ;;  %v5725_v13 = vld [vmem:[#allocation8 + $0xa00] ss:$16 sps:$4 sm:$0xff]   ;;  %v5745_v46 = vld [vmem:[#allocation8 + $0xba4] ss:$16 sps:$4 sm:$0xff]  }
 0x21a   : > { %3336 = vmatprep.subr.bf16.mxu1 %v5655_v7 }
 0x21b   : > { %3276 = vmatpush2.bf16.msra.mxu0 %v5650_v36  ;;  %v5701_v36 = vld [vmem:[#allocation8 + $0xa80] ss:$16 sps:$4 sm:$0xff]  }
 0x21c   : > { %3277 = vmatprep.subr.bf16.mxu0 %v5658_v38 }
 0x21d   : > { %3337 = vmatpush2.bf16.msra.mxu1 %v5653_v33  ;;  %v5709_v33 = vld [vmem:[#allocation8 + $0xa64] ss:$16 sps:$4 sm:$0xff]  }
 0x21e   : > { %3338 = vmatprep.subr.bf16.mxu1 %v5661_v59  ;;  %v3537_v59 = vrot.slane %v6309_v9, 1 }
 0x21f   : > { %3278 = vmatpush2.bf16.msra.mxu0 %v5656_v47  ;;  %v5873_v47 = vld [vmem:[#allocation3 + $0x38] sm:$0xff] }
 0x220   : > { %3279 = vmatprep.subr.bf16.mxu0 %v5664_v37  ;;  %v3386_v37 = vpack.c.bf16 %v5873_v47, %v3378_v19  ;;  %v5739_v19 = vld [vmem:[#allocation8 + $0xbc4] ss:$16 sps:$4 sm:$0xff]  }
 0x221   : > { %3339 = vmatpush2.bf16.msra.mxu1 %v5659_v3  ;;  %v5754_v47 = vld [vmem:[#allocation8 + $0x964] ss:$16 sps:$4 sm:$0xff]  }
 0x222   : > { %3340 = vmatprep.subr.bf16.mxu1 %v5667_v24  ;;  %v5704_v24 = vld [vmem:[#allocation8 + $0x860] ss:$16 sps:$4 sm:$0xff]  }
 0x223   : > { %3280 = vmatpush2.bf16.msra.mxu0 %v5662_v5 }
 0x224   : > { %3281 = vmatprep.subr.bf16.mxu0 %v5670_v23 }
 0x225   : > { %3341 = vmatpush2.bf16.msra.mxu1 %v5665_v25  ;;  %v3536_v25 = vrot.slane %v3384_v20, 1  ;;  %v5740_v20 = vld [vmem:[#allocation8 + $0x9a0] ss:$16 sps:$4 sm:$0xff]  }
 0x226   : > { %3342 = vmatprep.subr.bf16.mxu1 %v5673_v6  ;;  %v5712_v6 = vld [vmem:[#allocation8 + $0x844] ss:$16 sps:$4 sm:$0xff]  }
 0x227   : > { %3282 = vmatpush2.bf16.msra.mxu0 %v5668_v52 }
 0x228   : > { %3283 = vmatprep.subr.bf16.mxu0 %v5676_v0  ;;  %v5707_v0 = vld [vmem:[#allocation8 + $0xa60] ss:$16 sps:$4 sm:$0xff]  }
 0x229   : > { %3343 = vmatpush2.bf16.msra.mxu1 %v5671_v44 }
 0x22a   : > { %3344 = vmatprep.subr.bf16.mxu1 %v5679_v35 }
 0x22b   : > { %3284 = vmatpush2.bf16.msra.mxu0 %v5674_v43  ;;  %v6461_v43 = vsel %vm3532_vm5, %v3536_v25, %v3537_v59  ;;  %v5755_v25 = vld [vmem:[#allocation8 + $0xb60] ss:$16 sps:$4 sm:$0xff]  }
 0x22c   : > { %4205 = vmatprep.subr.bf16.mxu0 %v5682_v54  ;;  %v3542_v54 = vrot.slane %v3386_v37, 1  ;;  %v5749_v37 = vld [vmem:[#allocation8 + $0xb80] ss:$16 sps:$4 sm:$0xff]  }
 0x22d   : > { %3345 = vmatpush2.bf16.msra.mxu1 %v5677_v56  ;;  %v2281_v60 = vpop.f32.mrf.mxu0  ;;  %v5715_v56 = vld [vmem:[#allocation8 + $0xa44] ss:$16 sps:$4 sm:$0xff]  }
 0x22e   : > { %3286 = vmatmul.mubr.bf16.vlgmr.msra.gmra.mxu0 %v6408_v48  ;;  %4266 = vmatprep.subr.bf16.mxu1 %v5685_v21 }
 0x22f   : > { %3295 = vmatprep.mubr.bf16.mxu0 %v6309_v9  ;;  %4206 = vmatpush1.bf16.msra.mxu0 %v5680_v12  ;;  %v2342_v27 = vpop.f32.mrf.mxu1  ;;  %v2283_v28 = vpop.f32.mrf.mxu0  ;;  %v5710_v12 = vld [vmem:[#allocation8 + $0x840] ss:$16 sps:$4 sm:$0xff]  }
 0x230   : > { %3347 = vmatmul.mubr.bf16.vlgmr.msra.gmra.mxu1 %v6412_v49  ;;  %4207 = vmatprep.subr.bf16.mxu0 %v5688_v57  ;;  %v6436_v18 = vadd.f32 %v2342_v27, %v2281_v60  ;;  %v5718_v60 = vld [vmem:[#allocation8 + $0x824] ss:$16 sps:$4 sm:$0xff]  }
 0x231   : > { %3356 = vmatprep.mubr.bf16.mxu1 %v6311_v55  ;;  %4267 = vmatpush1.bf16.msra.mxu1 %v5683_v58  ;;  %v2344_v48 = vpop.f32.mrf.mxu1  ;;  %v2285_v41 = vpop.f32.mrf.mxu0 }
 0x232   : > { %4268 = vmatprep.subr.bf16.mxu1 %v5691_v61  ;;  %v6439_v10 = vadd.f32 %v2344_v48, %v2283_v28 }
 0x233   : > { %4208 = vmatpush1.bf16.msra.mxu0 %v5686_v2  ;;  %v2346_v51 = vpop.f32.mrf.mxu1  ;;  %v2287_v49 = vpop.f32.mrf.mxu0  ;;  %v5713_v2 = vld [vmem:[#allocation8 + $0xa40] ss:$16 sps:$4 sm:$0xff]  }
 0x234   : > { %4209 = vmatprep.subr.bf16.mxu0 %v5694_v17  ;;  %v6441_v14 = vadd.f32 %v2346_v51, %v2285_v41  ;;  %v5721_v17 = vld [vmem:[#allocation8 + $0xa24] ss:$16 sps:$4 sm:$0xff]  }
 0x235   : > { %4269 = vmatpush1.bf16.msra.mxu1 %v5689_v40  ;;  %v2348_v29 = vpop.f32.mrf.mxu1  ;;  %v2291_v22 = vpop.f32.mrf.mxu0  ;;  %v5716_v40 = vld [vmem:[#allocation8 + $0x820] ss:$16 sps:$4 sm:$0xff]  }
 0x236   : > { %3296 = vmatmul.mubr.bf16.gmra.mxu0 %v6313_v39  ;;  %4270 = vmatprep.subr.bf16.mxu1 %v5697_v42  ;;  %v6444_v15 = vadd.f32 %v2348_v29, %v2287_v49  ;;  %v5724_v42 = vld [vmem:[#allocation8 + $0x804] ss:$16 sps:$4 sm:$0xff]  }
 0x237   : > { %3305 = vmatprep.mubr.bf16.mxu0 %v6417_v53  ;;  %4210 = vmatpush1.bf16.msra.mxu0 %v5692_v11  ;;  %v2352_v32 = vpop.f32.mrf.mxu1  ;;  %v2293_v30 = vpop.f32.mrf.mxu0  ;;  %v5719_v11 = vld [vmem:[#allocation8 + $0xa20] ss:$16 sps:$4 sm:$0xff]   ;;  %v5727_v49 = vld [vmem:[#allocation8 + $0xa04] ss:$16 sps:$4 sm:$0xff]  }
 0x238   : > { %3357 = vmatmul.mubr.bf16.gmra.mxu1 %v6318_v63  ;;  %4211 = vmatprep.subr.bf16.mxu0 %v5700_v50  ;;  %v6448_v7 = vadd.f32 %v2352_v32, %v2291_v22  ;;  %v5722_v50 = vld [vmem:[#allocation8 + $0x800] ss:$16 sps:$4 sm:$0xff]   ;;  %v5733_v29 = vld [vmem:[#allocation8 + $0xbe4] ss:$16 sps:$4 sm:$0xff]  }
 0x239   : > { %3366 = vmatprep.mubr.bf16.mxu1 %v6421_v45  ;;  %4271 = vmatpush1.bf16.msra.mxu1 %v5695_v34  ;;  %v2354_v38 = vpop.f32.mrf.mxu1  ;;  %v2295_v53 = vpop.f32.mrf.mxu0  ;;  %v3543_v45 = vrot.slane %v6311_v55, 1  ;;  %v5730_v34 = vld [vmem:[#allocation8 + $0x9e4] ss:$16 sps:$4 sm:$0xff]   ;;  %v5728_v22 = vld [vmem:[#allocation8 + $0x9e0] ss:$16 sps:$4 sm:$0xff]  }
 0x23a   : > { %4272 = vmatprep.subr.bf16.mxu1 %v5703_v1  ;;  %v6452_v3 = vadd.f32 %v2354_v38, %v2293_v30  ;;  %v5736_v1 = vld [vmem:[#allocation8 + $0x9c4] ss:$16 sps:$4 sm:$0xff]   ;;  %v5734_v32 = vld [vmem:[#allocation8 + $0x9c0] ss:$16 sps:$4 sm:$0xff]  }
 0x23b   : > { %4212 = vmatpush1.bf16.msra.mxu0 %v5698_v16  ;;  %v2356_v5 = vpop.f32.mrf.mxu1  ;;  %v2297_v23 = vpop.f32.mrf.mxu0  ;;  %v5731_v16 = vld [vmem:[#allocation8 + $0xbe0] ss:$16 sps:$4 sm:$0xff]   ;;  %v5742_v30 = vld [vmem:[#allocation8 + $0x9a4] ss:$16 sps:$4 sm:$0xff]  }
 0x23c   : > { %4213 = vmatprep.subr.bf16.mxu0 %v5706_v31  ;;  %v6455_v52 = vadd.f32 %v2356_v5, %v2295_v53  ;;  %v5737_v31 = vld [vmem:[#allocation8 + $0xbc0] ss:$16 sps:$4 sm:$0xff]   ;;  %v5751_v53 = vld [vmem:[#allocation8 + $0xb84] ss:$16 sps:$4 sm:$0xff]  }
 0x23d   : > { %4273 = vmatpush1.bf16.msra.mxu1 %v5701_v36  ;;  %v2358_v44 = vpop.f32.mrf.mxu1  ;;  %v2301_v35 = vpop.f32.mrf.mxu0  ;;  %v5748_v36 = vld [vmem:[#allocation8 + $0x984] ss:$16 sps:$4 sm:$0xff]   ;;  %v5743_v38 = vld [vmem:[#allocation8 + $0xba0] ss:$16 sps:$4 sm:$0xff]  }
 0x23e   : > { %3306 = vmatmul.mubr.bf16.gmra.mxu0 %v6425_v26  ;;  %4274 = vmatprep.subr.bf16.mxu1 %v5709_v33  ;;  %v6463_v21 = vadd.f32 %v2358_v44, %v2297_v23  ;;  %v6470_v26 = vsel %vm3532_vm5, %v3542_v54, %v3543_v45  ;;  %v5746_v33 = vld [vmem:[#allocation8 + $0x980] ss:$16 sps:$4 sm:$0xff]   ;;  %v5760_v23 = vld [vmem:[#allocation8 + $0x944] ss:$16 sps:$4 sm:$0xff]  }
 0x23f   : > { %4214 = vmatpush1.bf16.msra.mxu0 %v5704_v24  ;;  %4237 = vmatprep.mubr.bf16.mxu0 %v6461_v43  ;;  %v2362_v57 = vpop.f32.mrf.mxu1  ;;  %v2303_v58 = vpop.f32.mrf.mxu0  ;;  %v5757_v24 = vld [vmem:[#allocation8 + $0xb64] ss:$16 sps:$4 sm:$0xff]   ;;  %v5752_v5 = vld [vmem:[#allocation8 + $0x960] ss:$16 sps:$4 sm:$0xff]  }
 0x240   : > { %3367 = vmatmul.mubr.bf16.gmra.mxu1 %v6428_v4  ;;  %4215 = vmatprep.subr.bf16.mxu0 %v5712_v6  ;;  %v6472_v61 = vadd.f32 %v2362_v57, %v2301_v35  ;;  %v5763_v6 = vld [vmem:[#allocation8 + $0xb44] ss:$16 sps:$4 sm:$0xff]   ;;  %v5761_v35 = vld [vmem:[#allocation8 + $0xb40] ss:$16 sps:$4 sm:$0xff]  }
 0x241   : > { %4275 = vmatpush1.bf16.msra.mxu1 %v5707_v0  ;;  %4298 = vmatprep.mubr.bf16.mxu1 %v6470_v26  ;;  %v2364_v27 = vpop.f32.mrf.mxu1  ;;  %v2305_v28 = vpop.f32.mrf.mxu0  ;;  %v5758_v0 = vld [vmem:[#allocation8 + $0x940] ss:$16 sps:$4 sm:$0xff]   ;;  %v5766_v44 = vld [vmem:[#allocation8 + $0x924] ss:$16 sps:$4 sm:$0xff]  }
 0x242   : > { %4276 = vmatprep.subr.bf16.mxu1 %v5715_v56  ;;  %v6475_v4 = vadd.f32 %v2364_v27, %v2303_v58  ;;  %v5769_v54 = vld [vmem:[#allocation8 + $0xb24] ss:$16 sps:$4 sm:$0xff]   ;;  %v5764_v56 = vld [vmem:[#allocation8 + $0x920] ss:$16 sps:$4 sm:$0xff]  }
 0x243   : > { %4216 = vmatpush1.bf16.msra.mxu0 %v5710_v12  ;;  %v2366_v48 = vpop.f32.mrf.mxu1  ;;  %v2306_v41 = vpop.f32.mrf.mxu0  ;;  %v3380_v12 = vld [vmem:[#allocation3 + $0x88] sm:$0x7]  ;;  %v3375_v58 = vld [vmem:[#allocation3] sm:$0xfc]  ;;  %v3377_v28 = vld [vmem:[#allocation3 + $0x10] sm:$0xfc] }
 0x244   : > { %4217 = vmatprep.subr.bf16.mxu0 %v5718_v60  ;;  %v5772_v57 = vld [vmem:[#allocation8 + $0x904] ss:$16 sps:$4 sm:$0xff]   ;;  %v5767_v60 = vld [vmem:[#allocation8 + $0xb20] ss:$16 sps:$4 sm:$0xff]  }
 0x245   : > { %4277 = vmatpush1.bf16.msra.mxu1 %v5713_v2  ;;  %v2367_v51 = vpop.f32.mrf.mxu1  ;;  %v3382_v2 = vld [vmem:[#allocation3 + $0x98] sm:$0x7]  ;;  %v5874_v48 = vld [vmem:[#allocation3 + $0x20] sm:$0xff] }
 0x246   : > { %4278 = vmatprep.subr.bf16.mxu1 %v5721_v17  ;;  %v5775_v27 = vld [vmem:[#allocation8 + $0xb04] ss:$16 sps:$4 sm:$0xff]   ;;  %v3388_v17 = vpack.c.bf16 %v3380_v12, %v3380_v12  ;;  %v3383_v41 = vpack.c.bf16 %v5874_v48, %v3375_v58  ;;  %v5773_v51 = vld [vmem:[#allocation8 + $0xb00] ss:$16 sps:$4 sm:$0xff]  }
 0x247   : > { %4218 = vmatpush1.bf16.msra.mxu0 %v5716_v40  ;;  %v5770_v40 = vld [vmem:[#allocation8 + $0x900] ss:$16 sps:$4 sm:$0xff]  }
 0x248   : > { %4219 = vmatprep.subr.bf16.mxu0 %v5724_v42  ;;  %v5778_v42 = vld [vmem:[#allocation8 + $0x8ec] ss:$16 sps:$4 sm:$0xff]  }
 0x249   : > { %4279 = vmatpush1.bf16.msra.mxu1 %v5719_v11  ;;  %v3390_v11 = vpack.c.bf16 %v3382_v2, %v3382_v2  ;;  %v5791_v2 = vld [vmem:[#allocation8 + $0xaa8] ss:$16 sps:$4 sm:$0xff]  }
 0x24a   : > { %4280 = vmatprep.subr.bf16.mxu1 %v5727_v49  ;;  %v3534_v49 = vrot.slane %v6313_v39, 1 }
 0x24b   : > { %4220 = vmatpush1.bf16.msra.mxu0 %v5722_v50  ;;  %v5875_v50 = vld [vmem:[#allocation3 + $0x30] sm:$0xff] }
 0x24c   : > { %4221 = vmatprep.subr.bf16.mxu0 %v5730_v34  ;;  %v3385_v34 = vpack.c.bf16 %v5875_v50, %v3377_v28  ;;  %v5797_v50 = vld [vmem:[#allocation8 + $0xa88] ss:$16 sps:$4 sm:$0xff]  }
 0x24d   : > { %4281 = vmatpush1.bf16.msra.mxu1 %v5725_v13  ;;  %v5781_v13 = vld [vmem:[#allocation8 + $0xaec] ss:$16 sps:$4 sm:$0xff]  }
 0x24e   : > { %4282 = vmatprep.subr.bf16.mxu1 %v5733_v29  ;;  %v6478_v29 = vrot.slane %v3388_v17, 1  ;;  %v5799_v17 = vld [vmem:[#allocation8 + $0xa8c] ss:$16 sps:$4 sm:$0xff]  }
 0x24f   : > { %4222 = vmatpush2.bf16.msra.mxu0 %v5728_v22  ;;  %v3379_v22 = vld [vmem:[#allocation3 + $0x80] sm:$0x7] }
 0x250   : > { %4223 = vmatprep.subr.bf16.mxu0 %v5736_v1  ;;  %v3533_v1 = vrot.slane %v3383_v41, 1  ;;  %v5794_v41 = vld [vmem:[#allocation8 + $0x888] ss:$16 sps:$4 sm:$0xff]  }
 0x251   : > { %4283 = vmatpush2.bf16.msra.mxu1 %v5731_v16  ;;  %v3540_v16 = vrot.slane %v6318_v63, 1  ;;  %v6491_v63 = vsel %vm3532_vm5, %v3537_v59, %v6478_v29 }
 0x252   : > { %4284 = vmatprep.subr.bf16.mxu1 %v5739_v19  ;;  %v5776_v19 = vld [vmem:[#allocation8 + $0x8e8] ss:$16 sps:$4 sm:$0xff]   ;;  %v6484_v39 = vsel %vm3532_vm5, %v3533_v1, %v3534_v49 }
 0x253   : > { %4224 = vmatpush2.bf16.msra.mxu0 %v5734_v32  ;;  %v6481_v32 = vrot.slane %v3390_v11, 1 }
 0x254   : > { %4225 = vmatprep.subr.bf16.mxu0 %v5742_v30  ;;  %v5784_v30 = vld [vmem:[#allocation8 + $0x8cc] ss:$16 sps:$4 sm:$0xff]  }
 0x255   : > { %4285 = vmatpush2.bf16.msra.mxu1 %v5737_v31  ;;  %v3381_v31 = vld [vmem:[#allocation3 + $0x90] sm:$0x7]  ;;  %v6502_v9 = vsel %vm3532_vm5, %v3543_v45, %v6481_v32  ;;  %v5788_v45 = vld [vmem:[#allocation8 + $0x8a8] ss:$16 sps:$4 sm:$0xff]  }
 0x256   : > { %4286 = vmatprep.subr.bf16.mxu1 %v5745_v46  ;;  %v3539_v46 = vrot.slane %v3385_v34, 1 }
 0x257   : > { %4226 = vmatpush2.bf16.msra.mxu0 %v5740_v20  ;;  %v5779_v20 = vld [vmem:[#allocation8 + $0xae8] ss:$16 sps:$4 sm:$0xff]  }
 0x258   : > { %4227 = vmatprep.subr.bf16.mxu0 %v5748_v36  ;;  %v3387_v36 = vpack.c.bf16 %v3379_v22, %v3379_v22  ;;  %v5805_v22 = vld [vmem:[#allocation8 + $0xa6c] ss:$16 sps:$4 sm:$0xff]  }
 0x259   : > { %4287 = vmatpush2.bf16.msra.mxu1 %v5743_v38 }
 0x25a   : > { %4288 = vmatprep.subr.bf16.mxu1 %v5751_v53  ;;  %v5787_v53 = vld [vmem:[#allocation8 + $0xacc] ss:$16 sps:$4 sm:$0xff]  }
 0x25b   : > { %4228 = vmatpush2.bf16.msra.mxu0 %v5746_v33  ;;  %v6494_v33 = vsel %vm3532_vm5, %v3539_v46, %v3540_v16 }
 0x25c   : > { %4229 = vmatprep.subr.bf16.mxu0 %v5754_v47  ;;  %v5782_v47 = vld [vmem:[#allocation8 + $0x8c8] ss:$16 sps:$4 sm:$0xff]  }
 0x25d   : > { %4289 = vmatpush2.bf16.msra.mxu1 %v5749_v37  ;;  %v3389_v37 = vpack.c.bf16 %v3381_v31, %v3381_v31  ;;  %v5808_v31 = vld [vmem:[#allocation8 + $0x84c] ss:$16 sps:$4 sm:$0xff]  }
 0x25e   : > { %4290 = vmatprep.subr.bf16.mxu1 %v5757_v24 }
 0x25f   : > { %4230 = vmatpush2.bf16.msra.mxu0 %v5752_v5  ;;  %v5790_v5 = vld [vmem:[#allocation8 + $0x8ac] ss:$16 sps:$4 sm:$0xff]   ;;  %v6511_v55 = vrot.slane %v3389_v37, 1  ;;  %v5806_v37 = vld [vmem:[#allocation8 + $0x848] ss:$16 sps:$4 sm:$0xff]  }
 0x260   : > { %4231 = vmatprep.subr.bf16.mxu0 %v5760_v23 }
 0x261   : > { %4291 = vmatpush2.bf16.msra.mxu1 %v5755_v25  ;;  %v5785_v25 = vld [vmem:[#allocation8 + $0xac8] ss:$16 sps:$4 sm:$0xff]   ;;  %v6524_v48 = vsel %vm3532_vm5, %v3540_v16, %v6511_v55 }
 0x262   : > { %4292 = vmatprep.subr.bf16.mxu1 %v5763_v6  ;;  %v6507_v6 = vrot.slane %v3387_v36, 1  ;;  %v5800_v16 = vld [vmem:[#allocation8 + $0x868] ss:$16 sps:$4 sm:$0xff]  }
 0x263   : > { %4232 = vmatpush2.bf16.msra.mxu0 %v5758_v0 }
 0x264   : > { %4233 = vmatprep.subr.bf16.mxu0 %v5766_v44 }
 0x265   : > { %4293 = vmatpush2.bf16.msra.mxu1 %v5761_v35  ;;  %v5793_v35 = vld [vmem:[#allocation8 + $0xaac] ss:$16 sps:$4 sm:$0xff]  }
 0x266   : > { %4294 = vmatprep.subr.bf16.mxu1 %v5769_v54 }
 0x267   : > { %4234 = vmatpush2.bf16.msra.mxu0 %v5764_v56 }
 0x268   : > { %4235 = vmatprep.subr.bf16.mxu0 %v5772_v57  ;;  %v5796_v57 = vld [vmem:[#allocation8 + $0x88c] ss:$16 sps:$4 sm:$0xff]  }
 0x269   : > { %4295 = vmatpush2.bf16.msra.mxu1 %v5767_v60  ;;  %v6517_v60 = vsel %vm3532_vm5, %v3534_v49, %v6507_v6 }
 0x26a   : > { %4296 = vmatprep.subr.bf16.mxu1 %v5775_v27 }
 0x26b   : > { %4236 = vmatpush2.bf16.msra.mxu0 %v5770_v40 }
 0x26c   : > { %4327 = vmatprep.subr.bf16.mxu0 %v5778_v42 }
 0x26d   : > { %4297 = vmatpush2.bf16.msra.mxu1 %v5773_v51  ;;  %v2403_v38 = vpop.f32.mrf.mxu0  ;;  %v5802_v51 = vld [vmem:[#allocation8 + $0x86c] ss:$16 sps:$4 sm:$0xff]  }
 0x26e   : > { %4238 = vmatmul.mubr.bf16.vlgmr.msra.gmra.mxu0 %v6484_v39  ;;  %4388 = vmatprep.subr.bf16.mxu1 %v5781_v13 }
 0x26f   : > { %4247 = vmatprep.mubr.bf16.mxu0 %v6491_v63  ;;  %4328 = vmatpush1.bf16.msra.mxu0 %v5776_v19  ;;  %v2405_v59 = vpop.f32.mrf.mxu0 }
 0x270   : > { %v2464_v24 = vpop.f32.mrf.mxu1  ;;  %4299 = vmatmul.mubr.bf16.vlgmr.msra.gmra.mxu1 %v6494_v33  ;;  %4329 = vmatprep.subr.bf16.mxu0 %v5784_v30 }
 0x271   : > { %v6504_v23 = vadd.f32 %v2464_v24, %v2403_v38  ;;  %4308 = vmatprep.mubr.bf16.mxu1 %v6502_v9  ;;  %4389 = vmatpush1.bf16.msra.mxu1 %v5779_v20  ;;  %v2407_v44 = vpop.f32.mrf.mxu0  ;;  %v5803_v20 = vld [vmem:[#allocation8 + $0xa68] ss:$16 sps:$4 sm:$0xff]  }
 0x272   : > { %v2466_v0 = vpop.f32.mrf.mxu1  ;;  %4390 = vmatprep.subr.bf16.mxu1 %v5787_v53  ;;  %v5811_v53 = vld [vmem:[#allocation8 + $0xa4c] ss:$16 sps:$4 sm:$0xff]  }
 0x273   : > { %v6509_v54 = vadd.f32 %v2466_v0, %v2405_v59  ;;  %4330 = vmatpush1.bf16.msra.mxu0 %v5782_v47  ;;  %v2409_v12 = vpop.f32.mrf.mxu0  ;;  %v5809_v0 = vld [vmem:[#allocation8 + $0xa48] ss:$16 sps:$4 sm:$0xff]  }
 0x274   : > { %v2468_v56 = vpop.f32.mrf.mxu1  ;;  %4331 = vmatprep.subr.bf16.mxu0 %v5790_v5  ;;  %v5814_v5 = vld [vmem:[#allocation8 + $0x82c] ss:$16 sps:$4 sm:$0xff]  }
 0x275   : > { %v6513_v58 = vadd.f32 %v2468_v56, %v2407_v44  ;;  %4391 = vmatpush1.bf16.msra.mxu1 %v5785_v25  ;;  %v2413_v28 = vpop.f32.mrf.mxu0 }
 0x276   : > { %v2470_v27 = vpop.f32.mrf.mxu1  ;;  %4248 = vmatmul.mubr.bf16.gmra.mxu0 %v6517_v60  ;;  %4392 = vmatprep.subr.bf16.mxu1 %v5793_v35 }
 0x277   : > { %v6520_v40 = vadd.f32 %v2470_v27, %v2409_v12  ;;  %4257 = vmatprep.mubr.bf16.mxu0 %v6478_v29  ;;  %4332 = vmatpush1.bf16.msra.mxu0 %v5788_v45  ;;  %v2415_v11 = vpop.f32.mrf.mxu0  ;;  %v5817_v45 = vld [vmem:[#allocation8 + $0xa2c] ss:$16 sps:$4 sm:$0xff]   ;;  %v5815_v27 = vld [vmem:[#allocation8 + $0xa28] ss:$16 sps:$4 sm:$0xff]  }
 0x278   : > { %v2474_v42 = vpop.f32.mrf.mxu1  ;;  %4309 = vmatmul.mubr.bf16.gmra.mxu1 %v6524_v48  ;;  %4333 = vmatprep.subr.bf16.mxu0 %v5796_v57 }
 0x279   : > { %v6528_v49 = vadd.f32 %v2474_v42, %v2413_v28  ;;  %4318 = vmatprep.mubr.bf16.mxu1 %v6481_v32  ;;  %4393 = vmatpush1.bf16.msra.mxu1 %v5791_v2  ;;  %v2417_v13 = vpop.f32.mrf.mxu0  ;;  %v5820_v2 = vld [vmem:[#allocation8 + $0x80c] ss:$16 sps:$4 sm:$0xff]   ;;  %v5821_v42 = vld [vmem:[#allocation8 + $0xa08] ss:$16 sps:$4 sm:$0xff]  }
 0x27a   : > { %v2476_v34 = vpop.f32.mrf.mxu1  ;;  %4394 = vmatprep.subr.bf16.mxu1 %v5799_v17  ;;  %v5823_v17 = vld [vmem:[#allocation8 + $0xa0c] ss:$16 sps:$4 sm:$0xff]  }
 0x27b   : > { %v6531_v1 = vadd.f32 %v2476_v34, %v2415_v11  ;;  %4334 = vmatpush1.bf16.msra.mxu0 %v5794_v41  ;;  %v2419_v30 = vpop.f32.mrf.mxu0  ;;  %v5826_v41 = vld [vmem:[#allocation8 + $0x9ec] ss:$16 sps:$4 sm:$0xff]   ;;  %v5827_v34 = vld [vmem:[#allocation8 + $0xbe8] ss:$16 sps:$4 sm:$0xff]  }
 0x27c   : > { %v2478_v19 = vpop.f32.mrf.mxu1  ;;  %4335 = vmatprep.subr.bf16.mxu0 %v5802_v51  ;;  %v5829_v11 = vld [vmem:[#allocation8 + $0xbec] ss:$16 sps:$4 sm:$0xff]   ;;  %v5824_v51 = vld [vmem:[#allocation8 + $0x9e8] ss:$16 sps:$4 sm:$0xff]  }
 0x27d   : > { %v6533_v46 = vadd.f32 %v2478_v19, %v2417_v13  ;;  %4395 = vmatpush1.bf16.msra.mxu1 %v5797_v50  ;;  %v2423_v38 = vpop.f32.mrf.mxu0  ;;  %v5832_v50 = vld [vmem:[#allocation8 + $0x9cc] ss:$16 sps:$4 sm:$0xff]   ;;  %v5833_v19 = vld [vmem:[#allocation8 + $0xbc8] ss:$16 sps:$4 sm:$0xff]  }
 0x27e   : > { %v2480_v36 = vpop.f32.mrf.mxu1  ;;  %4258 = vmatmul.mubr.bf16.gmra.mxu0 %v6507_v6  ;;  %4396 = vmatprep.subr.bf16.mxu1 %v5805_v22  ;;  %v5835_v13 = vld [vmem:[#allocation8 + $0xbcc] ss:$16 sps:$4 sm:$0xff]   ;;  %v5830_v22 = vld [vmem:[#allocation8 + $0x9c8] ss:$16 sps:$4 sm:$0xff]  }
 0x27f   : > { %v6536_v47 = vadd.f32 %v2480_v36, %v2419_v30  ;;  %4336 = vmatpush1.bf16.msra.mxu0 %v5800_v16  ;;  %4359 = vmatprep.mubr.bf16.mxu0 %v6461_v43  ;;  %v2425_v59 = vpop.f32.mrf.mxu0  ;;  %v5812_v43 = vld [vmem:[#allocation8 + $0x828] ss:$16 sps:$4 sm:$0xff]   ;;  %v5838_v16 = vld [vmem:[#allocation8 + $0x9ac] ss:$16 sps:$4 sm:$0xff]  }
 0x280   : > { %v2484_v24 = vpop.f32.mrf.mxu1  ;;  %4319 = vmatmul.mubr.bf16.gmra.mxu1 %v6511_v55  ;;  %4337 = vmatprep.subr.bf16.mxu0 %v5808_v31  ;;  %v5841_v30 = vld [vmem:[#allocation8 + $0xbac] ss:$16 sps:$4 sm:$0xff]   ;;  %v5836_v31 = vld [vmem:[#allocation8 + $0x9a8] ss:$16 sps:$4 sm:$0xff]  }
 0x281   : > { %v6540_v25 = vadd.f32 %v2484_v24, %v2423_v38  ;;  %4397 = vmatpush1.bf16.msra.mxu1 %v5803_v20  ;;  %4420 = vmatprep.mubr.bf16.mxu1 %v6470_v26  ;;  %v2427_v35 = vpop.f32.mrf.mxu0  ;;  %v5818_v26 = vld [vmem:[#allocation8 + $0x808] ss:$16 sps:$4 sm:$0xff]   ;;  %v5844_v20 = vld [vmem:[#allocation8 + $0x98c] ss:$16 sps:$4 sm:$0xff]  }
 0x282   : > { %v2486_v44 = vpop.f32.mrf.mxu1  ;;  %4398 = vmatprep.subr.bf16.mxu1 %v5811_v53  ;;  %v5839_v36 = vld [vmem:[#allocation8 + $0xba8] ss:$16 sps:$4 sm:$0xff]   ;;  %v5847_v38 = vld [vmem:[#allocation8 + $0xb8c] ss:$16 sps:$4 sm:$0xff]  }
 0x283   : > { %v6543_v56 = vadd.f32 %v2486_v44, %v2425_v59  ;;  %4338 = vmatpush1.bf16.msra.mxu0 %v5806_v37  ;;  %v2428_v57 = vpop.f32.mrf.mxu0  ;;  %v5842_v53 = vld [vmem:[#allocation8 + $0x988] ss:$16 sps:$4 sm:$0xff]   ;;  %v5850_v37 = vld [vmem:[#allocation8 + $0x96c] ss:$16 sps:$4 sm:$0xff]  }
 0x284   : > { %v2488_v12 = vpop.f32.mrf.mxu1  ;;  %4339 = vmatprep.subr.bf16.mxu0 %v5814_v5  ;;  %v5845_v24 = vld [vmem:[#allocation8 + $0xb88] ss:$16 sps:$4 sm:$0xff]   ;;  %v5853_v59 = vld [vmem:[#allocation8 + $0xb6c] ss:$16 sps:$4 sm:$0xff]  }
 0x285   : > { %4399 = vmatpush1.bf16.msra.mxu1 %v5809_v0  ;;  %v5848_v5 = vld [vmem:[#allocation8 + $0x968] ss:$16 sps:$4 sm:$0xff]   ;;  %v5856_v0 = vld [vmem:[#allocation8 + $0x94c] ss:$16 sps:$4 sm:$0xff]  }
 0x286   : > { %v2489_v28 = vpop.f32.mrf.mxu1  ;;  %4400 = vmatprep.subr.bf16.mxu1 %v5817_v45  ;;  %v5851_v44 = vld [vmem:[#allocation8 + $0xb68] ss:$16 sps:$4 sm:$0xff]   ;;  %v5859_v35 = vld [vmem:[#allocation8 + $0xb4c] ss:$16 sps:$4 sm:$0xff]  }
 0x287   : > { %4340 = vmatpush1.bf16.msra.mxu0 %v5812_v43  ;;  %v5854_v45 = vld [vmem:[#allocation8 + $0x948] ss:$16 sps:$4 sm:$0xff]   ;;  %v5862_v43 = vld [vmem:[#allocation8 + $0x92c] ss:$16 sps:$4 sm:$0xff]  }
 0x288   : > { %4341 = vmatprep.subr.bf16.mxu0 %v5820_v2  ;;  %v5857_v12 = vld [vmem:[#allocation8 + $0xb48] ss:$16 sps:$4 sm:$0xff]   ;;  %v5865_v57 = vld [vmem:[#allocation8 + $0xb2c] ss:$16 sps:$4 sm:$0xff]  }
 0x289   : > { %4401 = vmatpush1.bf16.msra.mxu1 %v5815_v27  ;;  %v5860_v2 = vld [vmem:[#allocation8 + $0x928] ss:$16 sps:$4 sm:$0xff]   ;;  %v5868_v27 = vld [vmem:[#allocation8 + $0x90c] ss:$16 sps:$4 sm:$0xff]  }
 0x28a   : > { %4402 = vmatprep.subr.bf16.mxu1 %v5823_v17  ;;  %v5863_v28 = vld [vmem:[#allocation8 + $0xb28] ss:$16 sps:$4 sm:$0xff]   ;;  %v5871_v17 = vld [vmem:[#allocation8 + $0xb0c] ss:$16 sps:$4 sm:$0xff]  }
 0x28b   : > { %4342 = vmatpush1.bf16.msra.mxu0 %v5818_v26  ;;  %v5866_v26 = vld [vmem:[#allocation8 + $0x908] ss:$16 sps:$4 sm:$0xff]  }
 0x28c   : > { %4343 = vmatprep.subr.bf16.mxu0 %v5826_v41  ;;  %v5869_v41 = vld [vmem:[#allocation8 + $0xb08] ss:$16 sps:$4 sm:$0xff]  }
 0x28d   : > { %4403 = vmatpush1.bf16.msra.mxu1 %v5821_v42 }
 0x28e   : > { %4404 = vmatprep.subr.bf16.mxu1 %v5829_v11 }
 0x28f   : > { %4344 = vmatpush2.bf16.msra.mxu0 %v5824_v51 }
 0x290   : > { %4345 = vmatprep.subr.bf16.mxu0 %v5832_v50 }
 0x291   : > { %4405 = vmatpush2.bf16.msra.mxu1 %v5827_v34 }
 0x292   : > { %4406 = vmatprep.subr.bf16.mxu1 %v5835_v13 }
 0x293   : > { %4346 = vmatpush2.bf16.msra.mxu0 %v5830_v22 }
 0x294   : > { %4347 = vmatprep.subr.bf16.mxu0 %v5838_v16 }
 0x295   : > { %4407 = vmatpush2.bf16.msra.mxu1 %v5833_v19 }
 0x296   : > { %4408 = vmatprep.subr.bf16.mxu1 %v5841_v30 }
 0x297   : > { %4348 = vmatpush2.bf16.msra.mxu0 %v5836_v31 }
 0x298   : > { %4349 = vmatprep.subr.bf16.mxu0 %v5844_v20 }
 0x299   : > { %4409 = vmatpush2.bf16.msra.mxu1 %v5839_v36 }
 0x29a   : > { %4410 = vmatprep.subr.bf16.mxu1 %v5847_v38 }
 0x29b   : > { %4350 = vmatpush2.bf16.msra.mxu0 %v5842_v53 }
 0x29c   : > { %4351 = vmatprep.subr.bf16.mxu0 %v5850_v37 }
 0x29d   : > { %4411 = vmatpush2.bf16.msra.mxu1 %v5845_v24 }
 0x29e   : > { %4412 = vmatprep.subr.bf16.mxu1 %v5853_v59 }
 0x29f   : > { %4352 = vmatpush2.bf16.msra.mxu0 %v5848_v5 }
 0x2a0   : > { %4353 = vmatprep.subr.bf16.mxu0 %v5856_v0 }
 0x2a1   : > { %4413 = vmatpush2.bf16.msra.mxu1 %v5851_v44 }
 0x2a2   : > { %4414 = vmatprep.subr.bf16.mxu1 %v5859_v35 }
 0x2a3   : > { %4354 = vmatpush2.bf16.msra.mxu0 %v5854_v45 }
 0x2a4   : > { %4355 = vmatprep.subr.bf16.mxu0 %v5862_v43 }
 0x2a5   : > { %4415 = vmatpush2.bf16.msra.mxu1 %v5857_v12 }
 0x2a6   : > { %4416 = vmatprep.subr.bf16.mxu1 %v5865_v57 }
 0x2a7   : > { %4356 = vmatpush2.bf16.msra.mxu0 %v5860_v2 }
 0x2a8   : > { %4357 = vmatprep.subr.bf16.mxu0 %v5868_v27 }
 0x2a9   : > { %4417 = vmatpush2.bf16.msra.mxu1 %v5863_v28 }
 0x2aa   : > { %4418 = vmatprep.subr.bf16.mxu1 %v5871_v17 }
 0x2ab   : > { %4358 = vmatpush2.bf16.msra.mxu0 %v5866_v26 }
 0x2ad   : > { %4419 = vmatpush2.bf16.msra.mxu1 %v5869_v41 }
 0x2ae   : > { %v3165_v42 = vpop.f32.mrf.mxu0  ;;  %4360 = vmatmul.mubr.bf16.vlgmr.msra.gmra.mxu0 %v6484_v39 }
 0x2af   : > { %v3166_v11 = vadd.f32 %v3165_v42, %v6436_v18  ;;  %4369 = vmatprep.mubr.bf16.mxu0 %v6491_v63 }
 0x2b0   : > { %v3226_v51 = vpop.f32.mrf.mxu1  ;;  %4421 = vmatmul.mubr.bf16.vlgmr.msra.gmra.mxu1 %v6494_v33  ;;  %v3167_v50 = vpop.f32.mrf.mxu0 }
 0x2b1   : > { %v6549_v34 = vadd.f32 %v3226_v51, %v3166_v11  ;;  %4430 = vmatprep.mubr.bf16.mxu1 %v6502_v9  ;;  %v3168_v13 = vadd.f32 %v3167_v50, %v6439_v10 }
 0x2b2   : > { %v3228_v22 = vpop.f32.mrf.mxu1  ;;  %v3169_v16 = vpop.f32.mrf.mxu0 }
 0x2b3   : > { %v6553_v19 = vadd.f32 %v3228_v22, %v3168_v13  ;;  %v3170_v39 = vadd.f32 %v3169_v16, %v6441_v14 }
 0x2b4   : > { %v3230_v30 = vpop.f32.mrf.mxu1  ;;  %v3171_v18 = vpop.f32.mrf.mxu0 }
 0x2b5   : > { %v6556_v31 = vadd.f32 %v3230_v30, %v3170_v39  ;;  %v3172_v63 = vadd.f32 %v3171_v18, %v6444_v15 }
 0x2b6   : > { %v3232_v33 = vpop.f32.mrf.mxu1  ;;  %v3175_v20 = vpop.f32.mrf.mxu0  ;;  %4370 = vmatmul.mubr.bf16.gmra.mxu0 %v6517_v60 }
 0x2b7   : > { %v6560_v36 = vadd.f32 %v3232_v33, %v3172_v63  ;;  %v3176_v10 = vadd.f32 %v3175_v20, %v6448_v7  ;;  %4379 = vmatprep.mubr.bf16.mxu0 %v6478_v29 }
 0x2b8   : > { %v3236_v9 = vpop.f32.mrf.mxu1  ;;  %4431 = vmatmul.mubr.bf16.gmra.mxu1 %v6524_v48  ;;  %v3177_v14 = vpop.f32.mrf.mxu0 }
 0x2b9   : > { %v6565_v38 = vadd.f32 %v3236_v9, %v3176_v10  ;;  %4440 = vmatprep.mubr.bf16.mxu1 %v6481_v32  ;;  %v3178_v15 = vadd.f32 %v3177_v14, %v6452_v3 }
 0x2ba   : > { %v3238_v53 = vpop.f32.mrf.mxu1  ;;  %v3179_v37 = vpop.f32.mrf.mxu0 }
 0x2bb   : > { %v6569_v24 = vadd.f32 %v3238_v53, %v3178_v15  ;;  %v3180_v60 = vadd.f32 %v3179_v37, %v6455_v52 }
 0x2bc   : > { %v3240_v59 = vpop.f32.mrf.mxu1  ;;  %v3181_v7 = vpop.f32.mrf.mxu0 }
 0x2bd   : > { %v6572_v5 = vadd.f32 %v3240_v59, %v3180_v60  ;;  %v3182_v29 = vadd.f32 %v3181_v7, %v6463_v21 }
 0x2be   : > { %v3242_v48 = vpop.f32.mrf.mxu1  ;;  %v3185_v0 = vpop.f32.mrf.mxu0  ;;  %4380 = vmatmul.mubr.bf16.gmra.mxu0 %v6507_v6 }
 0x2bf   : > { %v6576_v44 = vadd.f32 %v3242_v48, %v3182_v29  ;;  %v3186_v3 = vadd.f32 %v3185_v0, %v6472_v61 }
 0x2c0   : > { %v3246_v32 = vpop.f32.mrf.mxu1  ;;  %4441 = vmatmul.mubr.bf16.gmra.mxu1 %v6511_v55  ;;  %v3187_v35 = vpop.f32.mrf.mxu0 }
 0x2c1   : > { %v6580_v45 = vadd.f32 %v3246_v32, %v3186_v3  ;;  %v3188_v52 = vadd.f32 %v3187_v35, %v6475_v4 }
 0x2c2   : > { %v3248_v43 = vpop.f32.mrf.mxu1  ;;  %v3189_v12 = vpop.f32.mrf.mxu0 }
 0x2c3   : > { %v6583_v57 = vadd.f32 %v3248_v43, %v3188_v52  ;;  %v6615_v43 = vld [vmem:[#allocation9] sm:$0xf] }
 0x2c4   : > { %v3250_v21 = vpop.f32.mrf.mxu1  ;;  %v3190_v2 = vpop.f32.mrf.mxu0 }
 0x2c5   : > { %v6729_v2 = vsub.s32 0, %v6204_v62 }
 0x2c6   : > { %v3251_v27 = vpop.f32.mrf.mxu1 }
 0x2c7   : > { %v6620_v27 = vrot.slane %v6615_v43, %v6729_v2 }
 0x2ee   : > { %v3287_v6 = vpop.f32.mrf.mxu0 }
 0x2ef   : > { %v3288_v28 = vadd.f32 %v3287_v6, %v6504_v23 }
 0x2f0   : > { %v3348_v17 = vpop.f32.mrf.mxu1  ;;  %v3289_v61 = vpop.f32.mrf.mxu0 }
 0x2f1   : > { %v6586_v26 = vadd.f32 %v3348_v17, %v3288_v28  ;;  %v3290_v55 = vadd.f32 %v3289_v61, %v6509_v54  ;;  %v6730_v61 = vsub.s32 1, %v6204_v62 }
 0x2f2   : > { %v3350_v41 = vpop.f32.mrf.mxu1  ;;  %v3291_v42 = vpop.f32.mrf.mxu0 }
 0x2f3   : > { %v6589_v11 = vadd.f32 %v3350_v41, %v3290_v55  ;;  %v3292_v4 = vadd.f32 %v3291_v42, %v6513_v58  ;;  %v6627_v55 = vrot.slane %v6615_v43, %v6730_v61 }
 0x2f4   : > { %v3352_v51 = vpop.f32.mrf.mxu1  ;;  %v3293_v50 = vpop.f32.mrf.mxu0 }
 0x2f5   : > { %v6592_v13 = vadd.f32 %v3352_v51, %v3292_v4  ;;  %v3294_v22 = vadd.f32 %v3293_v50, %v6520_v40 }
 0x2f6   : > { %v3354_v16 = vpop.f32.mrf.mxu1  ;;  %v3297_v23 = vpop.f32.mrf.mxu0 }
 0x2f7   : > { %v6595_v39 = vadd.f32 %v3354_v16, %v3294_v22  ;;  %v3298_v30 = vadd.f32 %v3297_v23, %v6528_v49 }
 0x2f8   : > { %v3358_v18 = vpop.f32.mrf.mxu1  ;;  %v3299_v54 = vpop.f32.mrf.mxu0 }
 0x2f9   : > { %v6598_v63 = vadd.f32 %v3358_v18, %v3298_v30  ;;  %v3300_v33 = vadd.f32 %v3299_v54, %v6531_v1 }
 0x2fa   : > { %v3360_v20 = vpop.f32.mrf.mxu1  ;;  %v3301_v58 = vpop.f32.mrf.mxu0 }
 0x2fb   : > { %v6601_v10 = vadd.f32 %v3360_v20, %v3300_v33  ;;  %v3302_v9 = vadd.f32 %v3301_v58, %v6533_v46 }
 0x2fc   : > { %v3362_v14 = vpop.f32.mrf.mxu1  ;;  %v3303_v40 = vpop.f32.mrf.mxu0 }
 0x2fd   : > { %v6604_v15 = vadd.f32 %v3362_v14, %v3302_v9  ;;  %v3304_v53 = vadd.f32 %v3303_v40, %v6536_v47 }
 0x2fe   : > { %v3364_v37 = vpop.f32.mrf.mxu1  ;;  %v3307_v49 = vpop.f32.mrf.mxu0 }
 0x2ff   : > { %v6607_v60 = vadd.f32 %v3364_v37, %v3304_v53  ;;  %v3308_v59 = vadd.f32 %v3307_v49, %v6540_v25 }
 0x300   : > { %v3368_v7 = vpop.f32.mrf.mxu1  ;;  %v3309_v1 = vpop.f32.mrf.mxu0 }
 0x301   : > { %v6610_v29 = vadd.f32 %v3368_v7, %v3308_v59  ;;  %v3310_v48 = vadd.f32 %v3309_v1, %v6543_v56 }
 0x302   : > { %v3370_v46 = vpop.f32.mrf.mxu1  ;;  %v3311_v0 = vpop.f32.mrf.mxu0 }
 0x303   : > { %v6613_v3 = vadd.f32 %v3370_v46, %v3310_v48 }
 0x304   : > { %v3372_v32 = vpop.f32.mrf.mxu1  ;;  %v3312_v35 = vpop.f32.mrf.mxu0 }
 0x306   : > { %v3373_v47 = vpop.f32.mrf.mxu1 }
 0x32e   : > { %v4239_v52 = vpop.f32.mrf.mxu0 }
 0x330   : > { %v4300_v12 = vpop.f32.mrf.mxu1  ;;  %v4241_v21 = vpop.f32.mrf.mxu0 }
 0x331   : > { %v4301_v25 = vadd.f32 %v4300_v12, %v4239_v52 }
 0x332   : > { %v4302_v6 = vpop.f32.mrf.mxu1  ;;  %v4243_v56 = vpop.f32.mrf.mxu0 }
 0x333   : > { %v4449_v28 = vadd.f32 %v4301_v25, %v6549_v34  ;;  %v4303_v17 = vadd.f32 %v4302_v6, %v4241_v21 }
 0x334   : > { %v4304_v41 = vpop.f32.mrf.mxu1  ;;  %v4245_v42 = vpop.f32.mrf.mxu0 }
 0x335   : > { %v4491_v4 = vadd.f32 %v6620_v27, %v4449_v28  ;;  %v4450_v51 = vadd.f32 %v4303_v17, %v6553_v19  ;;  %v4305_v50 = vadd.f32 %v4304_v41, %v4243_v56 }
 0x336   : > { %v4306_v34 = vpop.f32.mrf.mxu1  ;;  %v4249_v22 = vpop.f32.mrf.mxu0 }
 0x337   : > { %v4511_v16 = vmax.f32 %v4491_v4, 0.0  ;;  %v4492_v23 = vadd.f32 %v6627_v55, %v4450_v51  ;;  %v4453_v30 = vadd.f32 %v4305_v50, %v6556_v31  ;;  %v4307_v18 = vadd.f32 %v4306_v34, %v4245_v42 }
 0x338   : > { %v4310_v54 = vpop.f32.mrf.mxu1  ;;  %v4251_v33 = vpop.f32.mrf.mxu0 }
 0x339   : > { %4531 = vst [vmem:[%s6634_s29] sm:$0xff] %v4511_v16  ;;  %v4512_v19 = vmax.f32 %v4492_v23, 0.0  ;;  %v4495_v20 = vadd.f32 %v6620_v27, %v4453_v30  ;;  %v4454_v58 = vadd.f32 %v4307_v18, %v6560_v36  ;;  %v4311_v9 = vadd.f32 %v4310_v54, %v4249_v22 }
 0x33a   : > { %v4312_v14 = vpop.f32.mrf.mxu1  ;;  %v4253_v40 = vpop.f32.mrf.mxu0 }
 0x33b   : > { %4532 = vst [vmem:[%s6634_s29 + $0x8] sm:$0xff] %v4512_v19  ;;  %v4515_v53 = vmax.f32 %v4495_v20, 0.0  ;;  %v4496_v37 = vadd.f32 %v6627_v55, %v4454_v58  ;;  %v4457_v31 = vadd.f32 %v4311_v9, %v6565_v38  ;;  %v4313_v49 = vadd.f32 %v4312_v14, %v4251_v33 }
 0x33c   : > { %v4314_v59 = vpop.f32.mrf.mxu1  ;;  %v4255_v7 = vpop.f32.mrf.mxu0 }
 0x33d   : > { %4535 = vst [vmem:[%s6634_s29 + $0x20] sm:$0xff] %v4515_v53  ;;  %v4516_v1 = vmax.f32 %v4496_v37, 0.0  ;;  %v4499_v48 = vadd.f32 %v6620_v27, %v4457_v31  ;;  %v4458_v46 = vadd.f32 %v4313_v49, %v6569_v24  ;;  %v4315_v36 = vadd.f32 %v4314_v59, %v4253_v40 }
 0x33e   : > { %v4316_v0 = vpop.f32.mrf.mxu1  ;;  %v4259_v32 = vpop.f32.mrf.mxu0 }
 0x33f   : > { %4536 = vst [vmem:[%s6634_s29 + $0x28] sm:$0xff] %v4516_v1  ;;  %v4500_v35 = vadd.f32 %v6627_v55, %v4458_v46  ;;  %v4461_v47 = vadd.f32 %v4315_v36, %v6572_v5  ;;  %v4317_v52 = vadd.f32 %v4316_v0, %v4255_v7  ;;  %v4519_v21 = vmax.f32 %v4499_v48, 0.0 }
 0x340   : > { %v4320_v12 = vpop.f32.mrf.mxu1  ;;  %v4261_v38 = vpop.f32.mrf.mxu0  ;;  %v6674_v1 = vrot.slane %v6615_v43, %v1046_v8 }
 0x341   : > { %v4503_v25 = vadd.f32 %v6620_v27, %v4461_v47  ;;  %v4462_v2 = vadd.f32 %v4317_v52, %v6576_v44  ;;  %v4321_v6 = vadd.f32 %v4320_v12, %v4259_v32  ;;  %v4520_v24 = vmax.f32 %v4500_v35, 0.0 }
 0x342   : > { %v4322_v56 = vpop.f32.mrf.mxu1  ;;  %v4263_v28 = vpop.f32.mrf.mxu0  ;;  %v4552_v51 = vrot.slane %v4519_v21, 1 }
 0x343   : > { %v4523_v17 = vmax.f32 %v4503_v25, 0.0  ;;  %v4504_v61 = vadd.f32 %v6627_v55, %v4462_v2  ;;  %v4323_v41 = vadd.f32 %v4322_v56, %v4261_v38  ;;  %v4465_v42 = vadd.f32 %v4321_v6, %v6580_v45 }
 0x344   : > { %v4324_v5 = vpop.f32.mrf.mxu1  ;;  %v4264_v4 = vpop.f32.mrf.mxu0  ;;  %v4555_v23 = vrot.slane %v4520_v24, 1 }
 0x345   : > { %v4553_v50 = vrot.slane %v4523_v17, 1  ;;  %v4524_v34 = vmax.f32 %v4504_v61, 0.0  ;;  %v4466_v44 = vadd.f32 %v4323_v41, %v6583_v57  ;;  %v4507_v22 = vadd.f32 %v6620_v27, %v4465_v42 }
 0x346   : > { %v4325_v16 = vpop.f32.mrf.mxu1 }
 0x347   : > { %v4554_v30 = vsel %vm3532_vm5, %v4552_v51, %v4553_v50  ;;  %v4556_v18 = vrot.slane %v4524_v34, 1  ;;  %v4508_v54 = vadd.f32 %v6627_v55, %v4466_v44  ;;  %v4527_v45 = vmax.f32 %v4507_v22, 0.0 }
 0x348   : > { %5159 = vst [vmem:[%s6634_s29 + $0x40] sm:$0xff] %v4554_v30  ;;  %v6731_v55 = vsub.s32 2, %v6204_v62 }
 0x349   : > { %v4557_v33 = vsel %vm3532_vm5, %v4555_v23, %v4556_v18  ;;  %v4528_v19 = vmax.f32 %v4508_v54, 0.0  ;;  %v4564_v20 = vrot.slane %v4527_v45, 1 }
 0x34a   : > { %5160 = vst [vmem:[%s6634_s29 + $0x48] sm:$0xff] %v4557_v33  ;;  %v6668_v37 = vrot.slane %v6615_v43, %v6731_v55 }
 0x34b   : > { %v4566_v58 = vrot.slane %v4528_v19, 1  ;;  %v4565_v57 = vsel %vm3532_vm5, %v4553_v50, %v4564_v20 }
 0x34c   : > { %5163 = vst [vmem:[%s6634_s29 + $0x60] sm:$0xff] %v4565_v57 }
 0x34d   : > { %v4567_v27 = vsel %vm3532_vm5, %v4556_v18, %v4566_v58 }
 0x34e   : > { %5164 = vst [vmem:[%s6634_s29 + $0x68] sm:$0xff] %v4567_v27 }
 0x36e   : > { %v4361_v9 = vpop.f32.mrf.mxu0 }
 0x370   : > { %v4422_v14 = vpop.f32.mrf.mxu1  ;;  %v4363_v40 = vpop.f32.mrf.mxu0 }
 0x371   : > { %v4423_v53 = vadd.f32 %v4422_v14, %v4361_v9 }
 0x372   : > { %v4424_v31 = vpop.f32.mrf.mxu1  ;;  %v4365_v49 = vpop.f32.mrf.mxu0 }
 0x373   : > { %v4451_v59 = vadd.f32 %v4423_v53, %v6586_v26  ;;  %v4425_v7 = vadd.f32 %v4424_v31, %v4363_v40 }
 0x374   : > { %v4426_v48 = vpop.f32.mrf.mxu1  ;;  %v4367_v46 = vpop.f32.mrf.mxu0 }
 0x375   : > { %v4493_v36 = vadd.f32 %v6668_v37, %v4451_v59  ;;  %v4452_v0 = vadd.f32 %v4425_v7, %v6589_v11  ;;  %v4427_v32 = vadd.f32 %v4426_v48, %v4365_v49 }
 0x376   : > { %v4428_v35 = vpop.f32.mrf.mxu1  ;;  %v4371_v47 = vpop.f32.mrf.mxu0 }
 0x377   : > { %v4513_v52 = vmax.f32 %v4493_v36, 0.0  ;;  %v4494_v26 = vadd.f32 %v6674_v1, %v4452_v0  ;;  %v4455_v12 = vadd.f32 %v4427_v32, %v6592_v13  ;;  %v4429_v38 = vadd.f32 %v4428_v35, %v4367_v46 }
 0x378   : > { %v4432_v62 = vpop.f32.mrf.mxu1  ;;  %v4373_v8 = vpop.f32.mrf.mxu0 }
 0x379   : > { %4533 = vst [vmem:[%s6634_s29 + $0x10] sm:$0xff] %v4513_v52  ;;  %v4514_v43 = vmax.f32 %v4494_v26, 0.0  ;;  %v4497_v21 = vadd.f32 %v6668_v37, %v4455_v12  ;;  %v4456_v25 = vadd.f32 %v4429_v38, %v6595_v39  ;;  %v4433_v11 = vadd.f32 %v4432_v62, %v4371_v47 }
 0x37a   : > { %v4434_v2 = vpop.f32.mrf.mxu1  ;;  %v4375_v6 = vpop.f32.mrf.mxu0 }
 0x37b   : > { %4534 = vst [vmem:[%s6634_s29 + $0x18] sm:$0xff] %v4514_v43  ;;  %v4517_v56 = vmax.f32 %v4497_v21, 0.0  ;;  %v4498_v28 = vadd.f32 %v6674_v1, %v4456_v25  ;;  %v4459_v13 = vadd.f32 %v4433_v11, %v6598_v63  ;;  %v4435_v24 = vadd.f32 %v4434_v2, %v4373_v8 }
 0x37c   : > { %v4436_v17 = vpop.f32.mrf.mxu1  ;;  %v4377_v61 = vpop.f32.mrf.mxu0 }
 0x37d   : > { %4537 = vst [vmem:[%s6634_s29 + $0x30] sm:$0xff] %v4517_v56  ;;  %v4518_v41 = vmax.f32 %v4498_v28, 0.0  ;;  %v4501_v42 = vadd.f32 %v6668_v37, %v4459_v13  ;;  %v4460_v5 = vadd.f32 %v4435_v24, %v6601_v10  ;;  %v4437_v39 = vadd.f32 %v4436_v17, %v4375_v6 }
 0x37e   : > { %v4438_v4 = vpop.f32.mrf.mxu1  ;;  %v4381_v51 = vpop.f32.mrf.mxu0 }
 0x37f   : > { %4538 = vst [vmem:[%s6634_s29 + $0x38] sm:$0xff] %v4518_v41  ;;  %v4502_v50 = vadd.f32 %v6674_v1, %v4460_v5  ;;  %v4463_v34 = vadd.f32 %v4437_v39, %v6604_v15  ;;  %v4439_v44 = vadd.f32 %v4438_v4, %v4377_v61  ;;  %v4521_v16 = vmax.f32 %v4501_v42, 0.0 }
 0x380   : > { %v4442_v22 = vpop.f32.mrf.mxu1  ;;  %v4383_v63 = vpop.f32.mrf.mxu0 }
 0x381   : > { %v4505_v23 = vadd.f32 %v6668_v37, %v4463_v34  ;;  %v4464_v30 = vadd.f32 %v4439_v44, %v6607_v60  ;;  %v4443_v18 = vadd.f32 %v4442_v22, %v4381_v51  ;;  %v4522_v10 = vmax.f32 %v4502_v50, 0.0 }
 0x382   : > { %v4444_v54 = vpop.f32.mrf.mxu1  ;;  %v4385_v45 = vpop.f32.mrf.mxu0  ;;  %v4558_v27 = vrot.slane %v4521_v16, 1 }
 0x383   : > { %v4525_v33 = vmax.f32 %v4505_v23, 0.0  ;;  %v4506_v19 = vadd.f32 %v6674_v1, %v4464_v30  ;;  %v4445_v20 = vadd.f32 %v4444_v54, %v4383_v63  ;;  %v4467_v58 = vadd.f32 %v4443_v18, %v6610_v29 }
 0x384   : > { %v4446_v15 = vpop.f32.mrf.mxu1  ;;  %v4386_v57 = vpop.f32.mrf.mxu0  ;;  %v4561_v55 = vrot.slane %v4522_v10, 1 }
 0x385   : > { %v4559_v9 = vrot.slane %v4525_v33, 1  ;;  %v4526_v14 = vmax.f32 %v4506_v19, 0.0  ;;  %v4468_v60 = vadd.f32 %v4445_v20, %v6613_v3  ;;  %v4509_v40 = vadd.f32 %v6668_v37, %v4467_v58 }
 0x386   : > { %v4447_v53 = vpop.f32.mrf.mxu1 }
 0x387   : > { %v4560_v31 = vsel %vm3532_vm5, %v4558_v27, %v4559_v9  ;;  %v4562_v49 = vrot.slane %v4526_v14, 1  ;;  %v4510_v59 = vadd.f32 %v6674_v1, %v4468_v60  ;;  %v4529_v29 = vmax.f32 %v4509_v40, 0.0 }
 0x388   : > { %5161 = vst [vmem:[%s6634_s29 + $0x50] sm:$0xff] %v4560_v31 }
 0x389   : > { %v4563_v7 = vsel %vm3532_vm5, %v4561_v55, %v4562_v49  ;;  %v4530_v48 = vmax.f32 %v4510_v59, 0.0  ;;  %v4568_v46 = vrot.slane %v4529_v29, 1 }
 0x38a   : > { %5162 = vst [vmem:[%s6634_s29 + $0x58] sm:$0xff] %v4563_v7 }
 0x38b   : > { %v4570_v36 = vrot.slane %v4530_v48, 1  ;;  %v4569_v3 = vsel %vm3532_vm5, %v4559_v9, %v4568_v46 }
 0x38c   : > { %5165 = vst [vmem:[%s6634_s29 + $0x70] sm:$0xff] %v4569_v3 }
 0x38d   : > { %v4571_v37 = vsel %vm3532_vm5, %v4562_v49, %v4570_v36 }
 0x38e   : > { %5166 = vst [vmem:[%s6634_s29 + $0x78] sm:$0xff] %v4571_v37 }
 0x38f PF: > { %s18_s18 = sadd.s32 1, %s5998_s18  }
 0x390   : > { %p15_p2 = scmp.ge.s32.totalorder %s18_s18, 4  }
 0x392   :  { %17 = sbr.rel (!%p15_p2) target bundleno = 3 (0x3), region = 95 }
 0x397   :  { %4613 = vsyncpa [#allocation5], 1 }
 0x398   :  { %4615 = vsyncpa [#allocation5 + $0x1], 1 }
 0x399   :  { %4616 = vsyncpa [#allocation7], 1 }
 0x39a   :  { %4617 = vsyncpa [#allocation10], 1 }

</bundles_post_ra>
